<compile_context>
chip_gen: v6e
topology: v6e:2x2x1
jax: 0.10.0
libtpu: 0.0.40
codegen_flags: <defaults>
</compile_context>

<pallas_src>
import functools

import jax
import jax.numpy as jnp
from jax import lax
from jax.experimental import pallas as pl
from jax.experimental.pallas import tpu as pltpu


def _make_kernel(D, H, W, Cin, Cout, Wp, groups, eps):
    DH = D * H
    WC = Wp * Cin            # lane width of one (Hp-row) slab
    WCout = W * Cout         # lane width of the output
    cpg = Cout // groups
    inv_n = 1.0 / float(D * H * W * cpg)

    def kernel(x_ref, w_ref, b_ref, gamma_ref, beta_ref, g2_ref, g2t_ref,
               alpha_ref, o_ref, xkh_ref, col_ref, acc_ref):
        # x_ref   : (1, Dp, Hp, Wp*Cin) bf16  padded input, channels folded into lanes
        # w_ref   : (9*Wp*Cin, W*Cout)  bf16  banded conv weights (kw folded in)
        # b/gamma/beta_ref : (1, W*Cout) f32  per-lane (channel tiled W times)
        # g2_ref  : (W*Cout, G) f32, g2t_ref : (G, W*Cout) f32  group membership
        # alpha_ref: (1,) f32 in SMEM
        # o_ref   : (1, D*H, W*Cout) f32      lane-dense output view

        # --- hoist the sublane-crossing kh shift: 3 relayout copies, not 27 ---
        for kh in range(3):
            xkh_ref[kh] = x_ref[0, :, kh:kh + H, :]

        # --- im2col: fold (kd, kh) into the contraction dim (kd slices are leading-dim,
        #     i.e. free; kw is handled by the banded weight matrix) ---
        for kd in range(3):
            for kh in range(3):
                j = kd * 3 + kh
                slab = xkh_ref[kh, kd:kd + D, :, :].reshape(DH, WC)
                col_ref[:, j * WC:(j + 1) * WC] = slab

        # --- ONE (D*H, 9*Wp*Cin) @ (9*Wp*Cin, W*Cout) bf16 matmul, f32 accumulation ---
        acc_ref[...] = jnp.dot(col_ref[...], w_ref[...],
                               preferred_element_type=jnp.float32) + b_ref[...]
        acc = acc_ref[...]

        # --- GroupNorm(groups, Cout): statistics via MXU matmuls ---
        ones_r = jnp.ones((1, DH), jnp.float32)
        col_sum = jnp.dot(ones_r, acc, preferred_element_type=jnp.float32)        # (1, W*Cout)
        col_sq = jnp.dot(ones_r, acc * acc, preferred_element_type=jnp.float32)   # (1, W*Cout)
        g_sum = jnp.dot(col_sum, g2_ref[...], preferred_element_type=jnp.float32)  # (1, G)
        g_sq = jnp.dot(col_sq, g2_ref[...], preferred_element_type=jnp.float32)    # (1, G)
        mean_g = g_sum * inv_n
        # E[x^2] - E[x]^2 in f32; fine at these scales (see review note).
        var_g = g_sq * inv_n - mean_g * mean_g
        rstd_g = lax.rsqrt(var_g + eps)
        mean_l = jnp.dot(mean_g, g2t_ref[...], preferred_element_type=jnp.float32)  # (1, W*Cout)
        rstd_l = jnp.dot(rstd_g, g2t_ref[...], preferred_element_type=jnp.float32)  # (1, W*Cout)

        # folded affine: y = acc * (gamma*rstd) + (beta - mean*gamma*rstd)
        scale = gamma_ref[...] * rstd_l
        shift = beta_ref[...] - mean_l * scale
        y = acc * scale + shift

        # --- PReLU (single shared parameter), alpha from SMEM ---
        alpha = alpha_ref[0]
        y = jnp.where(y > 0, y, alpha * y)

        o_ref[...] = y.reshape(1, DH, WCout).astype(o_ref.dtype)

    return kernel


@functools.partial(jax.jit, static_argnames=("groups", "eps"))
def up_conv_pallas(x, weight, bias, gamma, beta, alpha, *, groups=16, eps=1e-5):
    """x: (N, D, H, W, Cin); weight: (3, 3, 3, Cin, Cout) (DHWIO)."""
    N, D, H, W, Cin = x.shape
    Cout = weight.shape[-1]
    cpg = Cout // groups
    Dp, Hp, Wp = D + 2, H + 2, W + 2
    WC = Wp * Cin
    DH = D * H
    WCout = W * Cout

    # bf16 input, padded, with (W, Cin) flattened into the lane axis.
    xp = jnp.pad(x.astype(jnp.bfloat16), ((0, 0), (1, 1), (1, 1), (1, 1), (0, 0)))
    xp = xp.reshape(N, Dp, Hp, WC)

    # Banded weight matrix: wb[(kd*3+kh)*Wp*Cin + wp*Cin + c, w*Cout + o]
    #   = weight[kd, kh, wp - w, c, o]  if 0 <= wp - w <= 2 else 0
    wb6 = jnp.zeros((3, 3, Wp, Cin, W, Cout), weight.dtype)
    for w in range(W):
        wb6 = wb6.at[:, :, w:w + 3, :, w, :].set(weight)
    wb = wb6.reshape(9 * WC, WCout).astype(jnp.bfloat16)

    # Per-lane (channel tiled W times) vectors.
    bias_l = jnp.tile(bias.astype(jnp.float32), W).reshape(1, WCout)
    gamma_l = jnp.tile(gamma.astype(jnp.float32), W).reshape(1, WCout)
    beta_l = jnp.tile(beta.astype(jnp.float32), W).reshape(1, WCout)

    # Group membership (lane -> group) matrices for MXU group reductions.
    lane_grp = jnp.tile(jnp.arange(Cout) // cpg, W)                       # (W*Cout,)
    g2 = (lane_grp[:, None] == jnp.arange(groups)[None, :]).astype(jnp.float32)  # (W*Cout, G)
    g2t = g2.T                                                            # (G, W*Cout)

    alpha_s = jnp.asarray(alpha, jnp.float32).reshape(1)

    kernel = _make_kernel(D, H, W, Cin, Cout, Wp, groups, eps)

    out = pl.pallas_call(
        kernel,
        out_shape=jax.ShapeDtypeStruct((N, DH, WCout), jnp.float32),
        grid_spec=pltpu.PrefetchScalarGridSpec(
            num_scalar_prefetch=0,
            grid=(N,),
            in_specs=[
                pl.BlockSpec((1, Dp, Hp, WC), lambda n: (n, 0, 0, 0)),
                pl.BlockSpec((9 * WC, WCout), lambda n: (0, 0)),
                pl.BlockSpec((1, WCout), lambda n: (0, 0)),
                pl.BlockSpec((1, WCout), lambda n: (0, 0)),
                pl.BlockSpec((1, WCout), lambda n: (0, 0)),
                pl.BlockSpec((WCout, groups), lambda n: (0, 0)),
                pl.BlockSpec((groups, WCout), lambda n: (0, 0)),
                pl.BlockSpec(memory_space=pltpu.MemorySpace.SMEM),
            ],
            out_specs=pl.BlockSpec((1, DH, WCout), lambda n: (n, 0, 0)),
            scratch_shapes=[
                pltpu.VMEM((3, Dp, H, WC), jnp.bfloat16),   # kh-shifted slabs
                pltpu.VMEM((DH, 9 * WC), jnp.bfloat16),     # im2col (A matrix)
                pltpu.VMEM((DH, WCout), jnp.float32),       # conv accumulator
            ],
        ),
        compiler_params=pltpu.CompilerParams(
            dimension_semantics=("parallel",),
            vmem_limit_bytes=32 * 1024 * 1024,
        ),
    )(xp, wb, bias_l, gamma_l, beta_l, g2, g2t, alpha_s)

    # (N, D*H, W*Cout) is the same row-major bytes as (N, D, H, W, Cout).
    return out.reshape(N, D, H, W, Cout)


def up_conv_ref(x, weight, bias, gamma, beta, alpha, *, groups=16, eps=1e-5):
    """Plain-JAX f32 reference (same NDHWC layout)."""
    N, D, H, W, Cin = x.shape
    Cout = weight.shape[-1]
    xp = jnp.pad(x, ((0, 0), (1, 1), (1, 1), (1, 1), (0, 0)))
    out = jnp.zeros((N, D, H, W, Cout), jnp.float32)
    for kd in range(3):
        for kh in range(3):
            for kw in range(3):
                patch = xp[:, kd:kd + D, kh:kh + H, kw:kw + W, :]
                out = out + jnp.einsum(
                    "ndhwi,io->ndhwo", patch, weight[kd, kh, kw],
                    preferred_element_type=jnp.float32)
    out = out + bias
    cpg = Cout // groups
    og = out.reshape(N, D, H, W, groups, cpg)
    mean = og.mean(axis=(1, 2, 3, 5), keepdims=True)
    var = ((og - mean) ** 2).mean(axis=(1, 2, 3, 5), keepdims=True)
    og = (og - mean) / jnp.sqrt(var + eps)
    out = og.reshape(N, D, H, W, Cout) * gamma + beta
    return jnp.where(out > 0, out, alpha * out)


if __name__ == "__main__":
    # small shapes consistent with the module: GroupNorm(16, out_ch) needs out_ch % 16 == 0
    N, Cin, Cout = 2, 16, 32
    D = H = W = 8

    key = jax.random.PRNGKey(0)
    kx, kw, kb, kg, kbe = jax.random.split(key, 5)
    x = jax.random.normal(kx, (N, D, H, W, Cin), jnp.float32)
    weight = 0.05 * jax.random.normal(kw, (3, 3, 3, Cin, Cout), jnp.float32)  # DHWIO
    bias = 0.1 * jax.random.normal(kb, (Cout,), jnp.float32)
    gamma = 1.0 + 0.1 * jax.random.normal(kg, (Cout,), jnp.float32)
    beta = 0.1 * jax.random.normal(kbe, (Cout,), jnp.float32)
    alpha = jnp.float32(0.25)  # PReLU default init

    out = up_conv_pallas(x, weight, bias, gamma, beta, alpha)
    out = jax.block_until_ready(out)

    ref = up_conv_ref(x, weight, bias, gamma, beta, alpha)
    assert out.shape == (N, D, H, W, Cout)
    max_err = float(jnp.max(jnp.abs(out - ref)))
    assert max_err < 5e-2, f"max abs error too large: {max_err}"

    print("KERNEL_OK")
</pallas_src>

<mosaic_0001>
module attributes {stable_mosaic.version = 11 : i64} {
  func.func @kernel(%arg0: i32, %arg1: memref<1x10x10x160xbf16, #tpu.memory_space<vmem>>, %arg2: memref<1440x256xbf16, #tpu.memory_space<vmem>>, %arg3: memref<1x256xf32, #tpu.memory_space<vmem>>, %arg4: memref<1x256xf32, #tpu.memory_space<vmem>>, %arg5: memref<1x256xf32, #tpu.memory_space<vmem>>, %arg6: memref<256x16xf32, #tpu.memory_space<vmem>>, %arg7: memref<16x256xf32, #tpu.memory_space<vmem>>, %arg8: memref<1xf32, #tpu.memory_space<smem>>, %arg9: memref<1x64x256xf32, #tpu.memory_space<vmem>>, %arg10: memref<3x10x8x160xbf16, #tpu.memory_space<vmem>>, %arg11: memref<64x1440xbf16, #tpu.memory_space<vmem>>, %arg12: memref<64x256xf32, #tpu.memory_space<vmem>>) attributes {dimension_semantics = [#tpu.dimension_semantics<parallel>], iteration_bounds = array<i64: 2>, scalar_prefetch = 0 : i64, scratch_operands = 3 : i64, tpu.core_type = #tpu.core_type<tc>, window_params = [{transform_indices = @transform_0, window_bounds = array<i64: 1, 10, 10, 160>}, {pipeline_mode = #tpu.pipeline_mode<synchronous>, transform_indices = @transform_1, window_bounds = array<i64: 1440, 256>}, {pipeline_mode = #tpu.pipeline_mode<synchronous>, transform_indices = @transform_2, window_bounds = array<i64: 1, 256>}, {pipeline_mode = #tpu.pipeline_mode<synchronous>, transform_indices = @transform_3, window_bounds = array<i64: 1, 256>}, {pipeline_mode = #tpu.pipeline_mode<synchronous>, transform_indices = @transform_4, window_bounds = array<i64: 1, 256>}, {pipeline_mode = #tpu.pipeline_mode<synchronous>, transform_indices = @transform_5, window_bounds = array<i64: 256, 16>}, {pipeline_mode = #tpu.pipeline_mode<synchronous>, transform_indices = @transform_6, window_bounds = array<i64: 16, 256>}, {transform_indices = @transform_7, window_bounds = array<i64: 1>}, {transform_indices = @transform_8, window_bounds = array<i64: 1, 64, 256>}]} {
    %c0 = arith.constant 0 : index
    %c0_0 = arith.constant 0 : index
    %c0_1 = arith.constant 0 : index
    %c0_2 = arith.constant 0 : index
    %0 = vector.load %arg1[%c0, %c0_0, %c0_1, %c0_2] : memref<1x10x10x160xbf16, #tpu.memory_space<vmem>>, vector<1x10x8x160xbf16>
    %1 = vector.shape_cast %0 : vector<1x10x8x160xbf16> to vector<10x8x160xbf16>
    %c0_3 = arith.constant 0 : index
    %c0_4 = arith.constant 0 : index
    %c0_5 = arith.constant 0 : index
    %c0_6 = arith.constant 0 : index
    %2 = vector.load %arg10[%c0_3, %c0_4, %c0_5, %c0_6] : memref<3x10x8x160xbf16, #tpu.memory_space<vmem>>, vector<1x10x8x160xbf16>
    %3 = vector.shape_cast %2 : vector<1x10x8x160xbf16> to vector<10x8x160xbf16>
    %4 = vector.shape_cast %1 : vector<10x8x160xbf16> to vector<1x10x8x160xbf16>
    tpu.vector_store %arg10[%c0_3, %c0_4, %c0_5, %c0_6], %4 {strides = array<i32>} : memref<3x10x8x160xbf16, #tpu.memory_space<vmem>>, vector<1x10x8x160xbf16>,
    %c0_7 = arith.constant 0 : index
    %c0_8 = arith.constant 0 : index
    %c1 = arith.constant 1 : index
    %c0_9 = arith.constant 0 : index
    %5 = vector.load %arg1[%c0_7, %c0_8, %c1, %c0_9] : memref<1x10x10x160xbf16, #tpu.memory_space<vmem>>, vector<1x10x8x160xbf16>
    %6 = vector.shape_cast %5 : vector<1x10x8x160xbf16> to vector<10x8x160xbf16>
    %c1_10 = arith.constant 1 : index
    %c0_11 = arith.constant 0 : index
    %c0_12 = arith.constant 0 : index
    %c0_13 = arith.constant 0 : index
    %7 = vector.load %arg10[%c1_10, %c0_11, %c0_12, %c0_13] : memref<3x10x8x160xbf16, #tpu.memory_space<vmem>>, vector<1x10x8x160xbf16>
    %8 = vector.shape_cast %7 : vector<1x10x8x160xbf16> to vector<10x8x160xbf16>
    %9 = vector.shape_cast %6 : vector<10x8x160xbf16> to vector<1x10x8x160xbf16>
    tpu.vector_store %arg10[%c1_10, %c0_11, %c0_12, %c0_13], %9 {strides = array<i32>} : memref<3x10x8x160xbf16, #tpu.memory_space<vmem>>, vector<1x10x8x160xbf16>,
    %c0_14 = arith.constant 0 : index
    %c0_15 = arith.constant 0 : index
    %c2 = arith.constant 2 : index
    %c0_16 = arith.constant 0 : index
    %10 = vector.load %arg1[%c0_14, %c0_15, %c2, %c0_16] : memref<1x10x10x160xbf16, #tpu.memory_space<vmem>>, vector<1x10x8x160xbf16>
    %11 = vector.shape_cast %10 : vector<1x10x8x160xbf16> to vector<10x8x160xbf16>
    %c2_17 = arith.constant 2 : index
    %c0_18 = arith.constant 0 : index
    %c0_19 = arith.constant 0 : index
    %c0_20 = arith.constant 0 : index
    %12 = vector.load %arg10[%c2_17, %c0_18, %c0_19, %c0_20] : memref<3x10x8x160xbf16, #tpu.memory_space<vmem>>, vector<1x10x8x160xbf16>
    %13 = vector.shape_cast %12 : vector<1x10x8x160xbf16> to vector<10x8x160xbf16>
    %14 = vector.shape_cast %11 : vector<10x8x160xbf16> to vector<1x10x8x160xbf16>
    tpu.vector_store %arg10[%c2_17, %c0_18, %c0_19, %c0_20], %14 {strides = array<i32>} : memref<3x10x8x160xbf16, #tpu.memory_space<vmem>>, vector<1x10x8x160xbf16>,
    %c0_21 = arith.constant 0 : index
    %c0_22 = arith.constant 0 : index
    %c0_23 = arith.constant 0 : index
    %c0_24 = arith.constant 0 : index
    %15 = vector.load %arg10[%c0_21, %c0_22, %c0_23, %c0_24] : memref<3x10x8x160xbf16, #tpu.memory_space<vmem>>, vector<1x8x8x160xbf16>
    %16 = vector.shape_cast %15 : vector<1x8x8x160xbf16> to vector<8x8x160xbf16>
    %17 = vector.shape_cast %16 : vector<8x8x160xbf16> to vector<64x160xbf16>
    %c0_25 = arith.constant 0 : index
    %c0_26 = arith.constant 0 : index
    %18 = vector.load %arg11[%c0_25, %c0_26] : memref<64x1440xbf16, #tpu.memory_space<vmem>>, vector<64x160xbf16>
    tpu.vector_store %arg11[%c0_25, %c0_26], %17 {strides = array<i32>} : memref<64x1440xbf16, #tpu.memory_space<vmem>>, vector<64x160xbf16>,
    %c1_27 = arith.constant 1 : index
    %c0_28 = arith.constant 0 : index
    %c0_29 = arith.constant 0 : index
    %c0_30 = arith.constant 0 : index
    %19 = vector.load %arg10[%c1_27, %c0_28, %c0_29, %c0_30] : memref<3x10x8x160xbf16, #tpu.memory_space<vmem>>, vector<1x8x8x160xbf16>
    %20 = vector.shape_cast %19 : vector<1x8x8x160xbf16> to vector<8x8x160xbf16>
    %21 = vector.shape_cast %20 : vector<8x8x160xbf16> to vector<64x160xbf16>
    %c0_31 = arith.constant 0 : index
    %c160 = arith.constant 160 : index
    %22 = vector.load %arg11[%c0_31, %c160] : memref<64x1440xbf16, #tpu.memory_space<vmem>>, vector<64x160xbf16>
    tpu.vector_store %arg11[%c0_31, %c160], %21 {strides = array<i32>} : memref<64x1440xbf16, #tpu.memory_space<vmem>>, vector<64x160xbf16>,
    %c2_32 = arith.constant 2 : index
    %c0_33 = arith.constant 0 : index
    %c0_34 = arith.constant 0 : index
    %c0_35 = arith.constant 0 : index
    %23 = vector.load %arg10[%c2_32, %c0_33, %c0_34, %c0_35] : memref<3x10x8x160xbf16, #tpu.memory_space<vmem>>, vector<1x8x8x160xbf16>
    %24 = vector.shape_cast %23 : vector<1x8x8x160xbf16> to vector<8x8x160xbf16>
    %25 = vector.shape_cast %24 : vector<8x8x160xbf16> to vector<64x160xbf16>
    %c0_36 = arith.constant 0 : index
    %c320 = arith.constant 320 : index
    %26 = vector.load %arg11[%c0_36, %c320] : memref<64x1440xbf16, #tpu.memory_space<vmem>>, vector<64x160xbf16>
    tpu.vector_store %arg11[%c0_36, %c320], %25 {strides = array<i32>} : memref<64x1440xbf16, #tpu.memory_space<vmem>>, vector<64x160xbf16>,
    %c0_37 = arith.constant 0 : index
    %c1_38 = arith.constant 1 : index
    %c0_39 = arith.constant 0 : index
    %c0_40 = arith.constant 0 : index
    %27 = vector.load %arg10[%c0_37, %c1_38, %c0_39, %c0_40] : memref<3x10x8x160xbf16, #tpu.memory_space<vmem>>, vector<1x8x8x160xbf16>
    %28 = vector.shape_cast %27 : vector<1x8x8x160xbf16> to vector<8x8x160xbf16>
    %29 = vector.shape_cast %28 : vector<8x8x160xbf16> to vector<64x160xbf16>
    %c0_41 = arith.constant 0 : index
    %c480 = arith.constant 480 : index
    %30 = vector.load %arg11[%c0_41, %c480] : memref<64x1440xbf16, #tpu.memory_space<vmem>>, vector<64x160xbf16>
    tpu.vector_store %arg11[%c0_41, %c480], %29 {strides = array<i32>} : memref<64x1440xbf16, #tpu.memory_space<vmem>>, vector<64x160xbf16>,
    %c1_42 = arith.constant 1 : index
    %c1_43 = arith.constant 1 : index
    %c0_44 = arith.constant 0 : index
    %c0_45 = arith.constant 0 : index
    %31 = vector.load %arg10[%c1_42, %c1_43, %c0_44, %c0_45] : memref<3x10x8x160xbf16, #tpu.memory_space<vmem>>, vector<1x8x8x160xbf16>
    %32 = vector.shape_cast %31 : vector<1x8x8x160xbf16> to vector<8x8x160xbf16>
    %33 = vector.shape_cast %32 : vector<8x8x160xbf16> to vector<64x160xbf16>
    %c0_46 = arith.constant 0 : index
    %c640 = arith.constant 640 : index
    %34 = vector.load %arg11[%c0_46, %c640] : memref<64x1440xbf16, #tpu.memory_space<vmem>>, vector<64x160xbf16>
    tpu.vector_store %arg11[%c0_46, %c640], %33 {strides = array<i32>} : memref<64x1440xbf16, #tpu.memory_space<vmem>>, vector<64x160xbf16>,
    %c2_47 = arith.constant 2 : index
    %c1_48 = arith.constant 1 : index
    %c0_49 = arith.constant 0 : index
    %c0_50 = arith.constant 0 : index
    %35 = vector.load %arg10[%c2_47, %c1_48, %c0_49, %c0_50] : memref<3x10x8x160xbf16, #tpu.memory_space<vmem>>, vector<1x8x8x160xbf16>
    %36 = vector.shape_cast %35 : vector<1x8x8x160xbf16> to vector<8x8x160xbf16>
    %37 = vector.shape_cast %36 : vector<8x8x160xbf16> to vector<64x160xbf16>
    %c0_51 = arith.constant 0 : index
    %c800 = arith.constant 800 : index
    %38 = vector.load %arg11[%c0_51, %c800] : memref<64x1440xbf16, #tpu.memory_space<vmem>>, vector<64x160xbf16>
    tpu.vector_store %arg11[%c0_51, %c800], %37 {strides = array<i32>} : memref<64x1440xbf16, #tpu.memory_space<vmem>>, vector<64x160xbf16>,
    %c0_52 = arith.constant 0 : index
    %c2_53 = arith.constant 2 : index
    %c0_54 = arith.constant 0 : index
    %c0_55 = arith.constant 0 : index
    %39 = vector.load %arg10[%c0_52, %c2_53, %c0_54, %c0_55] : memref<3x10x8x160xbf16, #tpu.memory_space<vmem>>, vector<1x8x8x160xbf16>
    %40 = vector.shape_cast %39 : vector<1x8x8x160xbf16> to vector<8x8x160xbf16>
    %41 = vector.shape_cast %40 : vector<8x8x160xbf16> to vector<64x160xbf16>
    %c0_56 = arith.constant 0 : index
    %c960 = arith.constant 960 : index
    %42 = vector.load %arg11[%c0_56, %c960] : memref<64x1440xbf16, #tpu.memory_space<vmem>>, vector<64x160xbf16>
    tpu.vector_store %arg11[%c0_56, %c960], %41 {strides = array<i32>} : memref<64x1440xbf16, #tpu.memory_space<vmem>>, vector<64x160xbf16>,
    %c1_57 = arith.constant 1 : index
    %c2_58 = arith.constant 2 : index
    %c0_59 = arith.constant 0 : index
    %c0_60 = arith.constant 0 : index
    %43 = vector.load %arg10[%c1_57, %c2_58, %c0_59, %c0_60] : memref<3x10x8x160xbf16, #tpu.memory_space<vmem>>, vector<1x8x8x160xbf16>
    %44 = vector.shape_cast %43 : vector<1x8x8x160xbf16> to vector<8x8x160xbf16>
    %45 = vector.shape_cast %44 : vector<8x8x160xbf16> to vector<64x160xbf16>
    %c0_61 = arith.constant 0 : index
    %c1120 = arith.constant 1120 : index
    %46 = vector.load %arg11[%c0_61, %c1120] : memref<64x1440xbf16, #tpu.memory_space<vmem>>, vector<64x160xbf16>
    tpu.vector_store %arg11[%c0_61, %c1120], %45 {strides = array<i32>} : memref<64x1440xbf16, #tpu.memory_space<vmem>>, vector<64x160xbf16>,
    %c2_62 = arith.constant 2 : index
    %c2_63 = arith.constant 2 : index
    %c0_64 = arith.constant 0 : index
    %c0_65 = arith.constant 0 : index
    %47 = vector.load %arg10[%c2_62, %c2_63, %c0_64, %c0_65] : memref<3x10x8x160xbf16, #tpu.memory_space<vmem>>, vector<1x8x8x160xbf16>
    %48 = vector.shape_cast %47 : vector<1x8x8x160xbf16> to vector<8x8x160xbf16>
    %49 = vector.shape_cast %48 : vector<8x8x160xbf16> to vector<64x160xbf16>
    %c0_66 = arith.constant 0 : index
    %c1280 = arith.constant 1280 : index
    %50 = vector.load %arg11[%c0_66, %c1280] : memref<64x1440xbf16, #tpu.memory_space<vmem>>, vector<64x160xbf16>
    tpu.vector_store %arg11[%c0_66, %c1280], %49 {strides = array<i32>} : memref<64x1440xbf16, #tpu.memory_space<vmem>>, vector<64x160xbf16>,
    %c0_67 = arith.constant 0 : index
    %c0_68 = arith.constant 0 : index
    %51 = vector.load %arg11[%c0_67, %c0_68] : memref<64x1440xbf16, #tpu.memory_space<vmem>>, vector<64x1440xbf16>
    %c0_69 = arith.constant 0 : index
    %c0_70 = arith.constant 0 : index
    %52 = vector.load %arg2[%c0_69, %c0_70] : memref<1440x256xbf16, #tpu.memory_space<vmem>>, vector<1440x256xbf16>
    %cst = arith.constant dense<0.000000e+00> : vector<64x256xf32>
    %53 = tpu.matmul %51, %52, %cst {dimension_numbers = #tpu.dot_dimension_numbers<[1], [0], [0], [1], [0, 0, 1, 1], [], []>} : vector<64x1440xbf16>, vector<1440x256xbf16>, vector<64x256xf32> -> vector<64x256xf32>
    %c0_71 = arith.constant 0 : index
    %c0_72 = arith.constant 0 : index
    %54 = vector.load %arg3[%c0_71, %c0_72] : memref<1x256xf32, #tpu.memory_space<vmem>>, vector<1x256xf32>
    %55 = vector.broadcast %54 : vector<1x256xf32> to vector<64x256xf32>
    %56 = arith.addf %53, %55 : vector<64x256xf32>
    %c0_73 = arith.constant 0 : index
    %c0_74 = arith.constant 0 : index
    %57 = vector.load %arg12[%c0_73, %c0_74] : memref<64x256xf32, #tpu.memory_space<vmem>>, vector<64x256xf32>
    tpu.vector_store %arg12[%c0_73, %c0_74], %56 {strides = array<i32>} : memref<64x256xf32, #tpu.memory_space<vmem>>, vector<64x256xf32>,
    %c0_75 = arith.constant 0 : index
    %c0_76 = arith.constant 0 : index
    %58 = vector.load %arg12[%c0_75, %c0_76] : memref<64x256xf32, #tpu.memory_space<vmem>>, vector<64x256xf32>
    %cst_77 = arith.constant 1.000000e+00 : f32
    %59 = vector.broadcast %cst_77 : f32 to vector<1x64xf32>
    %cst_78 = arith.constant dense<0.000000e+00> : vector<1x256xf32>
    %60 = tpu.matmul %59, %58, %cst_78 {dimension_numbers = #tpu.dot_dimension_numbers<[1], [0], [0], [1], [0, 0, 1, 1], [], []>} : vector<1x64xf32>, vector<64x256xf32>, vector<1x256xf32> -> vector<1x256xf32>
    %61 = arith.mulf %58, %58 : vector<64x256xf32>
    %cst_79 = arith.constant dense<0.000000e+00> : vector<1x256xf32>
    %62 = tpu.matmul %59, %61, %cst_79 {dimension_numbers = #tpu.dot_dimension_numbers<[1], [0], [0], [1], [0, 0, 1, 1], [], []>} : vector<1x64xf32>, vector<64x256xf32>, vector<1x256xf32> -> vector<1x256xf32>
    %c0_80 = arith.constant 0 : index
    %c0_81 = arith.constant 0 : index
    %63 = vector.load %arg6[%c0_80, %c0_81] : memref<256x16xf32, #tpu.memory_space<vmem>>, vector<256x16xf32>
    %cst_82 = arith.constant dense<0.000000e+00> : vector<1x16xf32>
    %64 = tpu.matmul %60, %63, %cst_82 {dimension_numbers = #tpu.dot_dimension_numbers<[1], [0], [0], [1], [0, 0, 1, 1], [], []>} : vector<1x256xf32>, vector<256x16xf32>, vector<1x16xf32> -> vector<1x16xf32>
    %c0_83 = arith.constant 0 : index
    %c0_84 = arith.constant 0 : index
    %65 = vector.load %arg6[%c0_83, %c0_84] : memref<256x16xf32, #tpu.memory_space<vmem>>, vector<256x16xf32>
    %cst_85 = arith.constant dense<0.000000e+00> : vector<1x16xf32>
    %66 = tpu.matmul %62, %65, %cst_85 {dimension_numbers = #tpu.dot_dimension_numbers<[1], [0], [0], [1], [0, 0, 1, 1], [], []>} : vector<1x256xf32>, vector<256x16xf32>, vector<1x16xf32> -> vector<1x16xf32>
    %cst_86 = arith.constant 9.765625E-4 : f32
    %67 = vector.broadcast %cst_86 : f32 to vector<1x16xf32>
    %68 = arith.mulf %64, %67 : vector<1x16xf32>
    %cst_87 = arith.constant 9.765625E-4 : f32
    %69 = vector.broadcast %cst_87 : f32 to vector<1x16xf32>
    %70 = arith.mulf %66, %69 : vector<1x16xf32>
    %71 = arith.mulf %68, %68 : vector<1x16xf32>
    %72 = arith.subf %70, %71 : vector<1x16xf32>
    %cst_88 = arith.constant 9.99999974E-6 : f32
    %73 = vector.broadcast %cst_88 : f32 to vector<1x16xf32>
    %74 = arith.addf %72, %73 : vector<1x16xf32>
    %75 = math.rsqrt %74 : vector<1x16xf32>
    %c0_89 = arith.constant 0 : index
    %c0_90 = arith.constant 0 : index
    %76 = vector.load %arg7[%c0_89, %c0_90] : memref<16x256xf32, #tpu.memory_space<vmem>>, vector<16x256xf32>
    %cst_91 = arith.constant dense<0.000000e+00> : vector<1x256xf32>
    %77 = tpu.matmul %68, %76, %cst_91 {dimension_numbers = #tpu.dot_dimension_numbers<[1], [0], [0], [1], [0, 0, 1, 1], [], []>} : vector<1x16xf32>, vector<16x256xf32>, vector<1x256xf32> -> vector<1x256xf32>
    %c0_92 = arith.constant 0 : index
    %c0_93 = arith.constant 0 : index
    %78 = vector.load %arg7[%c0_92, %c0_93] : memref<16x256xf32, #tpu.memory_space<vmem>>, vector<16x256xf32>
    %cst_94 = arith.constant dense<0.000000e+00> : vector<1x256xf32>
    %79 = tpu.matmul %75, %78, %cst_94 {dimension_numbers = #tpu.dot_dimension_numbers<[1], [0], [0], [1], [0, 0, 1, 1], [], []>} : vector<1x16xf32>, vector<16x256xf32>, vector<1x256xf32> -> vector<1x256xf32>
    %c0_95 = arith.constant 0 : index
    %c0_96 = arith.constant 0 : index
    %80 = vector.load %arg4[%c0_95, %c0_96] : memref<1x256xf32, #tpu.memory_space<vmem>>, vector<1x256xf32>
    %81 = arith.mulf %80, %79 : vector<1x256xf32>
    %c0_97 = arith.constant 0 : index
    %c0_98 = arith.constant 0 : index
    %82 = vector.load %arg5[%c0_97, %c0_98] : memref<1x256xf32, #tpu.memory_space<vmem>>, vector<1x256xf32>
    %83 = arith.mulf %77, %81 : vector<1x256xf32>
    %84 = arith.subf %82, %83 : vector<1x256xf32>
    %85 = vector.broadcast %81 : vector<1x256xf32> to vector<64x256xf32>
    %86 = arith.mulf %58, %85 : vector<64x256xf32>
    %87 = vector.broadcast %84 : vector<1x256xf32> to vector<64x256xf32>
    %88 = arith.addf %86, %87 : vector<64x256xf32>
    %c0_99 = arith.constant 0 : index
    %89 = memref.load %arg8[%c0_99] : memref<1xf32, #tpu.memory_space<smem>>
    %cst_100 = arith.constant 0.000000e+00 : f32
    %90 = vector.broadcast %cst_100 : f32 to vector<64x256xf32>
    %91 = arith.cmpf ogt, %88, %90 : vector<64x256xf32>
    %92 = vector.broadcast %89 : f32 to vector<64x256xf32>
    %93 = arith.mulf %92, %88 : vector<64x256xf32>
    %94 = arith.select %91, %88, %93 : vector<64x256xi1>, vector<64x256xf32>
    %95 = vector.shape_cast %94 : vector<64x256xf32> to vector<1x64x256xf32>
    %c0_101 = arith.constant 0 : index
    %c0_102 = arith.constant 0 : index
    %c0_103 = arith.constant 0 : index
    %96 = vector.load %arg9[%c0_101, %c0_102, %c0_103] : memref<1x64x256xf32, #tpu.memory_space<vmem>>, vector<1x64x256xf32>
    tpu.vector_store %arg9[%c0_101, %c0_102, %c0_103], %95 {strides = array<i32>} : memref<1x64x256xf32, #tpu.memory_space<vmem>>, vector<1x64x256xf32>,
    return
  }
  func.func @transform_0(%arg0: i32) -> (i32, i32, i32, i32) {
    %c0_i32 = arith.constant 0 : i32
    %c0_i32_0 = arith.constant 0 : i32
    %c0_i32_1 = arith.constant 0 : i32
    %c0_i32_2 = arith.constant 0 : i32
    return %arg0, %c0_i32, %c0_i32_0, %c0_i32_1 : i32, i32, i32, i32
  }
  func.func @transform_1(%arg0: i32) -> (i32, i32) {
    %c0_i32 = arith.constant 0 : i32
    %c0_i32_0 = arith.constant 0 : i32
    %c0_i32_1 = arith.constant 0 : i32
    return %c0_i32, %c0_i32_0 : i32, i32
  }
  func.func @transform_2(%arg0: i32) -> (i32, i32) {
    %c0_i32 = arith.constant 0 : i32
    %c0_i32_0 = arith.constant 0 : i32
    %c0_i32_1 = arith.constant 0 : i32
    return %c0_i32, %c0_i32_0 : i32, i32
  }
  func.func @transform_3(%arg0: i32) -> (i32, i32) {
    %c0_i32 = arith.constant 0 : i32
    %c0_i32_0 = arith.constant 0 : i32
    %c0_i32_1 = arith.constant 0 : i32
    return %c0_i32, %c0_i32_0 : i32, i32
  }
  func.func @transform_4(%arg0: i32) -> (i32, i32) {
    %c0_i32 = arith.constant 0 : i32
    %c0_i32_0 = arith.constant 0 : i32
    %c0_i32_1 = arith.constant 0 : i32
    return %c0_i32, %c0_i32_0 : i32, i32
  }
  func.func @transform_5(%arg0: i32) -> (i32, i32) {
    %c0_i32 = arith.constant 0 : i32
    %c0_i32_0 = arith.constant 0 : i32
    %c0_i32_1 = arith.constant 0 : i32
    return %c0_i32, %c0_i32_0 : i32, i32
  }
  func.func @transform_6(%arg0: i32) -> (i32, i32) {
    %c0_i32 = arith.constant 0 : i32
    %c0_i32_0 = arith.constant 0 : i32
    %c0_i32_1 = arith.constant 0 : i32
    return %c0_i32, %c0_i32_0 : i32, i32
  }
  func.func @transform_7(%arg0: i32) -> i32 {
    %c0_i32 = arith.constant 0 : i32
    %c0_i32_0 = arith.constant 0 : i32
    return %c0_i32 : i32
  }
  func.func @transform_8(%arg0: i32) -> (i32, i32, i32) {
    %c0_i32 = arith.constant 0 : i32
    %c0_i32_0 = arith.constant 0 : i32
    %c0_i32_1 = arith.constant 0 : i32
    return %arg0, %c0_i32, %c0_i32_0 : i32, i32, i32
  }
}

</mosaic_0001>

<bundles_post_ra>
// kernel: tile.38
= control target key start
LH: loop header
LB: loop body
LE: loop exit
PB: predicated region body
PF: predicated region fallthrough
CT: control target
= control target key end

     0   :  { %s22_s0 = inlined_call_operand.vmem [shape: s32[32], index: 0, kind: input, shape index: {}]   ;;  %s23_s1 = inlined_call_operand.vmem [shape: s32[8,32], index: 1, kind: output, shape index: {}]  }
   0x1   :  { %v4_v0 = vld [vmem:[%s22_s0] ss:$0 sm:$0xff] }
   0x2   :  { %5 = vst [vmem:[%s23_s1] sm:$0xff] %v4_v0 }

// kernel: eq.8
= control target key start
LH: loop header
LB: loop body
LE: loop exit
PB: predicated region body
PF: predicated region fallthrough
CT: control target
= control target key end

     0   :  { %s7_s6 = smov 3  ;;  %s14_s9 = smov 3  ;;  %vm4_vm0 = vcmask 261120   ;;  %vm11_vm1 = vcmask 1048320   ;;  %vm18_vm2 = vcmask 785920   ;;  %vm25_vm3 = vcmask 523520   ;;  %s69_s0 = inlined_call_operand.vmem [shape: s32[8,32], index: 0, kind: input, shape index: {}]   ;;  %s70_s1 = inlined_call_operand.vmem [shape: s32[256], index: 1, kind: output, shape index: {}]  }
   0x1   :  { %v35_v0 = vld [vmem:[%s69_s0 + $0x3] ss:$4 sm:%s7_s6]   ;;  %s41_s10 = smov 96   ;;  %s21_s11 = smov 3  ;;  %v36_v1 = vld [vmem:[%s69_s0 + $0x2] ss:$4 sm:%s14_s9]  }
   0x2   :  { %9 = vrot.lane.b32.xlu0 %v35_v0, %s41_s10  ;;  %v37_v2 = vld [vmem:[%s69_s0 + $0x1] ss:$4 sm:%s21_s11]   ;;  %s2_s16 = smov 3  ;;  %s42_s17 = smov 32  }
   0x3   :  { %23 = vrot.lane.b32.xlu1 %v37_v2, %s42_s17  ;;  %v3_v3 = vld [vmem:[%s69_s0] ss:$4 sm:%s2_s16]   ;;  %s43_s0 = smov 64  }
   0x4   :  { %5 = vst.msk [vmem:[#allocation0] sm:$0x3] %vm4_vm0, %v3_v3  }
   0x6   :  { %16 = vrot.lane.b32.xlu0 %v36_v1, %s43_s0 }
  0x74   :  { %v10_v4 = vpop.permute.xlu0 %9  }
  0x75   :  { %12 = vst.msk [vmem:[#allocation0] sm:$0x3] %vm11_vm1, %v10_v4   ;;  %v24_v5 = vpop.permute.xlu1 %23  }
  0x78   :  { %v17_v6 = vpop.permute.xlu0 %16  }
  0x79   :  { %19 = vst.msk [vmem:[#allocation0] sm:$0x3] %vm18_vm2, %v17_v6  }
  0x7a   :  { %26 = vst.msk [vmem:[#allocation0] sm:$0x3] %vm25_vm3, %v24_v5  }
  0x81   :  { %v31_v7 = vld [vmem:[#allocation0] sm:$0x3] }
  0x82   :  { %34 = vst [vmem:[%s70_s1] sm:$0x3] %v31_v7 }

// kernel: tile.23
= control target key start
LH: loop header
LB: loop body
LE: loop exit
PB: predicated region body
PF: predicated region fallthrough
CT: control target
= control target key end

     0   :  { %s22_s0 = inlined_call_operand.vmem [shape: f32[32], index: 0, kind: input, shape index: {}]   ;;  %s23_s1 = inlined_call_operand.vmem [shape: f32[8,32], index: 1, kind: output, shape index: {}]  }
   0x1   :  { %v4_v0 = vld [vmem:[%s22_s0] ss:$0 sm:$0xff] }
   0x2   :  { %5 = vst [vmem:[%s23_s1] sm:$0xff] %v4_v0 }

// kernel: tile.24
= control target key start
LH: loop header
LB: loop body
LE: loop exit
PB: predicated region body
PF: predicated region fallthrough
CT: control target
= control target key end

     0   :  { %s7_s6 = smov 3  ;;  %s14_s9 = smov 3  ;;  %vm4_vm0 = vcmask 261120   ;;  %vm11_vm1 = vcmask 1048320   ;;  %vm18_vm2 = vcmask 785920   ;;  %vm25_vm3 = vcmask 523520   ;;  %s79_s0 = inlined_call_operand.vmem [shape: f32[8,32], index: 0, kind: input, shape index: {}]   ;;  %s80_s1 = inlined_call_operand.vmem [shape: f32[1,256], index: 1, kind: output, shape index: {}]  }
   0x1   :  { %v41_v0 = vld [vmem:[%s79_s0 + $0x3] ss:$4 sm:%s7_s6]   ;;  %s48_s10 = smov 96   ;;  %s21_s11 = smov 3  ;;  %v42_v1 = vld [vmem:[%s79_s0 + $0x2] ss:$4 sm:%s14_s9]  }
   0x2   :  { %9 = vrot.lane.b32.xlu0 %v41_v0, %s48_s10  ;;  %v43_v2 = vld [vmem:[%s79_s0 + $0x1] ss:$4 sm:%s21_s11]   ;;  %s2_s16 = smov 3  ;;  %s49_s17 = smov 32  }
   0x3   :  { %23 = vrot.lane.b32.xlu1 %v43_v2, %s49_s17  ;;  %v3_v3 = vld [vmem:[%s79_s0] ss:$4 sm:%s2_s16]   ;;  %s50_s0 = smov 64  }
   0x4   :  { %5 = vst.msk [vmem:[#allocation0] ss:$8 sm:$0x3] %vm4_vm0, %v3_v3  }
   0x6   :  { %16 = vrot.lane.b32.xlu0 %v42_v1, %s50_s0 }
  0x74   :  { %v10_v4 = vpop.permute.xlu0 %9  }
  0x75   :  { %12 = vst.msk [vmem:[#allocation0] ss:$8 sm:$0x3] %vm11_vm1, %v10_v4   ;;  %v24_v5 = vpop.permute.xlu1 %23  }
  0x78   :  { %v17_v6 = vpop.permute.xlu0 %16  }
  0x79   :  { %19 = vst.msk [vmem:[#allocation0] ss:$8 sm:$0x3] %vm18_vm2, %v17_v6  }
  0x7a   :  { %26 = vst.msk [vmem:[#allocation0] ss:$8 sm:$0x3] %vm25_vm3, %v24_v5  }
  0x81   :  { %v31_v7 = vld [vmem:[#allocation0] sm:$0x1]  ;;  %v36_v8 = vld [vmem:[#allocation0 + $0x8] sm:$0x1] }
  0x82   :  { %34 = vst [vmem:[%s80_s1] sm:$0x1] %v31_v7  ;;  %44 = vst [vmem:[%s80_s1 + $0x1] sm:$0x1] %v36_v8 }

// kernel: up_conv_pallas.1
= control target key start
LH: loop header
LB: loop body
LE: loop exit
PB: predicated region body
PF: predicated region fallthrough
CT: control target
= control target key end

     0   :  { %s4383_s29 = smov 0   ;;  %s6033_s0 = inlined_call_operand.vmem [shape: bf16[2,10,10,160], index: 0, kind: input, shape index: {}]   ;;  %s6034_s1 = inlined_call_operand.vmem [shape: bf16[1440,256], index: 1, kind: input, shape index: {}]   ;;  %s6035_s2 = inlined_call_operand.vmem [shape: f32[1,256], index: 2, kind: input, shape index: {}]   ;;  %s6036_s3 = inlined_call_operand.vmem [shape: f32[1,256], index: 3, kind: input, shape index: {}]   ;;  %s6037_s4 = inlined_call_operand.vmem [shape: f32[1,256], index: 4, kind: input, shape index: {}]   ;;  %s6038_s5 = inlined_call_operand.vmem [shape: f32[256,16], index: 5, kind: input, shape index: {}]   ;;  %s6039_s6 = inlined_call_operand.vmem [shape: f32[16,256], index: 6, kind: input, shape index: {}]   ;;  %s6040_s7 = inlined_call_operand.<no memory space> [shape: f32[1], index: 7, kind: input, shape index: {}]   ;;  %s6041_s8 = inlined_call_operand.vmem [shape: f32[2,64,256], index: 8, kind: output, shape index: {}]  }
   0x1   :  { %13 = sst [smem:[#allocation5]] %s6040_s7 }
   0x2 LB: > { %s3638_s30 = sadd.s32 4294967295, %s4327_s29   ;;  %p3642_p0 = scmp.ge.s32.totalorder %s4327_s29, 1  ;;  %s4327_s29 = sphi %s4383_s29, %s19_s29  }
   0x3   : > { %p263_p1 = scmp.lt.s32.totalorder %s4327_s29, 3 }
   0x5   : > { %p264_p2 = pnand %p3642_p0, %p263_p1 }
   0x7   : > { %267 = sbr.rel (%p264_p2) target bundleno = 1211 (0x4bb), region = 52 }
   0xc   : > { %p297_p3 = scmp.lt.s32.totalorder %s3638_s30, 1  ;;  %vm318_vm0 = vcmask 1043456   ;;  %vm319_vm1 = vcmask 261124   ;;  %vm555_vm2 = vcmask 1042432   ;;  %vm556_vm3 = vcmask 1046532   ;;  %s4329_s24 = smov 64  }
   0xd   : > { %vm4393_vm4 = vmor %vm319_vm1, %vm318_vm0  ;;  %vm351_vm6 = vsmask.f32 3328  ;;  %v3980_v2 = vld [vmem:[%s6034_s1 + $0x74] ss:$8 sps:$4 sm:$0xff]   ;;  %v3982_v3 = vld [vmem:[%s6034_s1 + $0x70] ss:$8 sps:$4 sm:$0xff]  }
   0xe   : > { %s6195_s30 = smov (!%p297_p3, %s3638_s30), 1  ;;  %vm4397_vm5 = vmor %vm555_vm2, %vm556_vm3  ;;  %v3983_v4 = vld [vmem:[%s6034_s1 + $0x64] ss:$8 sps:$4 sm:$0xff]   ;;  %vm352_vm7 = vsmask.f32 7440  ;;  %2458 = vmatprep.subr.bf16.mxu0 %v3980_v2  ;;  %s4330_s25 = smov 32  }
   0xf   : > { %s3965_s12 = smul.u32 160, %s6195_s30  ;;  %v3985_v5 = vld [vmem:[%s6034_s1 + $0x174] ss:$8 sps:$4 sm:$0xff]   ;;  %2459 = vmatpush1.bf16.msra.mxu0 %v3982_v3  ;;  %v3987_v6 = vld [vmem:[%s6034_s1 + $0x60] ss:$8 sps:$4 sm:$0xff]   ;;  %vm4456_vm8 = vmor %vm351_vm6, %vm352_vm7  ;;  %s4331_s26 = smov 96  }
  0x10   : > { %v3988_v7 = vld [vmem:[%s6034_s1 + $0x170] ss:$8 sps:$4 sm:$0xff]   ;;  %2460 = vmatprep.subr.bf16.mxu0 %v3983_v4  ;;  %2531 = vmatprep.subr.bf16.mxu1 %v3985_v5  ;;  %vm692_vm9 = vcmask 1043712   ;;  %vm693_vm10 = vcmask 523268   ;;  %vm743_vm11 = vcmask 523264   ;;  %vm760_vm12 = vcmask 1043968  }
  0x11   : > { %s4417_s19 = scalar_lea.vmem %s6033_s0, %s3965_s12  ;;  %2532 = vmatpush1.bf16.msra.mxu1 %v3988_v7  ;;  %vm761_vm13 = vcmask 785412   ;;  %vm675_vm14 = vcmask 261120   ;;  %vm4935_vm15 = vmor %vm693_vm10, %vm692_vm9  ;;  %vm812_vm1 = vcmask 785408   ;;  %vm829_vm2 = vcmask 1044224   ;;  %s3517_s14 = sld [smem:[#allocation5]] }
  0x12   : > { %v515_v8 = vld [vmem:[%s4417_s19] sm:$0xee]  ;;  %v516_v9 = vld [vmem:[%s4417_s19 + $0x8] sm:$0x11]  ;;  %v517_v17 = vld [vmem:[%s4417_s19 + $0x10] sm:$0xee] }
  0x13   : > { %v331_v10 = vld [vmem:[%s4417_s19] sm:$0xff]  ;;  %v3646_v11 = vrot.slane %v515_v8, 9  ;;  %v560_v12 = vrot.slane %v516_v9, 5  ;;  %v332_v13 = vld [vmem:[%s4417_s19 + $0x8] sm:$0x11]  ;;  %v333_v19 = vld [vmem:[%s4417_s19 + $0x10] sm:$0xff]  ;;  %2461 = vmatpush1.bf16.msra.mxu0 %v3987_v6 }
  0x14   : > { %v355_v14 = vshrl.u32 %v331_v10, 16  ;;  %v358_v15 = vshll.u32 %v331_v10, 16  ;;  %321 = vst.msk [vmem:[#allocation2] sm:$0xff] %vm4393_vm4, %v331_v10  ;;  %v364_v16 = vshll.u32 %v332_v13, 16  ;;  %v518_v18 = vld [vmem:[%s4417_s19 + $0x18] sm:$0x11]  ;;  %vm4940_vm0 = vmor %vm761_vm13, %vm760_vm12 }
  0x15   : > { %v561_v20 = vsel %vm4397_vm5, %v3646_v11, %v560_v12  ;;  %v3647_v23 = vrot.slane %v517_v17, 9  ;;  %v334_v24 = vld [vmem:[%s4417_s19 + $0x18] sm:$0x11]  ;;  %v310_v25 = vld [vmem:[%s4417_s19 + $0x20] sm:$0xff]  ;;  %322 = vst.msk [vmem:[#allocation2 + $0x8] sm:$0xff] %vm4393_vm4, %v333_v19  ;;  %v564_v27 = vrot.slane %v518_v18, 5 }
  0x16   : > { %v357_v21 = vrot.slane %v355_v14, 4  ;;  %v360_v22 = vrot.slane %v358_v15, 5  ;;  %609 = vst.msk [vmem:[#allocation2 + $0xa0] sm:$0xff] %vm4393_vm4, %v561_v20  ;;  %v366_v26 = vrot.slane %v364_v16, 5  ;;  %v369_v28 = vshrl.u32 %v333_v19, 16  ;;  %323 = vst.msk [vmem:[#allocation2 + $0x10] sm:$0xff] %vm4393_vm4, %v310_v25 }
  0x17   : > { %v372_v29 = vshll.u32 %v333_v19, 16  ;;  %v337_v30 = vld [vmem:[%s4417_s19 + $0x30] sm:$0xff]  ;;  %v378_v33 = vshll.u32 %v334_v24, 16  ;;  %v338_v34 = vld [vmem:[%s4417_s19 + $0x38] sm:$0x11]  ;;  %v4448_v37 = vld [vmem:[%s4417_s19 + $0x40] sm:$0xff]  ;;  %v565_v39 = vsel %vm4397_vm5, %v3647_v23, %v564_v27 }
  0x18   : > { %v341_v31 = vld [vmem:[%s4417_s19 + $0x50] sm:$0xff]  ;;  %v361_v32 = vor.u32 %v360_v22, %v357_v21  ;;  %v397_v35 = vshrl.u32 %v337_v30, 16  ;;  %v400_v36 = vshll.u32 %v337_v30, 16  ;;  %324 = vst.msk [vmem:[#allocation2 + $0x18] sm:$0xff] %vm4393_vm4, %v337_v30  ;;  %v371_v40 = vrot.slane %v369_v28, 4  ;;  %325 = vst.msk [vmem:[#allocation2 + $0x20] sm:$0xff] %vm4393_vm4, %v4448_v37 }
  0x19   : > { %326 = vst.msk [vmem:[#allocation2 + $0x28] sm:$0xff] %vm4393_vm4, %v341_v31  ;;  %v374_v41 = vrot.slane %v372_v29, 5  ;;  %v406_v42 = vshll.u32 %v338_v34, 16  ;;  %v336_v43 = vld [vmem:[%s4417_s19 + $0x28] sm:$0x11]  ;;  %v4464_v44 = vld [vmem:[%s4417_s19 + $0x70] sm:$0xff] }
  0x1a   : > { %v362_v45 = vrot.slane %v361_v32, 4  ;;  %610 = vst.msk [vmem:[#allocation2 + $0xa8] sm:$0xff] %vm4393_vm4, %v565_v39  ;;  %v380_v46 = vrot.slane %v378_v33, 5  ;;  %v399_v47 = vrot.slane %v397_v35, 4  ;;  %v402_v48 = vrot.slane %v400_v36, 5  ;;  %328 = vst.msk [vmem:[#allocation2 + $0x38] sm:$0xff] %vm4393_vm4, %v4464_v44 }
  0x1b   : > { %v375_v49 = vor.u32 %v374_v41, %v371_v40  ;;  %v408_v50 = vrot.slane %v406_v42, 5  ;;  %v383_v51 = vshrl.u32 %v310_v25, 16  ;;  %v386_v52 = vshll.u32 %v310_v25, 16  ;;  %v342_v53 = vld [vmem:[%s4417_s19 + $0x58] sm:$0x11]  ;;  %v4476_v54 = vld [vmem:[%s4417_s19 + $0x60] sm:$0xff] }
  0x1c   : > { %v367_v55 = vsel %vm4456_vm8, %v362_v45, %v366_v26  ;;  %v403_v56 = vor.u32 %v402_v48, %v399_v47  ;;  %v392_v57 = vshll.u32 %v336_v43, 16  ;;  %v425_v58 = vshrl.u32 %v341_v31, 16  ;;  %v340_v59 = vld [vmem:[%s4417_s19 + $0x48] sm:$0x11]  ;;  %327 = vst.msk [vmem:[#allocation2 + $0x30] sm:$0xff] %vm4393_vm4, %v4476_v54  ;;  %v4489_v3 = vld [vmem:[%s4417_s19 + $0x80] sm:$0xff] }
  0x1d   : > { %505 = vst.msk [vmem:[#allocation2 + $0x50] sm:$0xff] %vm4393_vm4, %v367_v55  ;;  %v376_v60 = vrot.slane %v375_v49, 4  ;;  %v4486_v61 = vld [vmem:[#allocation2 + $0x8] sm:$0xff]  ;;  %v385_v62 = vrot.slane %v383_v51, 4  ;;  %v388_v63 = vrot.slane %v386_v52, 5  ;;  %v428_v2 = vshll.u32 %v341_v31, 16 }
  0x1e   : > { %v703_v4 = vld [vmem:[#allocation2 + $0xa0] sm:$0xff]  ;;  %v4491_v5 = vld [vmem:[#allocation2 + $0x10] sm:$0xff]  ;;  %v404_v6 = vrot.slane %v403_v56, 4  ;;  %v394_v7 = vrot.slane %v392_v57, 5  ;;  %v427_v8 = vrot.slane %v425_v58, 4  ;;  %v434_v9 = vshll.u32 %v342_v53, 16 }
  0x1f   : > { %329 = vst.msk [vmem:[#allocation2 + $0x40] sm:$0xff] %vm4393_vm4, %v4489_v3  ;;  %628 = vst.msk [vmem:[#allocation3 + $0x30] sm:$0xff] %vm4393_vm4, %v4486_v61  ;;  %719 = vrot.lane.b32.xlu1 %v703_v4, %s4329_s24  ;;  %v381_v10 = vsel %vm4456_vm8, %v376_v60, %v380_v46  ;;  %v389_v11 = vor.u32 %v388_v63, %v385_v62  ;;  %v430_v12 = vrot.slane %v428_v2, 5  ;;  %v411_v13 = vshrl.u32 %v4448_v37, 16  ;;  %v346_v14 = vld [vmem:[%s4417_s19 + $0x78] sm:$0x11] }
  0x20   : > { %629 = vst.msk [vmem:[#allocation3 + $0x60] sm:$0xff] %vm4393_vm4, %v4491_v5  ;;  %506 = vst.msk [vmem:[#allocation2 + $0x58] sm:$0xff] %vm4393_vm4, %v381_v10  ;;  %v409_v15 = vsel %vm4456_vm8, %v404_v6, %v408_v50  ;;  %v436_v16 = vrot.slane %v434_v9, 5  ;;  %v414_v17 = vshll.u32 %v4448_v37, 16  ;;  %v420_v18 = vshll.u32 %v340_v59, 16  ;;  %v4516_v21 = vld [vmem:[#allocation2 + $0x20] sm:$0xff] }
  0x21   : > { %v344_v19 = vld [vmem:[%s4417_s19 + $0x68] sm:$0x11]  ;;  %v4514_v20 = vld [vmem:[%s4417_s19 + $0x30] sm:$0xee]  ;;  %508 = vst.msk [vmem:[#allocation2 + $0x68] sm:$0xff] %vm4393_vm4, %v409_v15  ;;  %v390_v23 = vrot.slane %v389_v11, 4  ;;  %v431_v24 = vor.u32 %v430_v12, %v427_v8 }
  0x22   : > { %v4518_v22 = vld [vmem:[#allocation2 + $0xa8] sm:$0xff]  ;;  %v413_v25 = vrot.slane %v411_v13, 4  ;;  %v453_v26 = vshrl.u32 %v4464_v44, 16  ;;  %v522_v27 = vld [vmem:[%s4417_s19 + $0x38] sm:$0x11]  ;;  %631 = vst.msk [vmem:[#allocation3 + $0xc0] sm:$0xff] %vm4393_vm4, %v4516_v21 }
  0x23   : > { %v416_v28 = vrot.slane %v414_v17, 5  ;;  %v422_v29 = vrot.slane %v420_v18, 5  ;;  %v456_v30 = vshll.u32 %v4464_v44, 16  ;;  %v462_v31 = vshll.u32 %v346_v14, 16  ;;  %v519_v32 = vld [vmem:[%s4417_s19 + $0x20] sm:$0xee]  ;;  %721 = vrot.lane.b32.xlu1 %v4518_v22, %s4329_s24 }
  0x24   : > { %v520_v33 = vld [vmem:[%s4417_s19 + $0x28] sm:$0x11]  ;;  %v4530_v34 = vld [vmem:[#allocation2 + $0x18] sm:$0xff]  ;;  %v395_v36 = vsel %vm4456_vm8, %v390_v23, %v394_v7  ;;  %v432_v37 = vrot.slane %v431_v24, 4  ;;  %v455_v39 = vrot.slane %v453_v26, 4  ;;  %v439_v40 = vshrl.u32 %v4476_v54, 16 }
  0x25   : > { %v4532_v35 = vld [vmem:[#allocation2 + $0x28] sm:$0xff]  ;;  %v525_v41 = vld [vmem:[%s4417_s19 + $0x50] sm:$0xee]  ;;  %630 = vst.msk [vmem:[#allocation3 + $0x90] sm:$0xff] %vm4393_vm4, %v4530_v34  ;;  %507 = vst.msk [vmem:[#allocation2 + $0x60] sm:$0xff] %vm4393_vm4, %v395_v36  ;;  %v417_v44 = vor.u32 %v416_v28, %v413_v25  ;;  %v458_v45 = vrot.slane %v456_v30, 5 }
  0x26   : > { %v4540_v42 = vld [vmem:[#allocation2 + $0x30] sm:$0xff]  ;;  %632 = vst.msk [vmem:[#allocation3 + $0xf0] sm:$0xff] %vm4393_vm4, %v4532_v35  ;;  %v464_v46 = vrot.slane %v462_v31, 5  ;;  %v442_v47 = vshll.u32 %v4476_v54, 16  ;;  %v526_v48 = vld [vmem:[%s4417_s19 + $0x58] sm:$0x11]  ;;  %v437_v49 = vsel %vm4456_vm8, %v432_v37, %v436_v16 }
  0x27   : > { %v635_v43 = vld [vmem:[#allocation2 + $0x50] sm:$0xff]  ;;  %633 = vst.msk [vmem:[#allocation3 + $0x120] sm:$0xff] %vm4393_vm4, %v4540_v42  ;;  %v441_v50 = vrot.slane %v439_v40, 4  ;;  %v448_v51 = vshll.u32 %v344_v19, 16  ;;  %v3649_v52 = vrot.slane %v4514_v20, 9  ;;  %510 = vst.msk [vmem:[#allocation2 + $0x78] sm:$0xff] %vm4393_vm4, %v437_v49  ;;  %v459_v55 = vor.u32 %v458_v45, %v455_v39  ;;  %790 = vrot.lane.b32.xlu1 %v4491_v5, %s4331_s26 }
  0x28   : > { %651 = vrot.lane.b32.xlu0 %v635_v43, %s4330_s25  ;;  %v523_v53 = vld [vmem:[%s4417_s19 + $0x40] sm:$0xee]  ;;  %v418_v54 = vrot.slane %v417_v44, 4  ;;  %v444_v56 = vrot.slane %v442_v47, 5  ;;  %v572_v57 = vrot.slane %v522_v27, 5  ;;  %v4563_v59 = vld [vmem:[#allocation2 + $0x38] sm:$0xff] }
  0x29   : > { %v524_v58 = vld [vmem:[%s4417_s19 + $0x48] sm:$0x11]  ;;  %v636_v60 = vld [vmem:[#allocation2 + $0x58] sm:$0xff]  ;;  %v450_v62 = vrot.slane %v448_v51, 5  ;;  %v3648_v63 = vrot.slane %v519_v32, 9  ;;  %v568_v2 = vrot.slane %v520_v33, 5 }
  0x2a   : > { %v3651_v4 = vrot.slane %v525_v41, 9  ;;  %634 = vst.msk [vmem:[#allocation3 + $0x150] sm:$0xff] %vm4393_vm4, %v4563_v59  ;;  %v4570_v6 = vld [vmem:[#allocation2 + $0x68] sm:$0xff]  ;;  %v423_v7 = vsel %vm4456_vm8, %v418_v54, %v422_v29  ;;  %v460_v8 = vrot.slane %v459_v55, 4  ;;  %v445_v9 = vor.u32 %v444_v56, %v441_v50  ;;  %v529_v11 = vld [vmem:[%s4417_s19 + $0x70] sm:$0xee] }
  0x2b   : > { %v573_v10 = vsel %vm4397_vm5, %v3649_v52, %v572_v57  ;;  %v530_v12 = vld [vmem:[%s4417_s19 + $0x78] sm:$0x11]  ;;  %509 = vst.msk [vmem:[#allocation2 + $0x70] sm:$0xff] %vm4393_vm4, %v423_v7  ;;  %v569_v13 = vsel %vm4397_vm5, %v3648_v63, %v568_v2  ;;  %v580_v14 = vrot.slane %v526_v48, 5  ;;  %v3650_v15 = vrot.slane %v523_v53, 9  ;;  %657 = vrot.lane.b32.xlu1 %v4570_v6, %s4330_s25  ;;  %s3894_s17 = sshll.u32 %s6195_s30, 7 }
  0x2c   : > { %653 = vrot.lane.b32.xlu0 %v636_v60, %s4330_s25  ;;  %612 = vst.msk [vmem:[#allocation2 + $0xb8] sm:$0xff] %vm4393_vm4, %v573_v10  ;;  %v576_v16 = vrot.slane %v524_v58, 5  ;;  %v527_v17 = vld [vmem:[%s4417_s19 + $0x60] sm:$0xee]  ;;  %v465_v18 = vsel %vm4456_vm8, %v460_v8, %v464_v46  ;;  %v446_v19 = vrot.slane %v445_v9, 4  ;;  %611 = vst.msk [vmem:[#allocation2 + $0xb0] sm:$0xff] %vm4393_vm4, %v569_v13  ;;  %s5988_s20 = scalar_lea.vmem %s6041_s8, %s3894_s17 }
  0x2d   : > { %v3653_v20 = vrot.slane %v529_v11, 9  ;;  %v588_v23 = vrot.slane %v530_v12, 5  ;;  %v528_v24 = vld [vmem:[%s4417_s19 + $0x68] sm:$0x11]  ;;  %512 = vst.msk [vmem:[#allocation2 + $0x88] sm:$0xff] %vm4393_vm4, %v465_v18  ;;  %v581_v25 = vsel %vm4397_vm5, %v3651_v4, %v580_v14  ;;  %v3652_v27 = vrot.slane %v527_v17, 9 }
  0x2e   : > { %v577_v26 = vsel %vm4397_vm5, %v3650_v15, %v576_v16  ;;  %v584_v28 = vrot.slane %v528_v24, 5  ;;  %v3989_v29 = vld [vmem:[%s6034_s1 + $0x54] ss:$8 sps:$4 sm:$0xff]   ;;  %v4602_v30 = vld [vmem:[#allocation2 + $0x60] sm:$0xff]  ;;  %v451_v31 = vsel %vm4456_vm8, %v446_v19, %v450_v62  ;;  %614 = vst.msk [vmem:[#allocation2 + $0xc8] sm:$0xff] %vm4393_vm4, %v581_v25  ;;  %vm830_vm3 = vcmask 1047556  }
  0x2f   : > { %613 = vst.msk [vmem:[#allocation2 + $0xc0] sm:$0xff] %vm4393_vm4, %v577_v26  ;;  %v589_v32 = vsel %vm4397_vm5, %v3653_v20, %v588_v23  ;;  %v3991_v33 = vld [vmem:[%s6034_s1 + $0x164] ss:$8 sps:$4 sm:$0xff]   ;;  %v3993_v36 = vld [vmem:[%s6034_s1 + $0x50] ss:$8 sps:$4 sm:$0xff]   ;;  %511 = vst.msk [vmem:[#allocation2 + $0x80] sm:$0xff] %vm4393_vm4, %v451_v31  ;;  %2462 = vmatprep.subr.bf16.mxu0 %v3989_v29 }
  0x30   : > { %v3994_v37 = vld [vmem:[%s6034_s1 + $0x160] ss:$8 sps:$4 sm:$0xff]   ;;  %788 = vrot.lane.b32.xlu0 %v4486_v61, %s4331_s26  ;;  %v4623_v39 = vld [vmem:[#allocation2 + $0x78] sm:$0xff]  ;;  %616 = vst.msk [vmem:[#allocation2 + $0xd8] sm:$0xff] %vm4393_vm4, %v589_v32  ;;  %v585_v40 = vsel %vm4397_vm5, %v3652_v27, %v584_v28  ;;  %v3995_v41 = vld [vmem:[%s6034_s1 + $0x44] ss:$8 sps:$4 sm:$0xff]   ;;  %2533 = vmatprep.subr.bf16.mxu1 %v3991_v33 }
  0x31   : > { %615 = vst.msk [vmem:[#allocation2 + $0xd0] sm:$0xff] %vm4393_vm4, %v585_v40  ;;  %2463 = vmatpush1.bf16.msra.mxu0 %v3993_v36  ;;  %v3997_v61 = vld [vmem:[%s6034_s1 + $0x154] ss:$8 sps:$4 sm:$0xff]   ;;  %661 = vrot.lane.b32.xlu1 %v4623_v39, %s4330_s25  ;;  %v3999_v43 = vld [vmem:[%s6034_s1 + $0x40] ss:$8 sps:$4 sm:$0xff]   ;;  %vm4951_vm6 = vmor %vm830_vm3, %vm829_vm2 }
  0x32   : > { %2534 = vmatpush1.bf16.msra.mxu1 %v3994_v37  ;;  %v4000_v44 = vld [vmem:[%s6034_s1 + $0x150] ss:$8 sps:$4 sm:$0xff]   ;;  %2464 = vmatprep.subr.bf16.mxu0 %v3995_v41  ;;  %v4001_v46 = vld [vmem:[%s6034_s1 + $0x34] ss:$8 sps:$4 sm:$0xff]   ;;  %v4003_v48 = vld [vmem:[%s6034_s1 + $0x144] ss:$8 sps:$4 sm:$0xff]  }
  0x33   : > { %2535 = vmatprep.subr.bf16.mxu1 %v3997_v61  ;;  %v4649_v45 = vld [vmem:[#allocation2 + $0x70] sm:$0xff]  ;;  %v4664_v50 = vld [vmem:[#allocation2 + $0xb8] sm:$0xff]  ;;  %v4006_v51 = vld [vmem:[%s6034_s1 + $0x140] ss:$8 sps:$4 sm:$0xff]  }
  0x34   : > { %655 = vrot.lane.b32.xlu0 %v4602_v30, %s4330_s25  ;;  %v4654_v47 = vld [vmem:[#allocation2 + $0x88] sm:$0xff]  ;;  %v4005_v49 = vld [vmem:[%s6034_s1 + $0x30] ss:$8 sps:$4 sm:$0xff]   ;;  %v4009_v54 = vld [vmem:[%s6034_s1 + $0x134] ss:$8 sps:$4 sm:$0xff]  }
  0x35   : > { %2465 = vmatpush1.bf16.msra.mxu0 %v3999_v43  ;;  %665 = vrot.lane.b32.xlu1 %v4654_v47, %s4330_s25  ;;  %v4007_v53 = vld [vmem:[%s6034_s1 + $0x24] ss:$8 sps:$4 sm:$0xff]   ;;  %v4011_v55 = vld [vmem:[%s6034_s1 + $0x20] ss:$8 sps:$4 sm:$0xff]   ;;  %v4012_v56 = vld [vmem:[%s6034_s1 + $0x130] ss:$8 sps:$4 sm:$0xff]  }
  0x36   : > { %2536 = vmatpush1.bf16.msra.mxu1 %v4000_v44  ;;  %2466 = vmatprep.subr.bf16.mxu0 %v4001_v46  ;;  %v4671_v52 = vld [vmem:[#allocation2 + $0x80] sm:$0xff]  ;;  %v4687_v57 = vld [vmem:[#allocation2 + $0xb0] sm:$0xff]  ;;  %v532_v60 = vld [vmem:[%s4417_s19 + $0x88] sm:$0x11] }
  0x37   : > { %2537 = vmatprep.subr.bf16.mxu1 %v4003_v48  ;;  %v531_v58 = vld [vmem:[%s4417_s19 + $0x80] sm:$0xee]  ;;  %v592_v63 = vrot.slane %v532_v60, 5  ;;  %v4013_v2 = vld [vmem:[%s6034_s1 + $0x14] ss:$8 sps:$4 sm:$0xff]   ;;  %v4696_v4 = vld [vmem:[#allocation2 + $0xc8] sm:$0xff] }
  0x38   : > { %659 = vrot.lane.b32.xlu0 %v4649_v45, %s4330_s25  ;;  %v3654_v62 = vrot.slane %v531_v58, 9  ;;  %v4015_v7 = vld [vmem:[%s6034_s1 + $0x124] ss:$8 sps:$4 sm:$0xff]   ;;  %v4017_v8 = vld [vmem:[%s6034_s1 + $0x10] ss:$8 sps:$4 sm:$0xff]  }
  0x39   : > { %2467 = vmatpush1.bf16.msra.mxu0 %v4005_v49  ;;  %725 = vrot.lane.b32.xlu1 %v4664_v50, %s4329_s24  ;;  %v4018_v10 = vld [vmem:[%s6034_s1 + $0x120] ss:$8 sps:$4 sm:$0xff]   ;;  %v4712_v11 = vld [vmem:[%s4417_s19 + $0x90] sm:$0xff]  ;;  %v4019_v12 = vld [vmem:[%s6034_s1 + $0x4] ss:$8 sps:$4 sm:$0xff]  }
  0x3a   : > { %2538 = vmatpush1.bf16.msra.mxu1 %v4006_v51  ;;  %2468 = vmatprep.subr.bf16.mxu0 %v4007_v53  ;;  %v593_v9 = vsel %vm4397_vm5, %v3654_v62, %v592_v63  ;;  %330 = vst.msk [vmem:[#allocation2 + $0x48] sm:$0xff] %vm4393_vm4, %v4712_v11  ;;  %v4021_v13 = vld [vmem:[%s6034_s1 + $0x114] ss:$8 sps:$4 sm:$0xff]   ;;  %v4023_v14 = vld [vmem:[%s6034_s1] ss:$8 sps:$4 sm:$0xff]   ;;  %v484_v60 = vshll.u32 %v4712_v11, 16 }
  0x3b   : > { %2539 = vmatprep.subr.bf16.mxu1 %v4009_v54  ;;  %617 = vst.msk [vmem:[#allocation2 + $0xe0] sm:$0xff] %vm4393_vm4, %v593_v9  ;;  %v4024_v15 = vld [vmem:[%s6034_s1 + $0x110] ss:$8 sps:$4 sm:$0xff]   ;;  %v4025_v16 = vld [vmem:[%s6034_s1 + $0xf4] ss:$8 sps:$4 sm:$0xff]   ;;  %v707_v18 = vld [vmem:[#allocation2 + $0xc0] sm:$0xff] }
  0x3c   : > { %663 = vrot.lane.b32.xlu0 %v4671_v52, %s4330_s25  ;;  %v4027_v17 = vld [vmem:[%s6034_s1 + $0x104] ss:$8 sps:$4 sm:$0xff]   ;;  %v4029_v19 = vld [vmem:[%s6034_s1 + $0xf0] ss:$8 sps:$4 sm:$0xff]   ;;  %v4030_v23 = vld [vmem:[%s6034_s1 + $0x100] ss:$8 sps:$4 sm:$0xff]  }
  0x3d   : > { %2469 = vmatpush1.bf16.msra.mxu0 %v4011_v55  ;;  %794 = vrot.lane.b32.xlu1 %v4516_v21, %s4331_s26  ;;  %v4748_v20 = vld [vmem:[#allocation2 + $0xd8] sm:$0xff]  ;;  %v4031_v24 = vld [vmem:[%s6034_s1 + $0xe4] ss:$8 sps:$4 sm:$0xff]   ;;  %v4035_v27 = vld [vmem:[%s6034_s1 + $0xe0] ss:$8 sps:$4 sm:$0xff]   ;;  %v467_v62 = vshrl.u32 %v4489_v3, 16 }
  0x3e   : > { %2540 = vmatpush1.bf16.msra.mxu1 %v4012_v56  ;;  %2470 = vmatprep.subr.bf16.mxu0 %v4013_v2  ;;  %v4033_v25 = vld [vmem:[%s6034_s1 + $0x1f4] ss:$8 sps:$4 sm:$0xff]   ;;  %v4760_v26 = vld [vmem:[#allocation2 + $0x40] sm:$0xff]  ;;  %v4036_v28 = vld [vmem:[%s6034_s1 + $0x1f0] ss:$8 sps:$4 sm:$0xff]   ;;  %v481_v56 = vshrl.u32 %v4712_v11, 16 }
  0x3f   : > { %2541 = vmatprep.subr.bf16.mxu1 %v4015_v7  ;;  %v4037_v29 = vld [vmem:[%s6034_s1 + $0xd4] ss:$8 sps:$4 sm:$0xff]   ;;  %v4039_v31 = vld [vmem:[%s6034_s1 + $0x1e4] ss:$8 sps:$4 sm:$0xff]   ;;  %v4041_v33 = vld [vmem:[%s6034_s1 + $0xd0] ss:$8 sps:$4 sm:$0xff]  }
  0x40   : > { %723 = vrot.lane.b32.xlu0 %v4687_v57, %s4329_s24  ;;  %v709_v32 = vld [vmem:[#allocation2 + $0xd0] sm:$0xff]  ;;  %v619_v36 = vld [vmem:[#allocation2] sm:$0xff]  ;;  %v470_v63 = vshll.u32 %v4489_v3, 16  ;;  %v483_v7 = vrot.slane %v481_v56, 4  ;;  %v486_v3 = vrot.slane %v484_v60, 5 }
  0x41   : > { %2471 = vmatpush1.bf16.msra.mxu0 %v4017_v8  ;;  %729 = vrot.lane.b32.xlu1 %v4696_v4, %s4329_s24  ;;  %v4042_v37 = vld [vmem:[%s6034_s1 + $0x1e0] ss:$8 sps:$4 sm:$0xff]   ;;  %627 = vst.msk [vmem:[#allocation3] sm:$0xff] %vm4393_vm4, %v619_v36  ;;  %v4043_v40 = vld [vmem:[%s6034_s1 + $0xc4] ss:$8 sps:$4 sm:$0xff]  }
  0x42   : > { %2542 = vmatpush1.bf16.msra.mxu1 %v4018_v10  ;;  %2472 = vmatprep.subr.bf16.mxu0 %v4019_v12  ;;  %v4045_v41 = vld [vmem:[%s6034_s1 + $0x1d4] ss:$8 sps:$4 sm:$0xff]   ;;  %v4047_v61 = vld [vmem:[%s6034_s1 + $0xc0] ss:$8 sps:$4 sm:$0xff]   ;;  %v4048_v43 = vld [vmem:[%s6034_s1 + $0x1d0] ss:$8 sps:$4 sm:$0xff]  }
  0x43   : > { %2543 = vmatprep.subr.bf16.mxu1 %v4021_v13  ;;  %v4049_v44 = vld [vmem:[%s6034_s1 + $0xb4] ss:$8 sps:$4 sm:$0xff]   ;;  %v4051_v46 = vld [vmem:[%s6034_s1 + $0x1c4] ss:$8 sps:$4 sm:$0xff]   ;;  %v4053_v48 = vld [vmem:[%s6034_s1 + $0xb0] ss:$8 sps:$4 sm:$0xff]   ;;  %v487_v13 = vor.u32 %v486_v3, %v483_v7 }
  0x44   : > { %792 = vrot.lane.b32.xlu0 %v4530_v34, %s4331_s26  ;;  %v4054_v49 = vld [vmem:[%s6034_s1 + $0x1c0] ss:$8 sps:$4 sm:$0xff]   ;;  %v4055_v51 = vld [vmem:[%s6034_s1 + $0xa4] ss:$8 sps:$4 sm:$0xff]   ;;  %v4057_v53 = vld [vmem:[%s6034_s1 + $0x1b4] ss:$8 sps:$4 sm:$0xff]  }
  0x45   : > { %2473 = vmatpush1.bf16.msra.mxu0 %v4023_v14  ;;  %798 = vrot.lane.b32.xlu1 %v4540_v42, %s4331_s26  ;;  %v4059_v54 = vld [vmem:[%s6034_s1 + $0xa0] ss:$8 sps:$4 sm:$0xff]   ;;  %v4061_v55 = vld [vmem:[%s6034_s1 + $0x94] ss:$8 sps:$4 sm:$0xff]   ;;  %v4072_v8 = vld [vmem:[%s6034_s1 + $0x190] ss:$8 sps:$4 sm:$0xff]  }
  0x46   : > { %2544 = vmatpush1.bf16.msra.mxu1 %v4024_v15  ;;  %2474 = vmatprep.subr.bf16.mxu0 %v4025_v16  ;;  %v4066_v58 = vld [vmem:[%s6034_s1 + $0x1a0] ss:$8 sps:$4 sm:$0xff]   ;;  %v4069_v2 = vld [vmem:[%s6034_s1 + $0x194] ss:$8 sps:$4 sm:$0xff]   ;;  %v4076_v9 = vld [vmem:[%s6034_s1 + $0x184] ss:$8 sps:$4 sm:$0xff]  }
  0x47   : > { %2545 = vmatprep.subr.bf16.mxu1 %v4027_v17  ;;  %v469_v10 = vrot.slane %v467_v62, 4  ;;  %v4080_v11 = vld [vmem:[%s6034_s1 + $0x274] ss:$8 sps:$4 sm:$0xff]   ;;  %v865_v12 = vld [vmem:[#allocation2 + $0xe0] sm:$0xff]  ;;  %v488_v17 = vrot.slane %v487_v13, 4 }
  0x48   : > { %727 = vrot.lane.b32.xlu0 %v707_v18, %s4329_s24  ;;  %v4081_v14 = vld [vmem:[%s6034_s1 + $0x180] ss:$8 sps:$4 sm:$0xff]   ;;  %v4090_v16 = vld [vmem:[%s6034_s1 + $0x374] ss:$8 sps:$4 sm:$0xff]   ;;  %v4078_v7 = vld [vmem:[%s6034_s1 + $0x270] ss:$8 sps:$4 sm:$0xff]  }
  0x49   : > { %2475 = vmatpush2.bf16.msra.mxu0 %v4029_v19  ;;  %733 = vrot.lane.b32.xlu1 %v4748_v20, %s4329_s24  ;;  %v348_v19 = vld [vmem:[%s4417_s19 + $0x88] sm:$0x11]  ;;  %v4073_v3 = vld [vmem:[#allocation3] ss:$48 sps:$4 sm:$0xff]  }
  0x4a   : > { %2546 = vmatpush1.bf16.msra.mxu1 %v4030_v23  ;;  %2476 = vmatprep.subr.bf16.mxu0 %v4031_v24  ;;  %v476_v23 = vshll.u32 %v348_v19, 16  ;;  %v930_v24 = vld [vmem:[#allocation2 + $0x48] sm:$0xff] }
  0x4b   : > { %2547 = vmatprep.subr.bf16.mxu1 %v4033_v25  ;;  %v4085_v13 = vld [vmem:[%s6034_s1 + $0x260] ss:$8 sps:$4 sm:$0xff]  }
  0x4c   : > { %796 = vrot.lane.b32.xlu0 %v4532_v35, %s4331_s26 }
  0x4d   : > { %2477 = vmatpush2.bf16.msra.mxu0 %v4035_v27  ;;  %802 = vrot.lane.b32.xlu1 %v4760_v26, %s4331_s26  ;;  %v478_v27 = vrot.slane %v476_v23, 5 }
  0x4e   : > { %2548 = vmatpush2.bf16.msra.mxu1 %v4036_v28  ;;  %2478 = vmatprep.subr.bf16.mxu0 %v4037_v29  ;;  %v841_v28 = vld [vmem:[#allocation2 + $0x58] sm:$0xff]  ;;  %v842_v29 = vld [vmem:[#allocation2 + $0x60] sm:$0xff] }
  0x4f   : > { %2549 = vmatprep.subr.bf16.mxu1 %v4039_v31  ;;  %849 = vst.msk [vmem:[#allocation3 + $0x14] sm:$0xff] %vm4393_vm4, %v841_v28  ;;  %850 = vst.msk [vmem:[#allocation3 + $0x44] sm:$0xff] %vm4393_vm4, %v842_v29  ;;  %v4093_v28 = vld [vmem:[%s6034_s1 + $0x250] ss:$8 sps:$4 sm:$0xff]   ;;  %v4096_v29 = vld [vmem:[%s6034_s1 + $0x360] ss:$8 sps:$4 sm:$0xff]  }
  0x50   : > { %731 = vrot.lane.b32.xlu0 %v709_v32, %s4329_s24 }
  0x51   : > { %2479 = vmatpush2.bf16.msra.mxu0 %v4041_v33  ;;  %876 = vrot.lane.b32.xlu1 %v4687_v57, %s4330_s25  ;;  %v4065_v57 = vld [vmem:[%s6034_s1 + $0x90] ss:$8 sps:$4 sm:$0xff]  }
  0x52   : > { %2550 = vmatpush2.bf16.msra.mxu1 %v4042_v37  ;;  %2480 = vmatprep.subr.bf16.mxu0 %v4043_v40 }
  0x53   : > { %2551 = vmatprep.subr.bf16.mxu1 %v4045_v41 }
  0x54   : > { %800 = vrot.lane.b32.xlu0 %v4563_v59, %s4331_s26 }
  0x55   : > { %2481 = vmatpush2.bf16.msra.mxu0 %v4047_v61  ;;  %941 = vrot.lane.b32.xlu1 %v4530_v34, %s4329_s24  ;;  %v4060_v34 = vld [vmem:[%s6034_s1 + $0x1b0] ss:$8 sps:$4 sm:$0xff]  }
  0x56   : > { %2552 = vmatpush2.bf16.msra.mxu1 %v4048_v43  ;;  %2482 = vmatprep.subr.bf16.mxu0 %v4049_v44 }
  0x57   : > { %2553 = vmatprep.subr.bf16.mxu1 %v4051_v46 }
  0x58   : > { %874 = vrot.lane.b32.xlu0 %v4518_v22, %s4330_s25  ;;  %v4063_v22 = vld [vmem:[%s6034_s1 + $0x1a4] ss:$8 sps:$4 sm:$0xff]  }
  0x59   : > { %2483 = vmatpush2.bf16.msra.mxu0 %v4053_v48  ;;  %880 = vrot.lane.b32.xlu1 %v707_v18, %s4330_s25 }
  0x5a   : > { %2554 = vmatpush2.bf16.msra.mxu1 %v4054_v49  ;;  %2484 = vmatprep.subr.bf16.mxu0 %v4055_v51 }
  0x5b   : > { %2555 = vmatprep.subr.bf16.mxu1 %v4057_v53 }
  0x5c   : > { %939 = vrot.lane.b32.xlu0 %v4491_v5, %s4329_s24  ;;  %v4067_v5 = vld [vmem:[%s6034_s1 + $0x84] ss:$8 sps:$4 sm:$0xff]  }
  0x5d   : > { %2485 = vmatpush2.bf16.msra.mxu0 %v4059_v54  ;;  %945 = vrot.lane.b32.xlu1 %v4532_v35, %s4329_s24  ;;  %v4071_v35 = vld [vmem:[%s6034_s1 + $0x80] ss:$8 sps:$4 sm:$0xff]  }
  0x5e   : > { %2556 = vmatpush2.bf16.msra.mxu1 %v4060_v34  ;;  %2486 = vmatprep.subr.bf16.mxu0 %v4061_v55  ;;  %v4229_v54 = vld [vmem:[%s6034_s1 + $0x420] ss:$8 sps:$4 sm:$0xff]  }
  0x5f   : > { %2557 = vmatprep.subr.bf16.mxu1 %v4063_v22 }
  0x60   : > { %878 = vrot.lane.b32.xlu0 %v4664_v50, %s4330_s25  ;;  %v472_v50 = vrot.slane %v470_v63, 5 }
  0x61   : > { %2487 = vmatpush2.bf16.msra.mxu0 %v4065_v57  ;;  %884 = vrot.lane.b32.xlu1 %v709_v32, %s4330_s25 }
  0x62   : > { %2558 = vmatpush2.bf16.msra.mxu1 %v4066_v58  ;;  %2488 = vmatprep.subr.bf16.mxu0 %v4067_v5  ;;  %v473_v15 = vor.u32 %v472_v50, %v469_v10 }
  0x63   : > { %2559 = vmatprep.subr.bf16.mxu1 %v4069_v2 }
  0x64   : > { %943 = vrot.lane.b32.xlu0 %v4516_v21, %s4329_s24  ;;  %v350_v21 = vld [vmem:[%s4417_s19 + $0x98] sm:$0x11] }
  0x65   : > { %2489 = vmatpush2.bf16.msra.mxu0 %v4071_v35  ;;  %949 = vrot.lane.b32.xlu1 %v4563_v59, %s4329_s24  ;;  %v490_v18 = vshll.u32 %v350_v21, 16  ;;  %v474_v59 = vrot.slane %v473_v15, 4  ;;  %v1053_v21 = vld [vmem:[#allocation2 + $0xb0] sm:$0xff] }
  0x66   : > { %2560 = vmatpush2.bf16.msra.mxu1 %v4072_v8  ;;  %2604 = vmatprep.subr.bf16.mxu0 %v4080_v11  ;;  %v4087_v11 = vld [vmem:[%s6034_s1 + $0x264] ss:$8 sps:$4 sm:$0xff]   ;;  %1061 = vst.msk [vmem:[#allocation3 + $0x28] sm:$0xff] %vm4393_vm4, %v1053_v21  ;;  %v4125_v21 = vld [vmem:[%s6034_s1 + $0x214] ss:$8 sps:$4 sm:$0xff]  }
  0x67   : > { %2561 = vmatprep.subr.bf16.mxu1 %v4076_v9  ;;  %v492_v25 = vrot.slane %v490_v18, 5 }
  0x68   : > { %882 = vrot.lane.b32.xlu0 %v4696_v4, %s4330_s25 }
  0x69   : > { %888 = vrot.lane.b32.xlu1 %v865_v12, %s4330_s25  ;;  %v493_v4 = vsel %vm4456_vm8, %v488_v17, %v492_v25  ;;  %v1054_v17 = vld [vmem:[#allocation2 + $0xb8] sm:$0xff]  ;;  %v4098_v25 = vld [vmem:[%s6034_s1 + $0x364] ss:$8 sps:$4 sm:$0xff]  }
  0x6a   : > { %2562 = vmatpush2.bf16.msra.mxu1 %v4081_v14  ;;  %514 = vst.msk [vmem:[#allocation2 + $0x98] sm:$0xff] %vm4393_vm4, %v493_v4  ;;  %v4088_v14 = vld [vmem:[%s6034_s1 + $0x370] ss:$8 sps:$4 sm:$0xff]   ;;  %1062 = vst.msk [vmem:[#allocation3 + $0x58] sm:$0xff] %vm4393_vm4, %v1054_v17 }
  0x6b   : > { %2677 = vmatprep.subr.bf16.mxu1 %v4090_v16 }
  0x6c   : > { %947 = vrot.lane.b32.xlu0 %v4540_v42, %s4329_s24  ;;  %v479_v42 = vsel %vm4456_vm8, %v474_v59, %v478_v27 }
  0x6d   : > { %953 = vrot.lane.b32.xlu1 %v930_v24, %s4329_s24  ;;  %513 = vst.msk [vmem:[#allocation2 + $0x90] sm:$0xff] %vm4393_vm4, %v479_v42  ;;  %v4095_v24 = vld [vmem:[%s6034_s1 + $0x254] ss:$8 sps:$4 sm:$0xff]  }
  0x70   : > { %886 = vrot.lane.b32.xlu0 %v4748_v20, %s4330_s25 }
  0x71   : > { %1006 = vrot.lane.b32.xlu1 %v4570_v6, %s4331_s26  ;;  %v995_v38 = vld [vmem:[#allocation2 + $0x98] sm:$0xff]  ;;  %v844_v6 = vld [vmem:[#allocation2 + $0x70] sm:$0xff] }
  0x72   : > { %852 = vst.msk [vmem:[#allocation3 + $0xa4] sm:$0xff] %vm4393_vm4, %v844_v6 }
  0x74   : > { %951 = vrot.lane.b32.xlu0 %v4760_v26, %s4329_s24  ;;  %v994_v31 = vld [vmem:[#allocation2 + $0x90] sm:$0xff] }
  0x75   : > { %1010 = vrot.lane.b32.xlu1 %v4623_v39, %s4331_s26  ;;  %856 = vst.msk [vmem:[#allocation3 + $0x164] sm:$0xff] %vm4393_vm4, %v994_v31  ;;  %v843_v39 = vld [vmem:[#allocation2 + $0x68] sm:$0xff] }
  0x76   : > { %851 = vst.msk [vmem:[#allocation3 + $0x74] sm:$0xff] %vm4393_vm4, %v843_v39  ;;  %v1055_v39 = vld [vmem:[#allocation2 + $0xc0] sm:$0xff] }
  0x77   : > { %1063 = vst.msk [vmem:[#allocation3 + $0x88] sm:$0xff] %vm4393_vm4, %v1055_v39  ;;  %v4138_v39 = vld [vmem:[%s6034_s1 + $0x314] ss:$8 sps:$4 sm:$0xff]  }
  0x78   : > { %1004 = vrot.lane.b32.xlu0 %v4602_v30, %s4331_s26  ;;  %v846_v30 = vld [vmem:[#allocation2 + $0x80] sm:$0xff] }
  0x79   : > { %1014 = vrot.lane.b32.xlu1 %v4654_v47, %s4331_s26  ;;  %854 = vst.msk [vmem:[#allocation3 + $0x104] sm:$0xff] %vm4393_vm4, %v846_v30  ;;  %v847_v47 = vld [vmem:[#allocation2 + $0x88] sm:$0xff] }
  0x7a   : > { %855 = vst.msk [vmem:[#allocation3 + $0x134] sm:$0xff] %vm4393_vm4, %v847_v47  ;;  %v1056_v30 = vld [vmem:[#allocation2 + $0xc8] sm:$0xff]  ;;  %v4099_v47 = vld [vmem:[#allocation3 + $0x60] ss:$48 sps:$4 sm:$0xff]  }
  0x7b   : > { %1064 = vst.msk [vmem:[#allocation3 + $0xb8] sm:$0xff] %vm4393_vm4, %v1056_v30 }
  0x7c   : > { %1008 = vrot.lane.b32.xlu0 %v4649_v45, %s4331_s26  ;;  %v845_v45 = vld [vmem:[#allocation2 + $0x78] sm:$0xff] }
  0x7d   : > { %1018 = vrot.lane.b32.xlu1 %v995_v38, %s4331_s26  ;;  %853 = vst.msk [vmem:[#allocation3 + $0xd4] sm:$0xff] %vm4393_vm4, %v845_v45  ;;  %v4105_v38 = vld [vmem:[%s6034_s1 + $0x354] ss:$8 sps:$4 sm:$0xff]  }
  0x80   : > { %1012 = vrot.lane.b32.xlu0 %v4671_v52, %s4331_s26 }
  0x84   : > { %1016 = vrot.lane.b32.xlu0 %v994_v31, %s4331_s26  ;;  %v4102_v31 = vld [vmem:[%s6034_s1 + $0x244] ss:$8 sps:$4 sm:$0xff]  }
  0x91   : > { %v720_v52 = vpop.permute.xlu1 %719 }
  0x92   : > { %v735_v20 = vrot.slane %v720_v52, 4 }
  0x94   : > { %v744_v37 = vsel %vm743_vm11, %v735_v20, %v720_v52 }
  0x95   : > { %v722_v26 = vpop.permute.xlu1 %721 }
  0x96   : > { %v736_v40 = vrot.slane %v722_v26, 4 }
  0x98   : > { %v745_v49 = vsel %vm743_vm11, %v736_v40, %v722_v26 }
  0x99   : > { %v791_v61 = vpop.permute.xlu1 %790 }
  0x9a   : > { %v652_v32 = vpop.permute.xlu0 %651  ;;  %v805_v44 = vrot.slane %v791_v61, 4 }
  0x9b   : > { %v667_v36 = vrot.slane %v652_v32, 4 }
  0x9c   : > { %v814_v34 = vsel %vm812_vm1, %v805_v44, %v791_v61 }
  0x9d   : > { %v676_v43 = vsel %vm675_vm14, %v667_v36, %v652_v32  ;;  %v658_v51 = vpop.permute.xlu1 %657  ;;  %v1057_v32 = vld [vmem:[#allocation2 + $0xd0] sm:$0xff]  ;;  %v1058_v36 = vld [vmem:[#allocation2 + $0xd8] sm:$0xff] }
  0x9e   : > { %695 = vst.msk [vmem:[#allocation3 + $0x4] sm:$0xff] %vm4935_vm15, %v676_v43  ;;  %v654_v46 = vpop.permute.xlu0 %653  ;;  %v670_v55 = vrot.slane %v658_v51, 4  ;;  %v534_v43 = vld [vmem:[%s4417_s19 + $0x98] sm:$0x11] }
  0x9f   : > { %v668_v48 = vrot.slane %v654_v46, 4  ;;  %763 = vst.msk [vmem:[#allocation3 + $0x8] sm:$0xff] %vm4940_vm0, %v744_v37  ;;  %v533_v37 = vld [vmem:[%s4417_s19 + $0x90] sm:$0xee] }
  0xa0   : > { %v679_v57 = vsel %vm675_vm14, %v670_v55, %v658_v51  ;;  %1065 = vst.msk [vmem:[#allocation3 + $0xe8] sm:$0xff] %vm4393_vm4, %v1057_v32  ;;  %1066 = vst.msk [vmem:[#allocation3 + $0x118] sm:$0xff] %vm4393_vm4, %v1058_v36  ;;  %v3655_v44 = vrot.slane %v533_v37, 9  ;;  %v4103_v51 = vld [vmem:[%s6034_s1 + $0x350] ss:$8 sps:$4 sm:$0xff]  }
  0xa1   : > { %v677_v53 = vsel %vm675_vm14, %v668_v48, %v654_v46  ;;  %698 = vst.msk [vmem:[#allocation3 + $0x94] sm:$0xff] %vm4935_vm15, %v679_v57  ;;  %v4100_v46 = vld [vmem:[%s6034_s1 + $0x240] ss:$8 sps:$4 sm:$0xff]   ;;  %v4141_v37 = vld [vmem:[%s6034_s1 + $0x2f4] ss:$8 sps:$4 sm:$0xff]  }
  0xa2   : > { %696 = vst.msk [vmem:[#allocation3 + $0x34] sm:$0xff] %vm4935_vm15, %v677_v53  ;;  %v789_v22 = vpop.permute.xlu0 %788 }
  0xa3   : > { %764 = vst.msk [vmem:[#allocation3 + $0x38] sm:$0xff] %vm4940_vm0, %v745_v49  ;;  %v804_v56 = vrot.slane %v789_v22, 4  ;;  %v662_v58 = vpop.permute.xlu1 %661  ;;  %v596_v49 = vrot.slane %v534_v43, 5 }
  0xa4   : > { %833 = vst.msk [vmem:[#allocation3 + $0x3c] sm:$0xff] %vm4951_vm6, %v814_v34  ;;  %v672_v5 = vrot.slane %v662_v58, 4 }
  0xa5   : > { %v813_v60 = vsel %vm812_vm1, %v804_v56, %v789_v22  ;;  %v4110_v22 = vld [vmem:[%s6034_s1 + $0x234] ss:$8 sps:$4 sm:$0xff]   ;;  %v4113_v56 = vld [vmem:[%s6034_s1 + $0x344] ss:$8 sps:$4 sm:$0xff]  }
  0xa6   : > { %832 = vst.msk [vmem:[#allocation3 + $0xc] sm:$0xff] %vm4951_vm6, %v813_v60  ;;  %v656_v62 = vpop.permute.xlu0 %655  ;;  %v681_v2 = vsel %vm675_vm14, %v672_v5, %v662_v58  ;;  %v597_v58 = vsel %vm4397_vm5, %v3655_v44, %v596_v49  ;;  %v1059_v60 = vld [vmem:[#allocation2 + $0xe0] sm:$0xff]  ;;  %v4108_v5 = vld [vmem:[%s6034_s1 + $0x230] ss:$8 sps:$4 sm:$0xff]  }
  0xa7   : > { %v669_v63 = vrot.slane %v656_v62, 4  ;;  %700 = vst.msk [vmem:[#allocation3 + $0xf4] sm:$0xff] %vm4935_vm15, %v681_v2  ;;  %v666_v35 = vpop.permute.xlu1 %665  ;;  %v4114_v2 = vld [vmem:[#allocation3 + $0xc0] ss:$48 sps:$4 sm:$0xff]  }
  0xa8   : > { %v674_v10 = vrot.slane %v666_v35, 4  ;;  %618 = vst.msk [vmem:[#allocation2 + $0xe8] sm:$0xff] %vm4393_vm4, %v597_v58  ;;  %1067 = vst.msk [vmem:[#allocation3 + $0x148] sm:$0xff] %vm4393_vm4, %v1059_v60 }
  0xa9   : > { %v678_v8 = vsel %vm675_vm14, %v669_v63, %v656_v62  ;;  %v4075_v9 = vld [vmem:[#allocation3 + $0x4] ss:$48 sps:$4 sm:$0xff]  }
  0xaa   : > { %697 = vst.msk [vmem:[#allocation3 + $0x64] sm:$0xff] %vm4935_vm15, %v678_v8  ;;  %v660_v50 = vpop.permute.xlu0 %659  ;;  %2490 = vmatprep.mubr.bf16.mxu0 %v4075_v9  ;;  %v683_v15 = vsel %vm675_vm14, %v674_v10, %v666_v35  ;;  %v4082_v19 = vld [vmem:[#allocation3 + $0x8] ss:$48 sps:$4 sm:$0xff]   ;;  %v4117_v8 = vld [vmem:[%s6034_s1 + $0x224] ss:$8 sps:$4 sm:$0xff]  }
  0xab   : > { %v671_v12 = vrot.slane %v660_v50, 4  ;;  %2491 = vmatmul.mubr.bf16.vlgmr.msra.gmra.mxu0 %v4073_v3  ;;  %702 = vst.msk [vmem:[#allocation3 + $0x154] sm:$0xff] %vm4935_vm15, %v683_v15  ;;  %v726_v16 = vpop.permute.xlu1 %725  ;;  %v4120_v9 = vld [vmem:[%s6034_s1 + $0x334] ss:$8 sps:$4 sm:$0xff]   ;;  %v4118_v15 = vld [vmem:[%s6034_s1 + $0x330] ss:$8 sps:$4 sm:$0xff]  }
  0xac   : > { %2605 = vmatpush1.bf16.msra.mxu0 %v4078_v7  ;;  %v738_v23 = vrot.slane %v726_v16, 4  ;;  %v4111_v7 = vld [vmem:[%s6034_s1 + $0x340] ss:$8 sps:$4 sm:$0xff]  }
  0xad   : > { %v680_v18 = vsel %vm675_vm14, %v671_v12, %v660_v50  ;;  %v4084_v59 = vld [vmem:[#allocation3 + $0xc] ss:$48 sps:$4 sm:$0xff]   ;;  %2606 = vmatprep.subr.bf16.mxu0 %v4087_v11  ;;  %v4130_v33 = vld [vmem:[#allocation3 + $0x10] ss:$48 sps:$4 sm:$0xff]  }
  0xae   : > { %699 = vst.msk [vmem:[#allocation3 + $0xc4] sm:$0xff] %vm4935_vm15, %v680_v18  ;;  %v664_v27 = vpop.permute.xlu0 %663  ;;  %2563 = vmatprep.mubr.bf16.mxu1 %v4084_v59  ;;  %v747_v42 = vsel %vm743_vm11, %v738_v23, %v726_v16  ;;  %v4128_v18 = vld [vmem:[%s6034_s1 + $0x324] ss:$8 sps:$4 sm:$0xff]  }
  0xaf   : > { %v673_v4 = vrot.slane %v664_v27, 4  ;;  %2564 = vmatmul.mubr.bf16.vlgmr.msra.gmra.mxu1 %v4082_v19  ;;  %766 = vst.msk [vmem:[#allocation3 + $0x98] sm:$0xff] %vm4940_vm0, %v747_v42  ;;  %v795_v6 = vpop.permute.xlu1 %794  ;;  %v1060_v59 = vld [vmem:[#allocation2 + $0xe8] sm:$0xff] }
  0xb0   : > { %2607 = vmatpush1.bf16.msra.mxu0 %v4085_v13  ;;  %2678 = vmatpush1.bf16.msra.mxu1 %v4088_v14  ;;  %v807_v20 = vrot.slane %v795_v6, 4  ;;  %v4115_v13 = vld [vmem:[%s6034_s1 + $0x220] ss:$8 sps:$4 sm:$0xff]   ;;  %1068 = vst.msk [vmem:[#allocation3 + $0x178] sm:$0xff] %vm4393_vm4, %v1060_v59  ;;  %vm3272_vm4 = vcmask 130048  }
  0xb1   : > { %v4091_v45 = vld [vmem:[#allocation3 + $0x64] ss:$48 sps:$4 sm:$0xff]   ;;  %v682_v52 = vsel %vm675_vm14, %v673_v4, %v664_v27  ;;  %2608 = vmatprep.subr.bf16.mxu0 %v4095_v24  ;;  %2679 = vmatprep.subr.bf16.mxu1 %v4098_v25  ;;  %v4123_v25 = vld [vmem:[%s6034_s1 + $0x210] ss:$8 sps:$4 sm:$0xff]   ;;  %v4126_v27 = vld [vmem:[%s6034_s1 + $0x320] ss:$8 sps:$4 sm:$0xff]  }
  0xb2   : > { %701 = vst.msk [vmem:[#allocation3 + $0x124] sm:$0xff] %vm4935_vm15, %v682_v52  ;;  %v724_v26 = vpop.permute.xlu0 %723  ;;  %2500 = vmatprep.mubr.bf16.mxu0 %v4091_v45  ;;  %v816_v61 = vsel %vm812_vm1, %v807_v20, %v795_v6  ;;  %v4133_v20 = vld [vmem:[%s6034_s1 + $0x200] ss:$8 sps:$4 sm:$0xff]  }
  0xb3   : > { %v737_v40 = vrot.slane %v724_v26, 4  ;;  %2501 = vmatmul.mubr.bf16.gmra.mxu0 %v4099_v47  ;;  %835 = vst.msk [vmem:[#allocation3 + $0x9c] sm:$0xff] %vm4951_vm6, %v816_v61  ;;  %v730_v48 = vpop.permute.xlu1 %729  ;;  %v4132_v47 = vld [vmem:[#allocation3 + $0x14] ss:$48 sps:$4 sm:$0xff]  }
  0xb4   : > { %2609 = vmatpush1.bf16.msra.mxu0 %v4093_v28  ;;  %2680 = vmatpush1.bf16.msra.mxu1 %v4096_v29  ;;  %v740_v55 = vrot.slane %v730_v48, 4  ;;  %v4129_v28 = vld [vmem:[#allocation3 + $0x120] ss:$48 sps:$4 sm:$0xff]  }
  0xb5   : > { %v746_v53 = vsel %vm743_vm11, %v737_v40, %v724_v26  ;;  %v4106_v34 = vld [vmem:[#allocation3 + $0xc4] ss:$48 sps:$4 sm:$0xff]   ;;  %2610 = vmatprep.subr.bf16.mxu0 %v4102_v31  ;;  %2681 = vmatprep.subr.bf16.mxu1 %v4105_v38  ;;  %v4136_v26 = vld [vmem:[%s6034_s1 + $0x310] ss:$8 sps:$4 sm:$0xff]  }
  0xb6   : > { %765 = vst.msk [vmem:[#allocation3 + $0x68] sm:$0xff] %vm4940_vm0, %v746_v53  ;;  %v793_v57 = vpop.permute.xlu0 %792  ;;  %2510 = vmatprep.mubr.bf16.mxu0 %v4106_v34  ;;  %v749_v63 = vsel %vm743_vm11, %v740_v55, %v730_v48  ;;  %v4135_v38 = vld [vmem:[%s6034_s1 + $0x204] ss:$8 sps:$4 sm:$0xff]   ;;  %v4142_v48 = vld [vmem:[%s6034_s1 + $0x300] ss:$8 sps:$4 sm:$0xff]  }
  0xb7   : > { %v806_v62 = vrot.slane %v793_v57, 4  ;;  %768 = vst.msk [vmem:[#allocation3 + $0xf8] sm:$0xff] %vm4940_vm0, %v749_v63  ;;  %v799_v1 = vpop.permute.xlu1 %798  ;;  %v4144_v40 = vld [vmem:[%s6034_s1 + $0x304] ss:$8 sps:$4 sm:$0xff]   ;;  %v4151_v63 = vld [vmem:[%s6034_s1 + $0x3f0] ss:$8 sps:$4 sm:$0xff]  }
  0xb8   : > { %2611 = vmatpush1.bf16.msra.mxu0 %v4100_v46  ;;  %2682 = vmatpush1.bf16.msra.mxu1 %v4103_v51  ;;  %v809_v3 = vrot.slane %v799_v1, 4  ;;  %v4139_v46 = vld [vmem:[%s6034_s1 + $0x2f0] ss:$8 sps:$4 sm:$0xff]  }
  0xb9   : > { %v815_v35 = vsel %vm812_vm1, %v806_v62, %v793_v57  ;;  %2612 = vmatprep.subr.bf16.mxu0 %v4110_v22  ;;  %2683 = vmatprep.subr.bf16.mxu1 %v4113_v56  ;;  %v4121_v11 = vld [vmem:[#allocation3 + $0x124] ss:$48 sps:$4 sm:$0xff]   ;;  %v4148_v62 = vld [vmem:[%s6034_s1 + $0x2e0] ss:$8 sps:$4 sm:$0xff]  }
  0xba   : > { %834 = vst.msk [vmem:[#allocation3 + $0x6c] sm:$0xff] %vm4951_vm6, %v815_v35  ;;  %v728_v10 = vpop.permute.xlu0 %727  ;;  %v818_v12 = vsel %vm812_vm1, %v809_v3, %v799_v1  ;;  %v4150_v22 = vld [vmem:[%s6034_s1 + $0x2e4] ss:$8 sps:$4 sm:$0xff]   ;;  %v4153_v56 = vld [vmem:[%s6034_s1 + $0x3f4] ss:$8 sps:$4 sm:$0xff]  }
  0xbb   : > { %v739_v50 = vrot.slane %v728_v10, 4  ;;  %2511 = vmatmul.mubr.bf16.gmra.mxu0 %v4114_v2  ;;  %837 = vst.msk [vmem:[#allocation3 + $0xfc] sm:$0xff] %vm4951_vm6, %v818_v12  ;;  %v734_v14 = vpop.permute.xlu1 %733  ;;  %v4159_v35 = vld [vmem:[%s6034_s1 + $0x3e4] ss:$8 sps:$4 sm:$0xff]  }
  0xbc   : > { %2613 = vmatpush1.bf16.msra.mxu0 %v4108_v5  ;;  %2684 = vmatpush1.bf16.msra.mxu1 %v4111_v7  ;;  %v742_v17 = vrot.slane %v734_v14, 4  ;;  %v4156_v7 = vld [vmem:[%s6034_s1 + $0x2d4] ss:$8 sps:$4 sm:$0xff]  }
  0xbd   : > { %v748_v16 = vsel %vm743_vm11, %v739_v50, %v728_v10  ;;  %2614 = vmatprep.subr.bf16.mxu0 %v4117_v8  ;;  %2685 = vmatprep.subr.bf16.mxu1 %v4120_v9  ;;  %v4147_v0 = vld [vmem:[#allocation3 + $0x68] ss:$48 sps:$4 sm:$0xff]  }
  0xbe   : > { %767 = vst.msk [vmem:[#allocation3 + $0xc8] sm:$0xff] %vm4940_vm0, %v748_v16  ;;  %v797_v19 = vpop.permute.xlu0 %796  ;;  %2520 = vmatprep.mubr.bf16.mxu0 %v4121_v11  ;;  %v751_v24 = vsel %vm743_vm11, %v742_v17, %v734_v14  ;;  %v4154_v10 = vld [vmem:[%s6034_s1 + $0x2d0] ss:$8 sps:$4 sm:$0xff]   ;;  %v4157_v50 = vld [vmem:[%s6034_s1 + $0x3e0] ss:$8 sps:$4 sm:$0xff]  }
  0xbf   : > { %v808_v23 = vrot.slane %v797_v19, 4  ;;  %770 = vst.msk [vmem:[#allocation3 + $0x158] sm:$0xff] %vm4940_vm0, %v751_v24  ;;  %v803_v29 = vpop.permute.xlu1 %802  ;;  %v4165_v16 = vld [vmem:[%s6034_s1 + $0x2c4] ss:$8 sps:$4 sm:$0xff]   ;;  %v4166_v24 = vld [vmem:[%s6034_s1 + $0x3d0] ss:$8 sps:$4 sm:$0xff]  }
  0xc0   : > { %2615 = vmatpush1.bf16.msra.mxu0 %v4115_v13  ;;  %2686 = vmatpush1.bf16.msra.mxu1 %v4118_v15  ;;  %v811_v31 = vrot.slane %v803_v29, 4 }
  0xc1   : > { %v817_v4 = vsel %vm812_vm1, %v808_v23, %v797_v19  ;;  %v4145_v42 = vld [vmem:[#allocation3 + $0x6c] ss:$48 sps:$4 sm:$0xff]   ;;  %2616 = vmatprep.subr.bf16.mxu0 %v4125_v21  ;;  %2687 = vmatprep.subr.bf16.mxu1 %v4128_v18  ;;  %v4163_v23 = vld [vmem:[%s6034_s1 + $0x2c0] ss:$8 sps:$4 sm:$0xff]  }
  0xc2   : > { %836 = vst.msk [vmem:[#allocation3 + $0xcc] sm:$0xff] %vm4951_vm6, %v817_v4  ;;  %v732_v6 = vpop.permute.xlu0 %731  ;;  %2573 = vmatprep.mubr.bf16.mxu1 %v4145_v42  ;;  %v820_v45 = vsel %vm812_vm1, %v811_v31, %v803_v29  ;;  %v4168_v21 = vld [vmem:[%s6034_s1 + $0x3d4] ss:$8 sps:$4 sm:$0xff]   ;;  %v4174_v29 = vld [vmem:[%s6034_s1 + $0x3c4] ss:$8 sps:$4 sm:$0xff]  }
  0xc3   : > { %v741_v30 = vrot.slane %v732_v6, 4  ;;  %2521 = vmatmul.mubr.bf16.gmra.mxu0 %v4129_v28  ;;  %2574 = vmatmul.mubr.bf16.gmra.mxu1 %v4147_v0  ;;  %839 = vst.msk [vmem:[#allocation3 + $0x15c] sm:$0xff] %vm4951_vm6, %v820_v45  ;;  %v877_v52 = vpop.permute.xlu1 %876  ;;  %v4171_v28 = vld [vmem:[%s6034_s1 + $0x2b4] ss:$8 sps:$4 sm:$0xff]   ;;  %v4169_v31 = vld [vmem:[%s6034_s1 + $0x2b0] ss:$8 sps:$4 sm:$0xff]  }
  0xc4   : > { %2617 = vmatpush1.bf16.msra.mxu0 %v4123_v25  ;;  %2688 = vmatpush1.bf16.msra.mxu1 %v4126_v27  ;;  %v891_v36 = vrot.slane %v877_v52, 4 }
  0xc5   : > { %v750_v32 = vsel %vm743_vm11, %v741_v30, %v732_v6  ;;  %2636 = vmatprep.mubr.bf16.mxu0 %v4132_v47  ;;  %2618 = vmatprep.subr.bf16.mxu0 %v4135_v38  ;;  %v4162_v34 = vld [vmem:[#allocation3 + $0xc8] ss:$48 sps:$4 sm:$0xff]   ;;  %v4180_v47 = vld [vmem:[%s6034_s1 + $0x2a4] ss:$8 sps:$4 sm:$0xff]  }
  0xc6   : > { %769 = vst.msk [vmem:[#allocation3 + $0x128] sm:$0xff] %vm4940_vm0, %v750_v32  ;;  %v801_v61 = vpop.permute.xlu0 %800  ;;  %2689 = vmatprep.subr.bf16.mxu1 %v4138_v39  ;;  %v899_v44 = vsel %vm675_vm14, %v891_v36, %v877_v52  ;;  %v4172_v6 = vld [vmem:[%s6034_s1 + $0x3c0] ss:$8 sps:$4 sm:$0xff]   ;;  %v4183_v52 = vld [vmem:[%s6034_s1 + $0x3b4] ss:$8 sps:$4 sm:$0xff]  }
  0xc7   : > { %v810_v43 = vrot.slane %v801_v61, 4  ;;  %915 = vst.msk [vmem:[#allocation3 + $0x48] sm:$0xff] %vm4935_vm15, %v899_v44  ;;  %v942_v49 = vpop.permute.xlu1 %941  ;;  %v4186_v44 = vld [vmem:[%s6034_s1 + $0x294] ss:$8 sps:$4 sm:$0xff]  }
  0xc8   : > { %2619 = vmatpush1.bf16.msra.mxu0 %v4133_v20  ;;  %2690 = vmatpush1.bf16.msra.mxu1 %v4136_v26  ;;  %v956_v55 = vrot.slane %v942_v49, 4 }
  0xc9   : > { %v819_v51 = vsel %vm812_vm1, %v810_v43, %v801_v61  ;;  %v4160_v53 = vld [vmem:[#allocation3 + $0xcc] ss:$48 sps:$4 sm:$0xff]   ;;  %2620 = vmatprep.subr.bf16.mxu0 %v4141_v37  ;;  %2691 = vmatprep.subr.bf16.mxu1 %v4144_v40  ;;  %v4178_v37 = vld [vmem:[%s6034_s1 + $0x2a0] ss:$8 sps:$4 sm:$0xff]   ;;  %v4181_v40 = vld [vmem:[%s6034_s1 + $0x3b0] ss:$8 sps:$4 sm:$0xff]  }
  0xca   : > { %838 = vst.msk [vmem:[#allocation3 + $0x12c] sm:$0xff] %vm4951_vm6, %v819_v51  ;;  %v875_v57 = vpop.permute.xlu0 %874  ;;  %2583 = vmatprep.mubr.bf16.mxu1 %v4160_v53  ;;  %v964_v60 = vsel %vm743_vm11, %v956_v55, %v942_v49  ;;  %v4187_v55 = vld [vmem:[%s6034_s1 + $0x3a0] ss:$8 sps:$4 sm:$0xff]  }
  0xcb   : > { %v890_v58 = vrot.slane %v875_v57, 4  ;;  %2584 = vmatmul.mubr.bf16.gmra.mxu1 %v4162_v34  ;;  %980 = vst.msk [vmem:[#allocation3 + $0x4c] sm:$0xff] %vm4940_vm0, %v964_v60  ;;  %v881_v5 = vpop.permute.xlu1 %880  ;;  %v4184_v34 = vld [vmem:[%s6034_s1 + $0x290] ss:$8 sps:$4 sm:$0xff]  }
  0xcc   : > { %2621 = vmatpush2.bf16.msra.mxu0 %v4139_v46  ;;  %2692 = vmatpush1.bf16.msra.mxu1 %v4142_v48  ;;  %v893_v1 = vrot.slane %v881_v5, 4  ;;  %v4189_v46 = vld [vmem:[%s6034_s1 + $0x3a4] ss:$8 sps:$4 sm:$0xff]  }
  0xcd   : > { %v898_v2 = vsel %vm675_vm14, %v890_v58, %v875_v57  ;;  %2622 = vmatprep.subr.bf16.mxu0 %v4150_v22  ;;  %2693 = vmatprep.subr.bf16.mxu1 %v4153_v56  ;;  %v4177_v13 = vld [vmem:[#allocation3 + $0x128] ss:$48 sps:$4 sm:$0xff]   ;;  %v4192_v57 = vld [vmem:[%s6034_s1 + $0x284] ss:$8 sps:$4 sm:$0xff]   ;;  %v4195_v58 = vld [vmem:[%s6034_s1 + $0x394] ss:$8 sps:$4 sm:$0xff]  }
  0xce   : > { %914 = vst.msk [vmem:[#allocation3 + $0x18] sm:$0xff] %vm4935_vm15, %v898_v2  ;;  %v940_v8 = vpop.permute.xlu0 %939  ;;  %v901_v9 = vsel %vm675_vm14, %v893_v1, %v881_v5  ;;  %v4190_v2 = vld [vmem:[%s6034_s1 + $0x280] ss:$8 sps:$4 sm:$0xff]   ;;  %v4193_v1 = vld [vmem:[%s6034_s1 + $0x390] ss:$8 sps:$4 sm:$0xff]  }
  0xcf   : > { %v955_v3 = vrot.slane %v940_v8, 4  ;;  %917 = vst.msk [vmem:[#allocation3 + $0xa8] sm:$0xff] %vm4935_vm15, %v901_v9  ;;  %v946_v11 = vpop.permute.xlu1 %945 }
  0xd0   : > { %2623 = vmatpush2.bf16.msra.mxu0 %v4148_v62  ;;  %2694 = vmatpush2.bf16.msra.mxu1 %v4151_v63  ;;  %v958_v15 = vrot.slane %v946_v11, 4 }
  0xd1   : > { %v4175_v12 = vld [vmem:[#allocation3 + $0x12c] ss:$48 sps:$4 sm:$0xff]   ;;  %v963_v14 = vsel %vm743_vm11, %v955_v3, %v940_v8  ;;  %2624 = vmatprep.subr.bf16.mxu0 %v4156_v7  ;;  %2695 = vmatprep.subr.bf16.mxu1 %v4159_v35 }
  0xd2   : > { %979 = vst.msk [vmem:[#allocation3 + $0x1c] sm:$0xff] %vm4940_vm0, %v963_v14  ;;  %v879_v17 = vpop.permute.xlu0 %878  ;;  %2593 = vmatprep.mubr.bf16.mxu1 %v4175_v12  ;;  %v966_v19 = vsel %vm743_vm11, %v958_v15, %v946_v11  ;;  %v4198_v8 = vld [vmem:[%s6034_s1 + $0x384] ss:$8 sps:$4 sm:$0xff]   ;;  %v4201_v3 = vld [vmem:[%s6034_s1 + $0x474] ss:$8 sps:$4 sm:$0xff]  }
  0xd3   : > { %v892_v18 = vrot.slane %v879_v17, 4  ;;  %2594 = vmatmul.mubr.bf16.gmra.mxu1 %v4177_v13  ;;  %982 = vst.msk [vmem:[#allocation3 + $0xac] sm:$0xff] %vm4940_vm0, %v966_v19  ;;  %v885_v59 = vpop.permute.xlu1 %884  ;;  %v4196_v12 = vld [vmem:[%s6034_s1 + $0x380] ss:$8 sps:$4 sm:$0xff]   ;;  %v4202_v13 = vld [vmem:[#allocation3 + $0x74] ss:$48 sps:$4 sm:$0xff]  }
  0xd4   : > { %2625 = vmatpush2.bf16.msra.mxu0 %v4154_v10  ;;  %2696 = vmatpush2.bf16.msra.mxu1 %v4157_v50  ;;  %v895_v27 = vrot.slane %v885_v59, 4 }
  0xd5   : > { %v900_v25 = vsel %vm675_vm14, %v892_v18, %v879_v17  ;;  %2626 = vmatprep.subr.bf16.mxu0 %v4165_v16  ;;  %2697 = vmatprep.subr.bf16.mxu1 %v4168_v21  ;;  %v4199_v16 = vld [vmem:[%s6034_s1 + $0x470] ss:$8 sps:$4 sm:$0xff]   ;;  %v4234_v21 = vld [vmem:[%s6034_s1 + $0x574] ss:$8 sps:$4 sm:$0xff]   ;;  %v4209_v18 = vld [vmem:[%s6034_s1 + $0x464] ss:$8 sps:$4 sm:$0xff]  }
  0xd6   : > { %916 = vst.msk [vmem:[#allocation3 + $0x78] sm:$0xff] %vm4935_vm15, %v900_v25  ;;  %v944_v4 = vpop.permute.xlu0 %943  ;;  %v903_v0 = vsel %vm675_vm14, %v895_v27, %v885_v59  ;;  %v4232_v25 = vld [vmem:[%s6034_s1 + $0x570] ss:$8 sps:$4 sm:$0xff]  }
  0xd7   : > { %v957_v42 = vrot.slane %v944_v4, 4  ;;  %919 = vst.msk [vmem:[#allocation3 + $0x108] sm:$0xff] %vm4935_vm15, %v903_v0  ;;  %v950_v38 = vpop.permute.xlu1 %949 }
  0xd8   : > { %2627 = vmatpush2.bf16.msra.mxu0 %v4163_v23  ;;  %2698 = vmatpush2.bf16.msra.mxu1 %v4166_v24  ;;  %v960_v45 = vrot.slane %v950_v38, 4  ;;  %v4204_v23 = vld [vmem:[#allocation3 + $0x18] ss:$48 sps:$4 sm:$0xff]  }
  0xd9   : > { %v965_v39 = vsel %vm743_vm11, %v957_v42, %v944_v4  ;;  %v4206_v30 = vld [vmem:[#allocation3 + $0x1c] ss:$48 sps:$4 sm:$0xff]   ;;  %2628 = vmatprep.subr.bf16.mxu0 %v4171_v28  ;;  %2699 = vmatprep.subr.bf16.mxu1 %v4174_v29  ;;  %v4207_v29 = vld [vmem:[%s6034_s1 + $0x460] ss:$8 sps:$4 sm:$0xff]  }
  0xda   : > { %981 = vst.msk [vmem:[#allocation3 + $0x7c] sm:$0xff] %vm4940_vm0, %v965_v39  ;;  %v883_v20 = vpop.permute.xlu0 %882  ;;  %2709 = vmatprep.mubr.bf16.mxu1 %v4206_v30  ;;  %v968_v32 = vsel %vm743_vm11, %v960_v45, %v950_v38  ;;  %v4212_v4 = vld [vmem:[%s6034_s1 + $0x454] ss:$8 sps:$4 sm:$0xff]   ;;  %v4241_v42 = vld [vmem:[%s6034_s1 + $0x564] ss:$8 sps:$4 sm:$0xff]  }
  0xdb   : > { %v894_v26 = vrot.slane %v883_v20, 4  ;;  %984 = vst.msk [vmem:[#allocation3 + $0x10c] sm:$0xff] %vm4940_vm0, %v968_v32  ;;  %v889_v36 = vpop.permute.xlu1 %888  ;;  %v1089_v38 = vld [vmem:[#allocation3 + $0xa0] sm:$0xff] }
  0xdc   : > { %2629 = vmatpush2.bf16.msra.mxu0 %v4169_v31  ;;  %2700 = vmatpush2.bf16.msra.mxu1 %v4172_v6  ;;  %v897_v43 = vrot.slane %v889_v36, 4  ;;  %v1083_v31 = vld [vmem:[#allocation3 + $0x70] sm:$0xff]  ;;  %v4210_v32 = vld [vmem:[%s6034_s1 + $0x450] ss:$8 sps:$4 sm:$0xff]  }
  0xdd   : > { %v902_v61 = vsel %vm675_vm14, %v894_v26, %v883_v20  ;;  %2630 = vmatprep.subr.bf16.mxu0 %v4180_v47  ;;  %2701 = vmatprep.subr.bf16.mxu1 %v4183_v52  ;;  %v4213_v45 = vld [vmem:[#allocation3 + $0xd4] ss:$48 sps:$4 sm:$0xff]   ;;  %v4239_v47 = vld [vmem:[%s6034_s1 + $0x560] ss:$8 sps:$4 sm:$0xff]   ;;  %v3672_v26 = vcombine.low %v1083_v31, %v1089_v38  ;;  %v4302_v31 = vld [vmem:[#allocation3 + $0x8c] ss:$48 sps:$4 sm:$0xff]  }
  0xde   : > { %918 = vst.msk [vmem:[#allocation3 + $0xd8] sm:$0xff] %vm4935_vm15, %v902_v61  ;;  %v948_v48 = vpop.permute.xlu0 %947  ;;  %v905_v51 = vsel %vm675_vm14, %v897_v43, %v889_v36  ;;  %v4250_v36 = vld [vmem:[%s6034_s1 + $0x554] ss:$8 sps:$4 sm:$0xff]   ;;  %v4269_v38 = vld [vmem:[%s6034_s1 + $0x4c0] ss:$8 sps:$4 sm:$0xff]  }
  0xdf   : > { %v959_v49 = vrot.slane %v948_v48, 4  ;;  %921 = vst.msk [vmem:[#allocation3 + $0x168] sm:$0xff] %vm4935_vm15, %v905_v51  ;;  %v954_v53 = vpop.permute.xlu1 %953  ;;  %v4218_v51 = vld [vmem:[%s6034_s1 + $0x440] ss:$8 sps:$4 sm:$0xff]  }
  0xe0   : > { %2631 = vmatpush2.bf16.msra.mxu0 %v4178_v37  ;;  %2702 = vmatpush2.bf16.msra.mxu1 %v4181_v40  ;;  %v962_v56 = vrot.slane %v954_v53, 4  ;;  %v4220_v40 = vld [vmem:[%s6034_s1 + $0x444] ss:$8 sps:$4 sm:$0xff]  }
  0xe1   : > { %v967_v22 = vsel %vm743_vm11, %v959_v49, %v948_v48  ;;  %2632 = vmatprep.subr.bf16.mxu0 %v4186_v44  ;;  %2703 = vmatprep.subr.bf16.mxu1 %v4189_v46  ;;  %v4215_v41 = vld [vmem:[#allocation3 + $0x7c] ss:$48 sps:$4 sm:$0xff]   ;;  %v4217_v44 = vld [vmem:[#allocation3 + $0x78] ss:$48 sps:$4 sm:$0xff]  }
  0xe2   : > { %983 = vst.msk [vmem:[#allocation3 + $0xdc] sm:$0xff] %vm4940_vm0, %v967_v22  ;;  %v887_v60 = vpop.permute.xlu0 %886  ;;  %v970_v62 = vsel %vm743_vm11, %v962_v56, %v954_v53  ;;  %v4248_v48 = vld [vmem:[%s6034_s1 + $0x550] ss:$8 sps:$4 sm:$0xff]   ;;  %v4223_v53 = vld [vmem:[%s6034_s1 + $0x434] ss:$8 sps:$4 sm:$0xff]   ;;  %v1095_v22 = vld [vmem:[#allocation3 + $0xd0] sm:$0xff] }
  0xe3   : > { %v896_v5 = vrot.slane %v887_v60, 4  ;;  %986 = vst.msk [vmem:[#allocation3 + $0x16c] sm:$0xff] %vm4940_vm0, %v970_v62  ;;  %v1007_v63 = vpop.permute.xlu1 %1006  ;;  %v1101_v56 = vld [vmem:[#allocation3 + $0x100] sm:$0xff] }
  0xe4   : > { %2633 = vmatpush2.bf16.msra.mxu0 %v4184_v34  ;;  %2704 = vmatpush2.bf16.msra.mxu1 %v4187_v55  ;;  %v1021_v35 = vrot.slane %v1007_v63, 4  ;;  %v4256_v34 = vld [vmem:[%s6034_s1 + $0x544] ss:$8 sps:$4 sm:$0xff]   ;;  %v3684_v62 = vcombine.low %v1095_v22, %v1101_v56  ;;  %v1299_v22 = vlaneseq }
  0xe5   : > { %v904_v7 = vsel %vm675_vm14, %v896_v5, %v887_v60  ;;  %2634 = vmatprep.subr.bf16.mxu0 %v4192_v57  ;;  %2705 = vmatprep.subr.bf16.mxu1 %v4195_v58  ;;  %v4224_v58 = vld [vmem:[#allocation3 + $0x134] ss:$48 sps:$4 sm:$0xff]   ;;  %v4254_v60 = vld [vmem:[%s6034_s1 + $0x540] ss:$8 sps:$4 sm:$0xff]  }
  0xe6   : > { %920 = vst.msk [vmem:[#allocation3 + $0x138] sm:$0xff] %vm4935_vm15, %v904_v7  ;;  %v952_v9 = vpop.permute.xlu0 %951  ;;  %v1029_v50 = vsel %vm812_vm1, %v1021_v35, %v1007_v63  ;;  %v4221_v63 = vld [vmem:[%s6034_s1 + $0x430] ss:$8 sps:$4 sm:$0xff]   ;;  %v5459_v56 = vshrl.u32 %v1299_v22, 7 }
  0xe7   : > { %v961_v10 = vrot.slane %v952_v9, 4  ;;  %1045 = vst.msk [vmem:[#allocation3 + $0x50] sm:$0xff] %vm4951_vm6, %v1029_v50  ;;  %v1011_v11 = vpop.permute.xlu1 %1010  ;;  %v4228_v7 = vld [vmem:[#allocation3 + $0xd8] ss:$48 sps:$4 sm:$0xff]  }
  0xe8   : > { %2635 = vmatpush2.bf16.msra.mxu0 %v4190_v2  ;;  %2706 = vmatpush2.bf16.msra.mxu1 %v4193_v1  ;;  %v1023_v15 = vrot.slane %v1011_v11, 4  ;;  %v4262_v2 = vld [vmem:[%s6034_s1 + $0x534] ss:$8 sps:$4 sm:$0xff]   ;;  %v4231_v1 = vld [vmem:[%s6034_s1 + $0x424] ss:$8 sps:$4 sm:$0xff]   ;;  %6089 = vst [vmem:[#allocation6_spill] sm:$0xff] %v5459_v56 }
  0xe9   : > { %v969_v14 = vsel %vm743_vm11, %v961_v10, %v952_v9  ;;  %2707 = vmatprep.subr.bf16.mxu1 %v4198_v8  ;;  %2750 = vmatprep.subr.bf16.mxu0 %v4201_v3  ;;  %v4226_v46 = vld [vmem:[#allocation3 + $0xdc] ss:$48 sps:$4 sm:$0xff]   ;;  %v4260_v8 = vld [vmem:[%s6034_s1 + $0x530] ss:$8 sps:$4 sm:$0xff]   ;;  %v4266_v10 = vld [vmem:[%s6034_s1 + $0x520] ss:$8 sps:$4 sm:$0xff]  }
  0xea   : > { %985 = vst.msk [vmem:[#allocation3 + $0x13c] sm:$0xff] %vm4940_vm0, %v969_v14  ;;  %v1005_v17 = vpop.permute.xlu0 %1004  ;;  %v1031_v59 = vsel %vm812_vm1, %v1023_v15, %v1011_v11  ;;  %v4268_v3 = vld [vmem:[%s6034_s1 + $0x524] ss:$8 sps:$4 sm:$0xff]   ;;  %v4238_v9 = vld [vmem:[%s6034_s1 + $0x414] ss:$8 sps:$4 sm:$0xff]  }
  0xeb   : > { %v1020_v19 = vrot.slane %v1005_v17, 4  ;;  %2637 = vmatmul.mubr.bf16.vlgmr.msra.gmra.mxu0 %v4130_v33  ;;  %1047 = vst.msk [vmem:[#allocation3 + $0xb0] sm:$0xff] %vm4951_vm6, %v1031_v59  ;;  %v1015_v24 = vpop.permute.xlu1 %1014  ;;  %v4235_v11 = vld [vmem:[#allocation3 + $0x130] ss:$48 sps:$4 sm:$0xff]   ;;  %v4247_v14 = vld [vmem:[%s6034_s1 + $0x404] ss:$8 sps:$4 sm:$0xff]  }
  0xec   : > { %2646 = vmatprep.mubr.bf16.mxu0 %v4202_v13  ;;  %2708 = vmatpush2.bf16.msra.mxu1 %v4196_v12  ;;  %v1025_v28 = vrot.slane %v1015_v24, 4  ;;  %v4236_v12 = vld [vmem:[%s6034_s1 + $0x410] ss:$8 sps:$4 sm:$0xff]   ;;  %v4274_v13 = vld [vmem:[%s6034_s1 + $0x514] ss:$8 sps:$4 sm:$0xff]  }
  0xed   : > { %v1028_v27 = vsel %vm812_vm1, %v1020_v19, %v1005_v17  ;;  %2751 = vmatpush1.bf16.msra.mxu0 %v4199_v16  ;;  %2823 = vmatprep.subr.bf16.mxu1 %v4234_v21  ;;  %v4244_v15 = vld [vmem:[#allocation3 + $0x138] ss:$48 sps:$4 sm:$0xff]   ;;  %v4295_v16 = vld [vmem:[#allocation3 + $0x2c] ss:$48 sps:$4 sm:$0xff]  }
  0xee   : > { %1044 = vst.msk [vmem:[#allocation3 + $0x20] sm:$0xff] %vm4951_vm6, %v1028_v27  ;;  %v1009_v0 = vpop.permute.xlu0 %1008  ;;  %2752 = vmatprep.subr.bf16.mxu0 %v4209_v18  ;;  %v1033_v39 = vsel %vm812_vm1, %v1025_v28, %v1015_v24  ;;  %v4272_v33 = vld [vmem:[%s6034_s1 + $0x510] ss:$8 sps:$4 sm:$0xff]   ;;  %v4245_v21 = vld [vmem:[%s6034_s1 + $0x400] ss:$8 sps:$4 sm:$0xff]  }
  0xef   : > { %v1022_v6 = vrot.slane %v1009_v0, 4  ;;  %2710 = vmatmul.mubr.bf16.vlgmr.msra.gmra.mxu1 %v4204_v23  ;;  %1049 = vst.msk [vmem:[#allocation3 + $0x110] sm:$0xff] %vm4951_vm6, %v1033_v39  ;;  %v1019_v30 = vpop.permute.xlu1 %1018  ;;  %v4280_v17 = vld [vmem:[%s6034_s1 + $0x504] ss:$8 sps:$4 sm:$0xff]   ;;  %v4253_v18 = vld [vmem:[%s6034_s1 + $0x4f4] ss:$8 sps:$4 sm:$0xff]  }
  0xf0   : > { %2719 = vmatprep.mubr.bf16.mxu1 %v4215_v41  ;;  %2824 = vmatpush1.bf16.msra.mxu1 %v4232_v25  ;;  %v1027_v20 = vrot.slane %v1019_v30, 4  ;;  %v4278_v19 = vld [vmem:[%s6034_s1 + $0x500] ss:$8 sps:$4 sm:$0xff]   ;;  %v4251_v59 = vld [vmem:[%s6034_s1 + $0x4f0] ss:$8 sps:$4 sm:$0xff]  }
  0xf1   : > { %v1030_v52 = vsel %vm812_vm1, %v1022_v6, %v1009_v0  ;;  %2753 = vmatpush1.bf16.msra.mxu0 %v4207_v29  ;;  %2825 = vmatprep.subr.bf16.mxu1 %v4241_v42  ;;  %v4242_v35 = vld [vmem:[#allocation3 + $0x13c] ss:$48 sps:$4 sm:$0xff]   ;;  %v4284_v41 = vld [vmem:[%s6034_s1 + $0x590] ss:$8 sps:$4 sm:$0xff]   ;;  %v4257_v25 = vld [vmem:[%s6034_s1 + $0x4e0] ss:$8 sps:$4 sm:$0xff]  }
  0xf2   : > { %1046 = vst.msk [vmem:[#allocation3 + $0x80] sm:$0xff] %vm4951_vm6, %v1030_v52  ;;  %v1013_v37 = vpop.permute.xlu0 %1012  ;;  %2754 = vmatprep.subr.bf16.mxu0 %v4212_v4  ;;  %v1035_v43 = vsel %vm812_vm1, %v1027_v20, %v1019_v30  ;;  %v4286_v23 = vld [vmem:[%s6034_s1 + $0x594] ss:$8 sps:$4 sm:$0xff]   ;;  %v4259_v24 = vld [vmem:[%s6034_s1 + $0x4e4] ss:$8 sps:$4 sm:$0xff]  }
  0xf3   : > { %v1024_v61 = vrot.slane %v1013_v37, 4  ;;  %2647 = vmatmul.mubr.bf16.gmra.mxu0 %v3672_v26  ;;  %1051 = vst.msk [vmem:[#allocation3 + $0x170] sm:$0xff] %vm4951_vm6, %v1035_v43  ;;  %v4292_v27 = vld [vmem:[%s6034_s1 + $0x584] ss:$8 sps:$4 sm:$0xff]   ;;  %v4265_v28 = vld [vmem:[%s6034_s1 + $0x4d4] ss:$8 sps:$4 sm:$0xff]  }
  0xf4   : > { %2656 = vmatprep.mubr.bf16.mxu0 %v4213_v45  ;;  %2826 = vmatpush1.bf16.msra.mxu1 %v4239_v47  ;;  %v4290_v29 = vld [vmem:[%s6034_s1 + $0x580] ss:$8 sps:$4 sm:$0xff]   ;;  %v4263_v4 = vld [vmem:[%s6034_s1 + $0x4d0] ss:$8 sps:$4 sm:$0xff]   ;;  %v4271_v42 = vld [vmem:[%s6034_s1 + $0x4c4] ss:$8 sps:$4 sm:$0xff]  }
  0xf5   : > { %v1032_v49 = vsel %vm812_vm1, %v1024_v61, %v1013_v37  ;;  %2755 = vmatpush1.bf16.msra.mxu0 %v4210_v32  ;;  %2827 = vmatprep.subr.bf16.mxu1 %v4250_v36  ;;  %v4301_v50 = vld [vmem:[#allocation3 + $0x24] ss:$48 sps:$4 sm:$0xff]   ;;  %v4293_v0 = vld [vmem:[#allocation3 + $0x28] ss:$48 sps:$4 sm:$0xff]   ;;  %v4307_v47 = vld [vmem:[#allocation3 + $0xec] ss:$48 sps:$4 sm:$0xff]  }
  0xf6   : > { %1048 = vst.msk [vmem:[#allocation3 + $0xe0] sm:$0xff] %vm4951_vm6, %v1032_v49  ;;  %v1017_v55 = vpop.permute.xlu0 %1016  ;;  %2756 = vmatprep.subr.bf16.mxu0 %v4220_v40  ;;  %v4277_v6 = vld [vmem:[%s6034_s1 + $0x4b4] ss:$8 sps:$4 sm:$0xff]   ;;  %v4275_v39 = vld [vmem:[%s6034_s1 + $0x4b0] ss:$8 sps:$4 sm:$0xff]  }
  0xf7   : > { %v1026_v57 = vrot.slane %v1017_v55, 4  ;;  %2720 = vmatmul.mubr.bf16.gmra.mxu1 %v4217_v44  ;;  %v4283_v30 = vld [vmem:[%s6034_s1 + $0x4a4] ss:$8 sps:$4 sm:$0xff]   ;;  %v4304_v45 = vld [vmem:[#allocation3 + $0x88] ss:$48 sps:$4 sm:$0xff]  }
  0xf8   : > { %2729 = vmatprep.mubr.bf16.mxu1 %v4226_v46  ;;  %2828 = vmatpush1.bf16.msra.mxu1 %v4248_v48  ;;  %v4281_v52 = vld [vmem:[%s6034_s1 + $0x4a0] ss:$8 sps:$4 sm:$0xff]   ;;  %v4289_v20 = vld [vmem:[%s6034_s1 + $0x494] ss:$8 sps:$4 sm:$0xff]   ;;  %v4287_v26 = vld [vmem:[%s6034_s1 + $0x490] ss:$8 sps:$4 sm:$0xff]  }
  0xf9   : > { %v1034_v5 = vsel %vm812_vm1, %v1026_v57, %v1017_v55  ;;  %2757 = vmatpush1.bf16.msra.mxu0 %v4218_v51  ;;  %2829 = vmatprep.subr.bf16.mxu1 %v4256_v34  ;;  %v4298_v32 = vld [vmem:[%s6034_s1 + $0x484] ss:$8 sps:$4 sm:$0xff]   ;;  %v4309_v36 = vld [vmem:[#allocation3 + $0xe8] ss:$48 sps:$4 sm:$0xff]   ;;  %v4299_v43 = vld [vmem:[#allocation3 + $0x20] ss:$48 sps:$4 sm:$0xff]  }
  0xfa   : > { %1050 = vst.msk [vmem:[#allocation3 + $0x140] sm:$0xff] %vm4951_vm6, %v1034_v5  ;;  %2758 = vmatprep.subr.bf16.mxu0 %v4223_v53  ;;  %v4313_v37 = vld [vmem:[#allocation3 + $0x14c] ss:$48 sps:$4 sm:$0xff]   ;;  %v4296_v40 = vld [vmem:[%s6034_s1 + $0x480] ss:$8 sps:$4 sm:$0xff]   ;;  %v1085_v46 = vld [vmem:[#allocation3 + $0x80] sm:$0xff] }
  0xfb   : > { %2657 = vmatmul.mubr.bf16.gmra.mxu0 %v3684_v62  ;;  %v4305_v61 = vld [vmem:[#allocation3 + $0x84] ss:$48 sps:$4 sm:$0xff]   ;;  %v4315_v44 = vld [vmem:[#allocation3 + $0x148] ss:$48 sps:$4 sm:$0xff]   ;;  %v5462_v57 = vsub.s32 0, %v5459_v56 }
  0xfc   : > { %2666 = vmatprep.mubr.bf16.mxu0 %v4224_v58  ;;  %2830 = vmatpush1.bf16.msra.mxu1 %v4254_v60  ;;  %v1091_v48 = vld [vmem:[#allocation3 + $0xb0] sm:$0xff]  ;;  %v5468_v60 = vsub.s32 1, %v5459_v56 }
  0xfd   : > { %2759 = vmatpush1.bf16.msra.mxu0 %v4221_v63  ;;  %2831 = vmatprep.subr.bf16.mxu1 %v4262_v2  ;;  %v4310_v49 = vld [vmem:[#allocation3 + $0xe4] ss:$48 sps:$4 sm:$0xff]   ;;  %v3676_v51 = vcombine.low %v1085_v46, %v1091_v48  ;;  %v4312_v34 = vld [vmem:[#allocation3 + $0xe0] ss:$48 sps:$4 sm:$0xff]   ;;  %6090 = vst [vmem:[#allocation7_spill] sm:$0xff] %v5462_v57 }
  0xfe   : > { %2760 = vmatprep.subr.bf16.mxu0 %v4231_v1  ;;  %v1297_v58 = vld [vmem:[%s6035_s2] sm:$0x3]  ;;  %6091 = vst [vmem:[#allocation8_spill] sm:$0xff] %v5468_v60 }
  0xff   : > { %2730 = vmatmul.mubr.bf16.gmra.mxu1 %v4228_v7  ;;  %v5471_v5 = vrot.slane %v1297_v58, %v5462_v57  ;;  %v5474_v63 = vrot.slane %v1297_v58, %v5468_v60 }
 0x100   : > { %2739 = vmatprep.mubr.bf16.mxu1 %v4242_v35  ;;  %2832 = vmatpush1.bf16.msra.mxu1 %v4260_v8 }
 0x101   : > { %2761 = vmatpush1.bf16.msra.mxu0 %v4229_v54  ;;  %2833 = vmatprep.subr.bf16.mxu1 %v4268_v3  ;;  %v4316_v53 = vld [vmem:[#allocation3 + $0x144] ss:$48 sps:$4 sm:$0xff]   ;;  %v4318_v55 = vld [vmem:[#allocation3 + $0x140] ss:$48 sps:$4 sm:$0xff]  }
 0x102   : > { %2762 = vmatprep.subr.bf16.mxu0 %v4238_v9 }
 0x103   : > { %2667 = vmatmul.mubr.bf16.gmra.mxu0 %v4235_v11 }
 0x104   : > { %2834 = vmatpush1.bf16.msra.mxu1 %v4266_v10  ;;  %2782 = vmatprep.mubr.bf16.mxu0 %v4301_v50 }
 0x105   : > { %2763 = vmatpush1.bf16.msra.mxu0 %v4236_v12  ;;  %2835 = vmatprep.subr.bf16.mxu1 %v4274_v13 }
 0x106   : > { %2764 = vmatprep.subr.bf16.mxu0 %v4247_v14 }
 0x107   : > { %2740 = vmatmul.mubr.bf16.gmra.mxu1 %v4244_v15 }
 0x108   : > { %2836 = vmatpush1.bf16.msra.mxu1 %v4272_v33  ;;  %3884 = vmatprep.mubr.msk.bf16.mxu1 %vm675_vm14, %v4295_v16 }
 0x109   : > { %2765 = vmatpush1.bf16.msra.mxu0 %v4245_v21  ;;  %2837 = vmatprep.subr.bf16.mxu1 %v4280_v17 }
 0x10a   : > { %2766 = vmatprep.subr.bf16.mxu0 %v4253_v18 }
 0x10c   : > { %2838 = vmatpush1.bf16.msra.mxu1 %v4278_v19 }
 0x10d   : > { %2767 = vmatpush2.bf16.msra.mxu0 %v4251_v59  ;;  %2851 = vmatprep.subr.bf16.mxu1 %v4286_v23 }
 0x10e   : > { %2768 = vmatprep.subr.bf16.mxu0 %v4259_v24 }
 0x110   : > { %2852 = vmatpush2.bf16.msra.mxu1 %v4284_v41 }
 0x111   : > { %2769 = vmatpush2.bf16.msra.mxu0 %v4257_v25  ;;  %2853 = vmatprep.subr.bf16.mxu1 %v4292_v27 }
 0x112   : > { %2770 = vmatprep.subr.bf16.mxu0 %v4265_v28 }
 0x114   : > { %2854 = vmatpush2.bf16.msra.mxu1 %v4290_v29 }
 0x115   : > { %2771 = vmatpush2.bf16.msra.mxu0 %v4263_v4 }
 0x116   : > { %2772 = vmatprep.subr.bf16.mxu0 %v4271_v42 }
 0x117   : > { %2856 = vmatmul.mubr.bf16.vlgmr.msra.gmra.mxu1 %v4293_v0 }
 0x118   : > { %3885 = vmatprep.mubr.msk.bf16.mxu1 %vm675_vm14, %v4302_v31 }
 0x119   : > { %2773 = vmatpush2.bf16.msra.mxu0 %v4269_v38 }
 0x11a   : > { %2774 = vmatprep.subr.bf16.mxu0 %v4277_v6 }
 0x11d   : > { %2775 = vmatpush2.bf16.msra.mxu0 %v4275_v39 }
 0x11e   : > { %2776 = vmatprep.subr.bf16.mxu0 %v4283_v30 }
 0x11f   : > { %2866 = vmatmul.mubr.bf16.gmra.mxu1 %v4304_v45 }
 0x120   : > { %3886 = vmatprep.mubr.msk.bf16.mxu1 %vm675_vm14, %v4307_v47 }
 0x121   : > { %2777 = vmatpush2.bf16.msra.mxu0 %v4281_v52 }
 0x122   : > { %2778 = vmatprep.subr.bf16.mxu0 %v4289_v20 }
 0x125   : > { %2779 = vmatpush2.bf16.msra.mxu0 %v4287_v26 }
 0x126   : > { %2780 = vmatprep.subr.bf16.mxu0 %v4298_v32 }
 0x127   : > { %2876 = vmatmul.mubr.bf16.gmra.mxu1 %v4309_v36 }
 0x128   : > { %3887 = vmatprep.mubr.msk.bf16.mxu1 %vm675_vm14, %v4313_v37 }
 0x129   : > { %2781 = vmatpush2.bf16.msra.mxu0 %v4296_v40 }
 0x12c   : > { %2783 = vmatmul.mubr.bf16.vlgmr.msra.gmra.mxu0 %v4299_v43 }
 0x12d   : > { %2792 = vmatprep.mubr.bf16.mxu0 %v4305_v61 }
 0x12f   : > { %2886 = vmatmul.mubr.bf16.gmra.mxu1 %v4315_v44 }
 0x134   : > { %2793 = vmatmul.mubr.bf16.gmra.mxu0 %v3676_v51 }
 0x135   : > { %2802 = vmatprep.mubr.bf16.mxu0 %v4310_v49  ;;  %v6042_v49 = vmov 0.0  }
 0x136   : > { %2996 = vmatprep.mubr.f32.mxu1 %v6042_v49 }
 0x13c   : > { %2803 = vmatmul.mubr.bf16.gmra.mxu0 %v4312_v34 }
 0x13d   : > { %2812 = vmatprep.mubr.bf16.mxu0 %v4316_v53 }
 0x144   : > { %2813 = vmatmul.mubr.bf16.gmra.mxu0 %v4318_v55 }
 0x16b   : > { %v2492_v62 = vpop.f32.mrf.mxu0 }
 0x16c   : > { %v2493_v1 = vadd.f32 %v2492_v62, %v5471_v5 }
 0x16d   : > { %v2494_v2 = vpop.f32.mrf.mxu0 }
 0x16e   : > { %v2495_v8 = vadd.f32 %v2494_v2, %v5474_v63 }
 0x16f   : > { %v2496_v7 = vpop.f32.mrf.mxu0  ;;  %v2565_v35 = vpop.f32.mrf.mxu1 }
 0x170   : > { %v2566_v54 = vadd.f32 %v2565_v35, %v2493_v1  ;;  %v2497_v10 = vadd.f32 %v2496_v7, %v5471_v5 }
 0x171   : > { %v2498_v3 = vpop.f32.mrf.mxu0  ;;  %v2567_v9 = vpop.f32.mrf.mxu1 }
 0x172   : > { %v2568_v50 = vadd.f32 %v2567_v9, %v2495_v8  ;;  %v2499_v13 = vadd.f32 %v2498_v3, %v5474_v63  ;;  %v5523_v3 = vld [vmem:[%s6038_s5 + $0xf8] sm:$0xff] }
 0x173   : > { %v2569_v11 = vpop.f32.mrf.mxu1  ;;  %v2502_v12 = vpop.f32.mrf.mxu0  ;;  %6092 = vst [vmem:[#allocation9_spill] sm:$0xff] %v5523_v3  ;;  %v5528_v9 = vld [vmem:[%s6038_s5 + $0x78] sm:$0xff]  ;;  %3895 = vmatprep.subr.mxu0 %v5523_v3 }
 0x174   : > { %v2570_v14 = vadd.f32 %v2569_v11, %v2497_v10  ;;  %v2503_v19 = vadd.f32 %v2502_v12, %v5471_v5  ;;  %6093 = vst [vmem:[#allocation10_spill] sm:$0xff] %v5528_v9  ;;  %3896 = vmatpush3.msra.mxu0 %v5528_v9 }
 0x175   : > { %v2571_v15 = vpop.f32.mrf.mxu1  ;;  %v2504_v33 = vpop.f32.mrf.mxu0 }
 0x176   : > { %v2572_v16 = vadd.f32 %v2571_v15, %v2499_v13  ;;  %v2505_v59 = vadd.f32 %v2504_v33, %v5474_v63  ;;  %v5547_v15 = vld [vmem:[%s6038_s5 + $0xe8] sm:$0xff] }
 0x177   : > { %v2506_v21 = vpop.f32.mrf.mxu0  ;;  %6097 = vst [vmem:[#allocation14_spill] sm:$0xff] %v5547_v15 }
 0x178   : > { %v2507_v25 = vadd.f32 %v2506_v21, %v5471_v5  ;;  %v5555_v21 = vld [vmem:[%s6038_s5 + $0x68] sm:$0xff] }
 0x179   : > { %v2508_v17 = vpop.f32.mrf.mxu0  ;;  %6099 = vst [vmem:[#allocation16_spill] sm:$0xff] %v5555_v21 }
 0x17a   : > { %v2509_v29 = vadd.f32 %v2508_v17, %v5474_v63 }
 0x17b   : > { %v2512_v18 = vpop.f32.mrf.mxu0 }
 0x17c   : > { %v2513_v31 = vadd.f32 %v2512_v18, %v5471_v5  ;;  %v5561_v18 = vld [vmem:[%s6038_s5 + $0xe0] sm:$0xff] }
 0x17d   : > { %v2514_v24 = vpop.f32.mrf.mxu0  ;;  %6100 = vst [vmem:[#allocation17_spill] sm:$0xff] %v5561_v18 }
 0x17e   : > { %v2515_v39 = vadd.f32 %v2514_v24, %v5474_v63 }
 0x17f   : > { %v2516_v42 = vpop.f32.mrf.mxu0 }
 0x180   : > { %v2517_v52 = vadd.f32 %v2516_v42, %v5471_v5 }
 0x181   : > { %v2518_v45 = vpop.f32.mrf.mxu0 }
 0x182   : > { %v2519_v32 = vadd.f32 %v2518_v45, %v5474_v63  ;;  %v5625_v45 = vld [vmem:[%s6038_s5 + $0x40] sm:$0xff] }
 0x183   : > { %v2575_v23 = vpop.f32.mrf.mxu1  ;;  %v2522_v37 = vpop.f32.mrf.mxu0  ;;  %6111 = vst [vmem:[#allocation28_spill] sm:$0xff] %v5625_v45 }
 0x184   : > { %v5482_v41 = vadd.f32 %v2575_v23, %v2503_v19  ;;  %v2523_v61 = vadd.f32 %v2522_v37, %v5471_v5  ;;  %v5575_v23 = vld [vmem:[%s6038_s5 + $0xd8] sm:$0xff] }
 0x185   : > { %v2577_v27 = vpop.f32.mrf.mxu1  ;;  %v5508_v51 = vpop.f32.mrf.mxu0  ;;  %6103 = vst [vmem:[#allocation20_spill] sm:$0xff] %v5575_v23 }
 0x186   : > { %v5485_v28 = vadd.f32 %v2577_v27, %v2505_v59 }
 0x187   : > { %v2579_v4 = vpop.f32.mrf.mxu1  ;;  %v5510_v53 = vpop.f32.mrf.mxu0 }
 0x188   : > { %v5488_v0 = vadd.f32 %v2579_v4, %v2507_v25  ;;  %v5583_v25 = vld [vmem:[%s6038_s5 + $0x58] sm:$0xff]  ;;  %v5597_v4 = vld [vmem:[%s6038_s5 + $0x50] sm:$0xff] }
 0x189   : > { %v2581_v38 = vpop.f32.mrf.mxu1  ;;  %v5514_v55 = vpop.f32.mrf.mxu0  ;;  %6105 = vst [vmem:[#allocation22_spill] sm:$0xff] %v5583_v25  ;;  %6107 = vst [vmem:[#allocation24_spill] sm:$0xff] %v5597_v4 }
 0x18a   : > { %v5491_v6 = vadd.f32 %v2581_v38, %v2509_v29  ;;  %v5591_v29 = vld [vmem:[%s6038_s5 + $0xd0] sm:$0xff]  ;;  %v5611_v38 = vld [vmem:[%s6038_s5 + $0x48] sm:$0xff] }
 0x18b   : > { %v2585_v30 = vpop.f32.mrf.mxu1  ;;  %6106 = vst [vmem:[#allocation23_spill] sm:$0xff] %v5591_v29  ;;  %6109 = vst [vmem:[#allocation26_spill] sm:$0xff] %v5611_v38 }
 0x18c   : > { %v5494_v47 = vadd.f32 %v2585_v30, %v2513_v31  ;;  %v5605_v31 = vld [vmem:[%s6038_s5 + $0xc8] sm:$0xff]  ;;  %v5619_v30 = vld [vmem:[%s6038_s5 + $0xc0] sm:$0xff] }
 0x18d   : > { %v2587_v20 = vpop.f32.mrf.mxu1  ;;  %6108 = vst [vmem:[#allocation25_spill] sm:$0xff] %v5605_v31  ;;  %6110 = vst [vmem:[#allocation27_spill] sm:$0xff] %v5619_v30 }
 0x18e   : > { %v5497_v26 = vadd.f32 %v2587_v20, %v2515_v39  ;;  %v5633_v20 = vld [vmem:[%s6038_s5 + $0xb8] sm:$0xff] }
 0x18f   : > { %v2589_v36 = vpop.f32.mrf.mxu1  ;;  %6112 = vst [vmem:[#allocation29_spill] sm:$0xff] %v5633_v20 }
 0x190   : > { %v5500_v40 = vadd.f32 %v2589_v36, %v2517_v52  ;;  %v5641_v36 = vld [vmem:[%s6038_s5 + $0x38] sm:$0xff] }
 0x191   : > { %v2591_v43 = vpop.f32.mrf.mxu1  ;;  %6113 = vst [vmem:[#allocation30_spill] sm:$0xff] %v5641_v36 }
 0x192   : > { %v5503_v44 = vadd.f32 %v2591_v43, %v2519_v32  ;;  %v5655_v43 = vld [vmem:[%s6038_s5 + $0x30] sm:$0xff] }
 0x193   : > { %v2595_v46 = vpop.f32.mrf.mxu1  ;;  %6115 = vst [vmem:[#allocation32_spill] sm:$0xff] %v5655_v43 }
 0x194   : > { %v5505_v48 = vadd.f32 %v2595_v46, %v2523_v61  ;;  %v5649_v61 = vld [vmem:[%s6038_s5 + $0xb0] sm:$0xff] }
 0x195   : > { %v5512_v34 = vpop.f32.mrf.mxu1  ;;  %6114 = vst [vmem:[#allocation31_spill] sm:$0xff] %v5649_v61 }
 0x197   : > { %v5516_v22 = vpop.f32.mrf.mxu1 }
 0x199   : > { %v5518_v2 = vpop.f32.mrf.mxu1 }
 0x1ab   : > { %v2638_v58 = vpop.f32.mrf.mxu0 }
 0x1ac   : > { %v2639_v62 = vadd.f32 %v2638_v58, %v2566_v54  ;;  %v5533_v54 = vld [vmem:[%s6038_s5 + $0xf0] sm:$0xff]  ;;  %v5663_v58 = vld [vmem:[%s6038_s5 + $0xa8] sm:$0xff] }
 0x1ad   : > { %v2640_v1 = vpop.f32.mrf.mxu0  ;;  %6094 = vst [vmem:[#allocation11_spill] sm:$0xff] %v5533_v54  ;;  %3897 = vmatprep.subr.mxu0 %v5533_v54  ;;  %6116 = vst [vmem:[#allocation33_spill] sm:$0xff] %v5663_v58 }
 0x1ae   : > { %v2641_v7 = vadd.f32 %v2640_v1, %v2568_v50  ;;  %v5541_v50 = vld [vmem:[%s6038_s5 + $0x70] sm:$0xff]  ;;  %v5671_v1 = vld [vmem:[%s6038_s5 + $0x28] sm:$0xff] }
 0x1af   : > { %v2642_v35 = vpop.f32.mrf.mxu0  ;;  %v2711_v8 = vpop.f32.mrf.mxu1  ;;  %6096 = vst [vmem:[#allocation13_spill] sm:$0xff] %v5541_v50  ;;  %3898 = vmatpush3.msra.mxu0 %v5541_v50  ;;  %6117 = vst [vmem:[#allocation34_spill] sm:$0xff] %v5671_v1 }
 0x1b0   : > { %v2643_v10 = vadd.f32 %v2642_v35, %v2570_v14  ;;  %v5535_v11 = vadd.f32 %v2711_v8, %v2639_v62  ;;  %3899 = vmatprep.subr.mxu0 %v5547_v15  ;;  %v5679_v35 = vld [vmem:[%s6038_s5 + $0xa0] sm:$0xff] }
 0x1b1   : > { %v2644_v12 = vpop.f32.mrf.mxu0  ;;  %v2713_v13 = vpop.f32.mrf.mxu1  ;;  %3900 = vmatpush3.msra.mxu0 %v5555_v21  ;;  %6118 = vst [vmem:[#allocation35_spill] sm:$0xff] %v5679_v35  ;;  %v5685_v8 = vld [vmem:[%s6038_s5 + $0x20] sm:$0xff] }
 0x1b2   : > { %6095 = vst [vmem:[#allocation12_spill] sm:$0xff] %v5535_v11  ;;  %v2645_v33 = vadd.f32 %v2644_v12, %v2572_v16  ;;  %v5549_v14 = vadd.f32 %v2713_v13, %v2641_v7  ;;  %v5569_v16 = vld [vmem:[%s6038_s5 + $0x60] sm:$0xff]  ;;  %3901 = vmatprep.subr.mxu0 %v5561_v18  ;;  %6119 = vst [vmem:[#allocation36_spill] sm:$0xff] %v5685_v8  ;;  %v5693_v12 = vld [vmem:[%s6038_s5 + $0x98] sm:$0xff]  ;;  %v2525_v11 = vadd.f32 %v5508_v51, %v5474_v63 }
 0x1b3   : > { %v2715_v17 = vpop.f32.mrf.mxu1  ;;  %6102 = vst [vmem:[#allocation19_spill] sm:$0xff] %v5569_v16  ;;  %3902 = vmatpush3.msra.mxu0 %v5569_v16  ;;  %v5635_v32 = vpop.f32.mrf.mxu0  ;;  %6120 = vst [vmem:[#allocation37_spill] sm:$0xff] %v5693_v12 }
 0x1b4   : > { %6098 = vst [vmem:[#allocation15_spill] sm:$0xff] %v5549_v14  ;;  %v5563_v19 = vadd.f32 %v2715_v17, %v2643_v10  ;;  %3903 = vmatprep.subr.mxu0 %v5575_v23  ;;  %v5707_v17 = vld [vmem:[%s6038_s5 + $0x90] sm:$0xff] }
 0x1b5   : > { %v2717_v59 = vpop.f32.mrf.mxu1  ;;  %3904 = vmatpush3.msra.mxu0 %v5583_v25  ;;  %v5665_v62 = vpop.f32.mrf.mxu0  ;;  %6122 = vst [vmem:[#allocation39_spill] sm:$0xff] %v5707_v17 }
 0x1b6   : > { %6101 = vst [vmem:[#allocation18_spill] sm:$0xff] %v5563_v19  ;;  %v5577_v24 = vadd.f32 %v2717_v59, %v2645_v33  ;;  %3905 = vmatprep.subr.mxu0 %v5591_v29  ;;  %v5701_v33 = vld [vmem:[%s6038_s5 + $0x18] sm:$0xff]  ;;  %v5713_v59 = vld [vmem:[%s6038_s5 + $0x10] sm:$0xff]  ;;  %v2598_v19 = vadd.f32 %v5512_v34, %v2525_v11 }
 0x1b7   : > { %v5585_v27 = vpop.f32.mrf.mxu1  ;;  %3906 = vmatpush3.msra.mxu0 %v5597_v4  ;;  %v5695_v13 = vpop.f32.mrf.mxu0  ;;  %6121 = vst [vmem:[#allocation38_spill] sm:$0xff] %v5701_v33  ;;  %6123 = vst [vmem:[#allocation40_spill] sm:$0xff] %v5713_v59 }
 0x1b8   : > { %6104 = vst [vmem:[#allocation21_spill] sm:$0xff] %v5577_v24  ;;  %3907 = vmatprep.subr.mxu0 %v5605_v31 }
 0x1b9   : > { %v5599_v42 = vpop.f32.mrf.mxu1  ;;  %3908 = vmatpush3.msra.mxu0 %v5611_v38  ;;  %v5716_v60 = vpop.f32.mrf.mxu0 }
 0x1ba   : > { %3909 = vmatprep.subr.mxu0 %v5619_v30 }
 0x1bb   : > { %v5613_v39 = vpop.f32.mrf.mxu1  ;;  %3910 = vmatpush3.msra.mxu0 %v5625_v45  ;;  %v2658_v56 = vpop.f32.mrf.mxu0 }
 0x1bc   : > { %3911 = vmatprep.subr.mxu0 %v5633_v20 }
 0x1bd   : > { %v5627_v52 = vpop.f32.mrf.mxu1  ;;  %3912 = vmatpush3.msra.mxu0 %v5641_v36 }
 0x1be   : > { %3913 = vmatprep.subr.mxu0 %v5649_v61 }
 0x1bf   : > { %v5643_v37 = vpop.f32.mrf.mxu1  ;;  %3914 = vmatpush3.msra.mxu0 %v5655_v43 }
 0x1c0   : > { %3915 = vmatprep.subr.mxu0 %v5663_v58 }
 0x1c1   : > { %v5657_v46 = vpop.f32.mrf.mxu1  ;;  %3916 = vmatpush3.msra.mxu0 %v5671_v1 }
 0x1c2   : > { %3917 = vmatprep.subr.mxu0 %v5679_v35  ;;  %v2660_v35 = vpop.f32.mrf.mxu0 }
 0x1c3   : > { %v5673_v7 = vpop.f32.mrf.mxu1  ;;  %3918 = vmatpush3.msra.mxu0 %v5685_v8 }
 0x1c4   : > { %3919 = vmatprep.subr.mxu0 %v5693_v12  ;;  %v2662_v12 = vpop.f32.mrf.mxu0 }
 0x1c5   : > { %v5687_v10 = vpop.f32.mrf.mxu1  ;;  %3920 = vmatpush3.msra.mxu0 %v5701_v33 }
 0x1c6   : > { %3921 = vmatprep.subr.mxu0 %v5707_v17  ;;  %v2664_v61 = vpop.f32.mrf.mxu0 }
 0x1c7   : > { %v2741_v49 = vpop.f32.mrf.mxu1  ;;  %3922 = vmatpush3.msra.mxu0 %v5713_v59 }
 0x1c8   : > { %v2668_v20 = vpop.f32.mrf.mxu0 }
 0x1c9   : > { %v2743_v57 = vpop.f32.mrf.mxu1 }
 0x1ca   : > { %v2670_v17 = vpop.f32.mrf.mxu0 }
 0x1cb   : > { %v2745_v8 = vpop.f32.mrf.mxu1 }
 0x1cc   : > { %v2672_v30 = vpop.f32.mrf.mxu0 }
 0x1cd   : > { %v2747_v1 = vpop.f32.mrf.mxu1 }
 0x1ce   : > { %v2674_v31 = vpop.f32.mrf.mxu0 }
 0x1d7   : > { %v5720_v58 = vpop.f32.mrf.mxu1 }
 0x1d8   : > { %6124 = vst [vmem:[#allocation41_spill] sm:$0xff] %v5720_v58 }
 0x1d9   : > { %v5722_v43 = vpop.f32.mrf.mxu1 }
 0x1da   : > { %6125 = vst [vmem:[#allocation42_spill] sm:$0xff] %v5722_v43 }
 0x1db   : > { %v5724_v36 = vpop.f32.mrf.mxu1 }
 0x1dc   : > { %6126 = vst [vmem:[#allocation43_spill] sm:$0xff] %v5724_v36 }
 0x1dd   : > { %v5726_v33 = vpop.f32.mrf.mxu1 }
 0x1de   : > { %6127 = vst [vmem:[#allocation44_spill] sm:$0xff] %v5726_v33  ;;  %v2527_v33 = vadd.f32 %v5510_v53, %v5471_v5  ;;  %v2671_v5 = vadd.f32 %v2670_v17, %v2598_v19  ;;  %v6155_v17 = vld [vmem:[#allocation12_spill] sm:$0xff] }
 0x1df   : > { %v5728_v45 = vpop.f32.mrf.mxu1 }
 0x1e0   : > { %6128 = vst [vmem:[#allocation45_spill] sm:$0xff] %v5728_v45  ;;  %v2600_v14 = vadd.f32 %v5516_v22, %v2527_v33  ;;  %v2663_v22 = vadd.f32 %v2662_v12, %v5500_v40 }
 0x1e1   : > { %v5730_v59 = vpop.f32.mrf.mxu1 }
 0x1e2   : > { %6129 = vst [vmem:[#allocation46_spill] sm:$0xff] %v5730_v59  ;;  %v2529_v59 = vadd.f32 %v5514_v55, %v5474_v63  ;;  %v2665_v63 = vadd.f32 %v2664_v61, %v5503_v44  ;;  %v2744_v55 = vadd.f32 %v2743_v57, %v2671_v5  ;;  %v2655_v57 = vadd.f32 %v5716_v60, %v5491_v6 }
 0x1e3   : > { %v5732_v38 = vpop.f32.mrf.mxu1  ;;  %v2649_v6 = vadd.f32 %v5635_v32, %v5482_v41 }
 0x1e4   : > { %6130 = vst [vmem:[#allocation47_spill] sm:$0xff] %v5732_v38  ;;  %v2738_v11 = vadd.f32 %v5687_v10, %v2665_v63 }
 0x1e5   : > { %v5736_v29 = vpop.f32.mrf.mxu1  ;;  %v6158_v63 = vld [vmem:[#allocation44_spill] sm:$0xff] }
 0x1e6   : > { %6132 = vst [vmem:[#allocation49_spill] sm:$0xff] %v5736_v29  ;;  %v2602_v29 = vadd.f32 %v5518_v2, %v2529_v59  ;;  %v2661_v2 = vadd.f32 %v2660_v35, %v5497_v26  ;;  %v2653_v26 = vadd.f32 %v5695_v13, %v5488_v0  ;;  %v6152_v35 = vld [vmem:[#allocation15_spill] sm:$0xff] }
 0x1e7   : > { %v5742_v16 = vpop.f32.mrf.mxu1 }
 0x1e8   : > { %6135 = vst [vmem:[#allocation52_spill] sm:$0xff] %v5742_v16  ;;  %v2675_v53 = vadd.f32 %v2674_v31, %v2602_v29  ;;  %v2669_v16 = vadd.f32 %v2668_v20, %v5505_v48  ;;  %v2659_v48 = vadd.f32 %v2658_v56, %v5494_v47  ;;  %v2734_v40 = vadd.f32 %v5657_v46, %v2661_v2  ;;  %v6149_v46 = vld [vmem:[#allocation18_spill] sm:$0xff] }
 0x1e9   : > { %v5748_v15 = vpop.f32.mrf.mxu1  ;;  %v2651_v56 = vadd.f32 %v5665_v62, %v5485_v28  ;;  %v2728_v47 = vadd.f32 %v5627_v52, %v2655_v57  ;;  %v2726_v0 = vadd.f32 %v5613_v39, %v2653_v26  ;;  %v6154_v12 = vld [vmem:[#allocation46_spill] sm:$0xff]  ;;  %v6162_v57 = vmov 0.0  }
 0x1ea   : > { %6138 = vst [vmem:[#allocation55_spill] sm:$0xff] %v5748_v15  ;;  %v2742_v33 = vadd.f32 %v2741_v49, %v2669_v16 }
 0x1eb   : > { %v5754_v9 = vpop.f32.mrf.mxu1 }
 0x1ec   : > { %v5734_v4 = vpop.f32.mrf.mxu0  ;;  %6140 = vst [vmem:[#allocation57_spill] sm:$0xff] %v5754_v9 }
 0x1ed   : > { %6131 = vst [vmem:[#allocation48_spill] sm:$0xff] %v5734_v4  ;;  %v2883_v43 = vpop.f32.mrf.mxu1  ;;  %v6148_v61 = vld [vmem:[#allocation49_spill] sm:$0xff] }
 0x1ee   : > { %v5738_v25 = vpop.f32.mrf.mxu0 }
 0x1ef   : > { %6133 = vst [vmem:[#allocation50_spill] sm:$0xff] %v5738_v25  ;;  %v2887_v4 = vpop.f32.mrf.mxu1  ;;  %v6145_v32 = vld [vmem:[#allocation52_spill] sm:$0xff] }
 0x1f0   : > { %v5740_v23 = vpop.f32.mrf.mxu0 }
 0x1f1   : > { %6134 = vst [vmem:[#allocation51_spill] sm:$0xff] %v5740_v23  ;;  %v2889_v38 = vpop.f32.mrf.mxu1  ;;  %v6143_v52 = vld [vmem:[#allocation55_spill] sm:$0xff] }
 0x1f2   : > { %v5744_v18 = vpop.f32.mrf.mxu0 }
 0x1f3   : > { %6136 = vst [vmem:[#allocation53_spill] sm:$0xff] %v5744_v18  ;;  %v2673_v18 = vadd.f32 %v2672_v30, %v2600_v14  ;;  %v2891_v51 = vpop.f32.mrf.mxu1 }
 0x1f4   : > { %v5746_v21 = vpop.f32.mrf.mxu0  ;;  %v6156_v59 = vld [vmem:[#allocation48_spill] sm:$0xff] }
 0x1f5   : > { %6137 = vst [vmem:[#allocation54_spill] sm:$0xff] %v5746_v21  ;;  %v2746_v21 = vadd.f32 %v2745_v8, %v2673_v18  ;;  %v2736_v18 = vadd.f32 %v5673_v7, %v2663_v22  ;;  %v2893_v31 = vpop.f32.mrf.mxu1  ;;  %v2785_v5 = vadd.f32 %v6156_v59, %v6155_v17  ;;  %v6159_v22 = vld [vmem:[#allocation43_spill] sm:$0xff]  ;;  %v6186_v59 = vld [vmem:[#allocation36_spill] sm:$0xff] }
 0x1f6   : > { %v5750_v50 = vpop.f32.mrf.mxu0  ;;  %v6153_v8 = vld [vmem:[#allocation50_spill] sm:$0xff]  ;;  %v6185_v17 = vld [vmem:[#allocation35_spill] sm:$0xff] }
 0x1f7   : > { %6139 = vst [vmem:[#allocation56_spill] sm:$0xff] %v5750_v50  ;;  %v2748_v50 = vadd.f32 %v2747_v1, %v2675_v53  ;;  %v6151_v1 = vld [vmem:[#allocation47_spill] sm:$0xff]  ;;  %v2787_v10 = vadd.f32 %v6153_v8, %v6152_v35  ;;  %v6157_v53 = vld [vmem:[#allocation45_spill] sm:$0xff]  ;;  %v6182_v8 = vld [vmem:[#allocation32_spill] sm:$0xff] }
 0x1f8   : > { %v5752_v54 = vpop.f32.mrf.mxu0  ;;  %v6181_v35 = vld [vmem:[#allocation31_spill] sm:$0xff] }
 0x1f9   : > { %v2799_v30 = vadd.f32 %v5752_v54, %v2726_v0  ;;  %v6146_v54 = vld [vmem:[#allocation21_spill] sm:$0xff] }
 0x1fa   : > { %v2800_v3 = vpop.f32.mrf.mxu0 }
 0x1fb   : > { %v2801_v28 = vadd.f32 %v2800_v3, %v2728_v47  ;;  %v5823_v7 = vadd.f32 %v6151_v1, %v2799_v30  ;;  %v6165_v30 = vld [vmem:[#allocation11_spill] sm:$0xff]  ;;  %v6180_v1 = vld [vmem:[#allocation30_spill] sm:$0xff] }
 0x1fc   : > { %v2804_v58 = vpop.f32.mrf.mxu0  ;;  %v6144_v3 = vld [vmem:[#allocation54_spill] sm:$0xff] }
 0x1fe   : > { %v2806_v36 = vpop.f32.mrf.mxu0 }
 0x1ff   : > { %v2807_v16 = vadd.f32 %v2806_v36, %v2734_v40 }
 0x200   : > { %v2808_v45 = vpop.f32.mrf.mxu0 }
 0x201   : > { %v5806_v20 = vadd.f32 %v6143_v52, %v2807_v16  ;;  %v6169_v52 = vld [vmem:[#allocation17_spill] sm:$0xff] }
 0x202   : > { %v2810_v25 = vpop.f32.mrf.mxu0 }
 0x203   : > { %v2811_v44 = vadd.f32 %v2810_v25, %v2738_v11  ;;  %v6161_v11 = vld [vmem:[#allocation41_spill] sm:$0xff]  ;;  %v3012_v26 = vmul.f32 %v5806_v20, %v5806_v20 }
 0x204   : > { %v2814_v23 = vpop.f32.mrf.mxu0 }
 0x205   : > { %v2815_v29 = vadd.f32 %v2814_v23, %v2742_v33  ;;  %v5795_v25 = vadd.f32 %v2883_v43, %v2811_v44  ;;  %v5817_v43 = vadd.f32 %v6148_v61, %v2801_v28  ;;  %v6163_v28 = vld [vmem:[#allocation9_spill] sm:$0xff]  ;;  %v6176_v61 = vld [vmem:[#allocation26_spill] sm:$0xff] }
 0x206   : > { %v2816_v24 = vpop.f32.mrf.mxu0 }
 0x207   : > { %v2817_v14 = vadd.f32 %v2816_v24, %v2744_v55  ;;  %v5791_v24 = vadd.f32 %v2887_v4, %v2815_v29  ;;  %v6142_v4 = vld [vmem:[#allocation56_spill] sm:$0xff]  ;;  %v3014_v40 = vmul.f32 %v5795_v25, %v5795_v25 }
 0x208   : > { %v2818_v15 = vpop.f32.mrf.mxu0 }
 0x209   : > { %v2819_v9 = vadd.f32 %v2818_v15, %v2746_v21  ;;  %v2732_v15 = vadd.f32 %v5643_v37, %v2659_v48  ;;  %v5785_v60 = vadd.f32 %v2889_v38, %v2817_v14  ;;  %v2722_v38 = vadd.f32 %v5585_v27, %v2649_v6  ;;  %v6147_v27 = vld [vmem:[#allocation53_spill] sm:$0xff] }
 0x20a   : > { %v2820_v34 = vpop.f32.mrf.mxu0  ;;  %v2791_v37 = vadd.f32 %v6147_v27, %v6146_v54  ;;  %v5851_v14 = vadd.f32 %v6161_v11, %v2785_v5  ;;  %v6173_v54 = vld [vmem:[#allocation23_spill] sm:$0xff]  ;;  %v6174_v27 = vld [vmem:[#allocation24_spill] sm:$0xff]  ;;  %v6187_v5 = vld [vmem:[#allocation37_spill] sm:$0xff] }
 0x20b   : > { %v2821_v19 = vadd.f32 %v2820_v34, %v2748_v50  ;;  %v2809_v50 = vadd.f32 %v2808_v45, %v2736_v18  ;;  %v5780_v21 = vadd.f32 %v2891_v51, %v2819_v9  ;;  %v2805_v23 = vadd.f32 %v2804_v58, %v2732_v15  ;;  %v6141_v45 = vld [vmem:[#allocation57_spill] sm:$0xff]  ;;  %v6150_v58 = vld [vmem:[#allocation51_spill] sm:$0xff]  ;;  %v6160_v34 = vld [vmem:[#allocation42_spill] sm:$0xff] }
 0x20c   : > { %v2724_v9 = vadd.f32 %v5599_v42, %v2651_v56  ;;  %v2795_v42 = vadd.f32 %v6144_v3, %v2722_v38  ;;  %v2789_v62 = vadd.f32 %v6150_v58, %v6149_v46  ;;  %v5839_v55 = vadd.f32 %v6158_v63, %v2791_v37  ;;  %v6164_v38 = vld [vmem:[#allocation10_spill] sm:$0xff]  ;;  %v6170_v3 = vld [vmem:[#allocation19_spill] sm:$0xff]  ;;  %v6175_v37 = vld [vmem:[#allocation25_spill] sm:$0xff] }
 0x20d   : > { %v5775_v49 = vadd.f32 %v2893_v31, %v2821_v19  ;;  %v5801_v41 = vadd.f32 %v6141_v45, %v2809_v50  ;;  %v5811_v36 = vadd.f32 %v6145_v32, %v2805_v23  ;;  %v5847_v2 = vadd.f32 %v6160_v34, %v2787_v10  ;;  %v6166_v45 = vld [vmem:[#allocation13_spill] sm:$0xff]  ;;  %v6172_v32 = vld [vmem:[#allocation22_spill] sm:$0xff]  ;;  %v6177_v46 = vld [vmem:[#allocation27_spill] sm:$0xff] }
 0x20e   : > { %v2797_v39 = vadd.f32 %v6142_v4, %v2724_v9  ;;  %v5835_v51 = vadd.f32 %v6157_v53, %v2795_v42  ;;  %v5843_v33 = vadd.f32 %v6159_v22, %v2789_v62  ;;  %v3017_v48 = vmul.f32 %v5780_v21, %v5780_v21  ;;  %v6167_v4 = vld [vmem:[#allocation14_spill] sm:$0xff]  ;;  %v6171_v42 = vld [vmem:[#allocation20_spill] sm:$0xff]  ;;  %v6179_v62 = vld [vmem:[#allocation29_spill] sm:$0xff] }
 0x20f   : > { %2948 = vmatprep.subr.mxu1 %v5775_v49  ;;  %v3018_v19 = vmul.f32 %v5775_v49, %v5775_v49  ;;  %v4333_v18 = vmov 1.0   ;;  %v3016_v29 = vmul.f32 %v5785_v60, %v5785_v60  ;;  %v3015_v31 = vmul.f32 %v5791_v24, %v5791_v24  ;;  %v6178_v58 = vld [vmem:[#allocation28_spill] sm:$0xff]  ;;  %v6183_v10 = vld [vmem:[#allocation33_spill] sm:$0xff]  ;;  %v6188_v53 = vld [vmem:[#allocation38_spill] sm:$0xff] }
 0x210   : > { %2949 = vmatpush1.msra.mxu1 %v5780_v21  ;;  %v5829_v13 = vadd.f32 %v6154_v12, %v2797_v39  ;;  %v3013_v44 = vmul.f32 %v5801_v41, %v5801_v41  ;;  %v3011_v15 = vmul.f32 %v5811_v36, %v5811_v36  ;;  %v3010_v50 = vmul.f32 %v5817_v43, %v5817_v43  ;;  %v6168_v39 = vld [vmem:[#allocation16_spill] sm:$0xff]  ;;  %v6184_v12 = vld [vmem:[#allocation34_spill] sm:$0xff]  ;;  %v6189_v63 = vld [vmem:[#allocation39_spill] sm:$0xff] }
 0x211   : > { %2950 = vmatprep.subr.mxu1 %v5785_v60  ;;  %v3009_v56 = vmul.f32 %v5823_v7, %v5823_v7  ;;  %v3007_v16 = vmul.f32 %v5835_v51, %v5835_v51  ;;  %v3006_v6 = vmul.f32 %v5839_v55, %v5839_v55  ;;  %v3005_v0 = vmul.f32 %v5843_v33, %v5843_v33  ;;  %v6190_v22 = vld [vmem:[#allocation40_spill] sm:$0xff]  ;;  %v3107_v34 = vld [vmem:[%s6038_s5 + $0x88] sm:$0xff] }
 0x212   : > { %2951 = vmatpush1.msra.mxu1 %v5791_v24  ;;  %v3008_v47 = vmul.f32 %v5829_v13, %v5829_v13  ;;  %v3004_v23 = vmul.f32 %v5847_v2, %v5847_v2  ;;  %v3003_v9 = vmul.f32 %v5851_v14, %v5851_v14  ;;  %3923 = vmatprep.subr.mxu0 %v3107_v34  ;;  %v3091_v11 = vld [vmem:[%s6038_s5 + $0x8] sm:$0xff] }
 0x213   : > { %2952 = vmatprep.subr.mxu1 %v5795_v25  ;;  %3924 = vmatpush3.msra.mxu0 %v3091_v11 }
 0x214   : > { %2953 = vmatpush1.msra.mxu1 %v5801_v41 }
 0x215   : > { %2954 = vmatprep.subr.mxu1 %v5806_v20 }
 0x216   : > { %2955 = vmatpush1.msra.mxu1 %v5811_v36 }
 0x217   : > { %2956 = vmatprep.subr.mxu1 %v5817_v43 }
 0x218   : > { %2957 = vmatpush1.msra.mxu1 %v5823_v7 }
 0x219   : > { %2958 = vmatprep.subr.mxu1 %v5829_v13 }
 0x21a   : > { %2959 = vmatpush1.msra.mxu1 %v5835_v51 }
 0x21b   : > { %2960 = vmatprep.subr.mxu1 %v5839_v55 }
 0x21c   : > { %2961 = vmatpush1.msra.mxu1 %v5843_v33 }
 0x21d   : > { %2962 = vmatprep.subr.mxu1 %v5847_v2 }
 0x21e   : > { %2963 = vmatpush1.msra.mxu1 %v5851_v14 }
 0x21f   : > { %3035 = vmatprep.subr.mxu1 %v3018_v19  ;;  %3888 = vmatmul.mubr.msk.f32.vlgmr.msra.gmra.mxu1 %vm743_vm11, %v4333_v18  ;;  %v3106_v19 = vld [vmem:[%s6038_s5 + $0x80] sm:$0xff] }
 0x220   : > { %3036 = vmatpush1.msra.mxu1 %v3017_v48  ;;  %3083 = vmatprep.mubr.f32.mxu1 %v6162_v57  ;;  %v3090_v48 = vld [vmem:[%s6038_s5] sm:$0xff] }
 0x221   : > { %3037 = vmatprep.subr.mxu1 %v3016_v29  ;;  %3925 = vmatprep.subr.mxu0 %v3106_v19 }
 0x222   : > { %3038 = vmatpush1.msra.mxu1 %v3015_v31  ;;  %3926 = vmatpush3.msra.mxu0 %v3090_v48 }
 0x223   : > { %3039 = vmatprep.subr.mxu1 %v3014_v40 }
 0x224   : > { %3040 = vmatpush1.msra.mxu1 %v3013_v44  ;;  %v3271_v44 = vld [vmem:[%s6039_s6 + $0x18] sm:$0xff] }
 0x225   : > { %3041 = vmatprep.subr.mxu1 %v3012_v26  ;;  %3304 = vmatprep.subr.mxu0 %v3271_v44  ;;  %v3270_v26 = vld [vmem:[%s6039_s6 + $0x10] sm:$0xff] }
 0x226   : > { %3042 = vmatpush1.msra.mxu1 %v3011_v15  ;;  %v3269_v15 = vld [vmem:[%s6039_s6 + $0x8] sm:$0xff] }
 0x227   : > { %3043 = vmatprep.subr.mxu1 %v3010_v50  ;;  %v3268_v50 = vld [vmem:[%s6039_s6] sm:$0xff] }
 0x228   : > { %3044 = vmatpush1.msra.mxu1 %v3009_v56 }
 0x229   : > { %3045 = vmatprep.subr.mxu1 %v3008_v47 }
 0x22a   : > { %3046 = vmatpush1.msra.mxu1 %v3007_v16 }
 0x22b   : > { %3047 = vmatprep.subr.mxu1 %v3006_v6 }
 0x22c   : > { %3048 = vmatpush1.msra.mxu1 %v3005_v0 }
 0x22d   : > { %3049 = vmatprep.subr.mxu1 %v3004_v23 }
 0x22e   : > { %3050 = vmatpush1.msra.mxu1 %v3003_v9 }
 0x22f   : > { %3889 = vmatmul.mubr.msk.f32.vlgmr.msra.gmra.mxu1 %vm743_vm11, %v4333_v18  ;;  %3930 = vmatprep.subr.mxu1 %v6163_v28 }
 0x230   : > { %3931 = vmatpush3.msra.mxu1 %v6164_v38 }
 0x231   : > { %3932 = vmatprep.subr.mxu1 %v6165_v30 }
 0x232   : > { %3933 = vmatpush3.msra.mxu1 %v6166_v45 }
 0x233   : > { %3934 = vmatprep.subr.mxu1 %v6167_v4 }
 0x234   : > { %3935 = vmatpush3.msra.mxu1 %v6168_v39  ;;  %v4334_v39 = vmov 1966171168  }
 0x235   : > { %3936 = vmatprep.subr.mxu1 %v6169_v52  ;;  %v3426_v52 = vunpack.c.l.s4 %v4334_v39 }
 0x236   : > { %3937 = vmatpush3.msra.mxu1 %v6170_v3 }
 0x237   : > { %3938 = vmatprep.subr.mxu1 %v6171_v42  ;;  %v3427_v42 = vunpack.c.0.s8 %v3426_v52 }
 0x238   : > { %3939 = vmatpush3.msra.mxu1 %v6172_v32 }
 0x239   : > { %3940 = vmatprep.subr.mxu1 %v6173_v54 }
 0x23a   : > { %3941 = vmatpush3.msra.mxu1 %v6174_v27 }
 0x23b   : > { %3942 = vmatprep.subr.mxu1 %v6175_v37 }
 0x23c   : > { %3943 = vmatpush3.msra.mxu1 %v6176_v61 }
 0x23d   : > { %3944 = vmatprep.subr.mxu1 %v6177_v46 }
 0x23e   : > { %3945 = vmatpush3.msra.mxu1 %v6178_v58  ;;  %v3421_v58 = vld [vmem:[%s6036_s3] sm:$0x3] }
 0x23f   : > { %3946 = vmatprep.subr.mxu1 %v6179_v62 }
 0x240   : > { %3947 = vmatpush3.msra.mxu1 %v6180_v1 }
 0x241   : > { %3948 = vmatprep.subr.mxu1 %v6181_v35  ;;  %v6192_v35 = vld [vmem:[#allocation7_spill] sm:$0xff] }
 0x242   : > { %3949 = vmatpush3.msra.mxu1 %v6182_v8 }
 0x243   : > { %3950 = vmatprep.subr.mxu1 %v6183_v10  ;;  %v6193_v10 = vld [vmem:[#allocation8_spill] sm:$0xff] }
 0x244   : > { %3951 = vmatpush3.msra.mxu1 %v6184_v12 }
 0x245   : > { %3952 = vmatprep.subr.mxu1 %v6185_v17 }
 0x246   : > { %3953 = vmatpush3.msra.mxu1 %v6186_v59 }
 0x247   : > { %3954 = vmatprep.subr.mxu1 %v6187_v5 }
 0x248   : > { %3955 = vmatpush3.msra.mxu1 %v6188_v53 }
 0x249   : > { %3956 = vmatprep.subr.mxu1 %v6189_v63  ;;  %v3441_v63 = vld [vmem:[%s6037_s4] sm:$0x3] }
 0x24a   : > { %3957 = vmatpush3.msra.mxu1 %v6190_v22 }
 0x24b   : > { %3958 = vmatprep.subr.mxu1 %v3107_v34 }
 0x24c   : > { %3959 = vmatpush3.msra.mxu1 %v3091_v11 }
 0x24d   : > { %3960 = vmatprep.subr.mxu1 %v3106_v19 }
 0x24e   : > { %3961 = vmatpush3.msra.mxu1 %v3090_v48  ;;  %v5959_v48 = vstv %s3517_s14 }
 0x2df   : > { %v2998_v18 = vpop.f32.mrf.mxu1 }
 0x2e1   : > { %v3000_v29 = vpop.f32.mrf.mxu1 }
 0x2e2   : > { %3186 = vmatprep.mubr.f32.mxu0 %v3000_v29 }
 0x2e3   : > { %3187 = vmatmul.mubr.f32.vlgmr.msra.gmra.mxu0 %v2998_v18 }
 0x2e4   : > { %3340 = vmatprep.mubr.f32.mxu0 %v6162_v57  ;;  %3305 = vmatpush1.msra.mxu0 %v3270_v26 }
 0x2e5   : > { %3306 = vmatprep.subr.mxu0 %v3269_v15 }
 0x2e6   : > { %3307 = vmatpush1.msra.mxu0 %v3268_v50 }
 0x2e7   : > { %3378 = vmatprep.subr.mxu0 %v3271_v44 }
 0x2ef   : > { %v3085_v31 = vpop.f32.mrf.mxu1 }
 0x2f1   : > { %v3087_v40 = vpop.f32.mrf.mxu1 }
 0x2f2   : > { %3256 = vmatprep.mubr.f32.mxu1 %v3087_v40 }
 0x2f3   : > { %3257 = vmatmul.mubr.f32.vlgmr.msra.gmra.mxu1 %v3085_v31 }
 0x3a3   : > { %v3927_v56 = vpop.f32.mrf.mxu0 }
 0x3a5   : > { %v3928_v47 = vpop.f32.mrf.mxu0 }
 0x3a6   : > { %v3929_v16 = vadd.f32 %v3928_v47, %v3927_v56 }
 0x3a8   : > { %v3262_v6 = vmul.f32 0.0009765625, %v3929_v16 }
 0x3aa   : > { %3890 = vmatmul.mubr.msk.f32.vlgmr.msra.gmra.mxu0 %vm3272_vm4, %v3262_v6  ;;  %v3264_v28 = vmul.f32 %v3262_v6, %v3262_v6 }
 0x3ab   : > { %3379 = vmatpush1.msra.mxu0 %v3270_v26  ;;  %3414 = vmatprep.mubr.f32.mxu0 %v6162_v57  ;;  %v6191_v57 = vld [vmem:[#allocation6_spill] sm:$0xff] }
 0x3ac   : > { %3380 = vmatprep.subr.mxu0 %v3269_v15  ;;  %v3430_v27 = vsub.s32 %v3427_v42, %v6191_v57 }
 0x3ad   : > { %3381 = vmatpush1.msra.mxu0 %v3268_v50 }
 0x3b3   : > { %v3962_v0 = vpop.f32.mrf.mxu1 }
 0x3b5   : > { %v3963_v23 = vpop.f32.mrf.mxu1 }
 0x3b6   : > { %v3964_v9 = vadd.f32 %v3963_v23, %v3962_v0 }
 0x3b8   : > { %v3263_v38 = vmul.f32 0.0009765625, %v3964_v9 }
 0x3ba   : > { %v3265_v30 = vsub.f32 %v3263_v38, %v3264_v28 }
 0x3bc   : > { %v3266_v45 = vadd.f32 1e-05, %v3265_v30 }
 0x3be   : > { %4319 = vrsqrt.f32 %v3266_v45 }
 0x3cb   : > { %v4320_v4 = vpop.eup %4319 }
 0x3cc   : > { %3891 = vmatmul.mubr.msk.f32.vlgmr.msra.gmra.mxu0 %vm3272_vm4, %v4320_v4 }
 0x46a   : > { %v3342_v3 = vpop.f32.mrf.mxu0 }
 0x46c   : > { %v3344_v32 = vpop.f32.mrf.mxu0 }
 0x48c   : > { %v3416_v54 = vpop.f32.mrf.mxu0 }
 0x48e   : > { %v3418_v37 = vpop.f32.mrf.mxu0 }
 0x48f   : > { %v3424_v61 = vcombine.low %v3416_v54, %v3418_v37 }
 0x491   : > { %v3431_v46 = vrot.slane %v3424_v61, %v3430_v27 }
 0x493   : > { %v3438_v62 = vrot.slane %v3431_v46, %v3430_v27 }
 0x495   : > { %v3440_v1 = vmul.f32 %v3438_v62, %v3421_v58 }
 0x497   : > { %v3446_v8 = vrot.slane %v3440_v1, %v6192_v35  ;;  %v3450_v12 = vrot.slane %v3440_v1, %v6193_v10 }
 0x499   : > { %v3453_v17 = vmul.f32 %v3446_v8, %v3342_v3  ;;  %v3454_v59 = vmul.f32 %v3450_v12, %v3344_v32  ;;  %v3474_v34 = vmul.f32 %v3446_v8, %v5851_v14  ;;  %v3475_v11 = vmul.f32 %v3450_v12, %v5847_v2 }
 0x49a   : > { %v3476_v19 = vmul.f32 %v3446_v8, %v5843_v33  ;;  %v3477_v29 = vmul.f32 %v3450_v12, %v5839_v55  ;;  %v3478_v31 = vmul.f32 %v3446_v8, %v5835_v51  ;;  %v3479_v40 = vmul.f32 %v3450_v12, %v5829_v13 }
 0x49b   : > { %v3457_v5 = vcombine.low %v3453_v17, %v3454_v59  ;;  %v3480_v44 = vmul.f32 %v3446_v8, %v5823_v7  ;;  %v3481_v26 = vmul.f32 %v3450_v12, %v5817_v43  ;;  %v3482_v15 = vmul.f32 %v3446_v8, %v5811_v36 }
 0x49c   : > { %v3483_v14 = vmul.f32 %v3450_v12, %v5806_v20  ;;  %v3484_v2 = vmul.f32 %v3446_v8, %v5801_v41  ;;  %v3485_v33 = vmul.f32 %v3450_v12, %v5795_v25  ;;  %v3486_v51 = vmul.f32 %v3446_v8, %v5791_v24 }
 0x49d   : > { %v3464_v53 = vrot.slane %v3457_v5, %v3430_v27  ;;  %v3487_v13 = vmul.f32 %v3450_v12, %v5785_v60  ;;  %v3488_v7 = vmul.f32 %v3446_v8, %v5780_v21  ;;  %v3489_v43 = vmul.f32 %v3450_v12, %v5775_v49 }
 0x49f   : > { %v3471_v22 = vrot.slane %v3464_v53, %v3430_v27 }
 0x4a1   : > { %v3473_v18 = vsub.f32 %v3441_v63, %v3471_v22 }
 0x4a3   : > { %v3494_v50 = vrot.slane %v3473_v18, %v6192_v35  ;;  %v3498_v55 = vrot.slane %v3473_v18, %v6193_v10 }
 0x4a5   : > { %v3501_v56 = vadd.f32 %v3494_v50, %v3474_v34  ;;  %v3502_v36 = vadd.f32 %v3498_v55, %v3475_v11  ;;  %v3503_v47 = vadd.f32 %v3494_v50, %v3476_v19  ;;  %v3504_v20 = vadd.f32 %v3498_v55, %v3477_v29 }
 0x4a6   : > { %v3505_v16 = vadd.f32 %v3494_v50, %v3478_v31  ;;  %v3506_v41 = vadd.f32 %v3498_v55, %v3479_v40  ;;  %v3507_v6 = vadd.f32 %v3494_v50, %v3480_v44  ;;  %v3508_v25 = vadd.f32 %v3498_v55, %v3481_v26 }
 0x4a7   : > { %v3509_v0 = vadd.f32 %v3494_v50, %v3482_v15  ;;  %v3510_v23 = vadd.f32 %v3498_v55, %v3483_v14  ;;  %v3511_v9 = vadd.f32 %v3494_v50, %v3484_v2  ;;  %v3512_v28 = vadd.f32 %v3498_v55, %v3485_v33 }
 0x4a8   : > { %v3513_v38 = vadd.f32 %v3494_v50, %v3486_v51  ;;  %v3514_v24 = vadd.f32 %v3498_v55, %v3487_v13  ;;  %v3515_v60 = vadd.f32 %v3494_v50, %v3488_v7  ;;  %v3516_v30 = vadd.f32 %v3498_v55, %v3489_v43 }
 0x4a9   : > { %vm3518_vm5 = vcmp.gt.f32.partialorder %v3501_v56, 0.0  ;;  %vm3519_vm7 = vcmp.gt.f32.partialorder %v3502_v36, 0.0  ;;  %vm3520_vm8 = vcmp.gt.f32.partialorder %v3503_v47, 0.0  ;;  %vm3521_vm9 = vcmp.gt.f32.partialorder %v3504_v20, 0.0 }
 0x4aa   : > { %vm3522_vm10 = vcmp.gt.f32.partialorder %v3505_v16, 0.0  ;;  %vm3523_vm11 = vcmp.gt.f32.partialorder %v3506_v41, 0.0  ;;  %vm3524_vm12 = vcmp.gt.f32.partialorder %v3507_v6, 0.0  ;;  %vm3525_vm13 = vcmp.gt.f32.partialorder %v3508_v25, 0.0 }
 0x4ab   : > { %vm3526_vm14 = vcmp.gt.f32.partialorder %v3509_v0, 0.0  ;;  %vm3527_vm15 = vcmp.gt.f32.partialorder %v3510_v23, 0.0  ;;  %vm3528_vm0 = vcmp.gt.f32.partialorder %v3511_v9, 0.0  ;;  %vm3529_vm1 = vcmp.gt.f32.partialorder %v3512_v28, 0.0 }
 0x4ac   : > { %vm3530_vm2 = vcmp.gt.f32.partialorder %v3513_v38, 0.0  ;;  %vm3531_vm3 = vcmp.gt.f32.partialorder %v3514_v24, 0.0  ;;  %vm3532_vm6 = vcmp.gt.f32.partialorder %v3515_v60, 0.0  ;;  %vm3533_vm4 = vcmp.gt.f32.partialorder %v3516_v30, 0.0 }
 0x4ad   : > { %v3535_v49 = vmul.f32 %v5959_v48, %v3501_v56  ;;  %v3536_v21 = vmul.f32 %v5959_v48, %v3502_v36  ;;  %v3537_v45 = vmul.f32 %v5959_v48, %v3503_v47  ;;  %v3538_v4 = vmul.f32 %v5959_v48, %v3504_v20 }
 0x4ae   : > { %v3539_v39 = vmul.f32 %v5959_v48, %v3505_v16  ;;  %v3540_v52 = vmul.f32 %v5959_v48, %v3506_v41  ;;  %v3541_v3 = vmul.f32 %v5959_v48, %v3507_v6  ;;  %v3542_v42 = vmul.f32 %v5959_v48, %v3508_v25 }
 0x4af   : > { %v3543_v32 = vmul.f32 %v5959_v48, %v3509_v0  ;;  %v3544_v54 = vmul.f32 %v5959_v48, %v3510_v23  ;;  %v3545_v57 = vmul.f32 %v5959_v48, %v3511_v9  ;;  %v3546_v27 = vmul.f32 %v5959_v48, %v3512_v28 }
 0x4b0   : > { %v3547_v37 = vmul.f32 %v5959_v48, %v3513_v38  ;;  %v3548_v61 = vmul.f32 %v5959_v48, %v3514_v24  ;;  %v3549_v46 = vmul.f32 %v5959_v48, %v3515_v60  ;;  %v3550_v58 = vmul.f32 %v5959_v48, %v3516_v30 }
 0x4b1   : > { %v3551_v62 = vsel %vm3518_vm5, %v3501_v56, %v3535_v49  ;;  %v3552_v1 = vsel %vm3519_vm7, %v3502_v36, %v3536_v21  ;;  %v3553_v35 = vsel %vm3520_vm8, %v3503_v47, %v3537_v45  ;;  %v3554_v8 = vsel %vm3521_vm9, %v3504_v20, %v3538_v4 }
 0x4b2   : > { %v3555_v10 = vsel %vm3522_vm10, %v3505_v16, %v3539_v39  ;;  %v3556_v12 = vsel %vm3523_vm11, %v3506_v41, %v3540_v52  ;;  %v3557_v17 = vsel %vm3524_vm12, %v3507_v6, %v3541_v3  ;;  %v3558_v59 = vsel %vm3525_vm13, %v3508_v25, %v3542_v42  ;;  %3567 = vst [vmem:[%s5988_s20] sm:$0xff] %v3551_v62 }
 0x4b3   : > { %3568 = vst [vmem:[%s5988_s20 + $0x8] sm:$0xff] %v3552_v1  ;;  %3569 = vst [vmem:[%s5988_s20 + $0x10] sm:$0xff] %v3553_v35  ;;  %v3559_v5 = vsel %vm3526_vm14, %v3509_v0, %v3543_v32  ;;  %v3560_v53 = vsel %vm3527_vm15, %v3510_v23, %v3544_v54  ;;  %v3561_v63 = vsel %vm3528_vm0, %v3511_v9, %v3545_v57 }
 0x4b4   : > { %3570 = vst [vmem:[%s5988_s20 + $0x18] sm:$0xff] %v3554_v8  ;;  %v3562_v22 = vsel %vm3529_vm1, %v3512_v28, %v3546_v27  ;;  %3571 = vst [vmem:[%s5988_s20 + $0x20] sm:$0xff] %v3555_v10  ;;  %v3563_v34 = vsel %vm3530_vm2, %v3513_v38, %v3547_v37  ;;  %v3564_v11 = vsel %vm3531_vm3, %v3514_v24, %v3548_v61 }
 0x4b5   : > { %3572 = vst [vmem:[%s5988_s20 + $0x28] sm:$0xff] %v3556_v12  ;;  %3573 = vst [vmem:[%s5988_s20 + $0x30] sm:$0xff] %v3557_v17  ;;  %v3565_v19 = vsel %vm3532_vm6, %v3515_v60, %v3549_v46  ;;  %v3566_v48 = vsel %vm3533_vm4, %v3516_v30, %v3550_v58 }
 0x4b6   : > { %3574 = vst [vmem:[%s5988_s20 + $0x38] sm:$0xff] %v3558_v59  ;;  %3575 = vst [vmem:[%s5988_s20 + $0x40] sm:$0xff] %v3559_v5 }
 0x4b7   : > { %3576 = vst [vmem:[%s5988_s20 + $0x48] sm:$0xff] %v3560_v53  ;;  %3577 = vst [vmem:[%s5988_s20 + $0x50] sm:$0xff] %v3561_v63 }
 0x4b8   : > { %3578 = vst [vmem:[%s5988_s20 + $0x58] sm:$0xff] %v3562_v22  ;;  %3579 = vst [vmem:[%s5988_s20 + $0x60] sm:$0xff] %v3563_v34 }
 0x4b9   : > { %3580 = vst [vmem:[%s5988_s20 + $0x68] sm:$0xff] %v3564_v11  ;;  %3581 = vst [vmem:[%s5988_s20 + $0x70] sm:$0xff] %v3565_v19 }
 0x4ba   : > { %3582 = vst [vmem:[%s5988_s20 + $0x78] sm:$0xff] %v3566_v48 }
 0x4bb PF: > { %s19_s29 = sadd.s32 1, %s4327_s29  }
 0x4bc   : > { %p16_p4 = scmp.ge.s32.totalorder %s19_s29, 4  }
 0x4be   :  { %18 = sbr.rel (!%p16_p4) target bundleno = 2 (0x2), region = 90 }

</bundles_post_ra>
